<compile_context>
chip_gen: v7x
topology: tpu7x:2x2x1
jax: 0.10.0
libtpu: 0.0.40
codegen_flags: <defaults>
</compile_context>

<pallas_src>
import functools

import jax
import jax.numpy as jnp
from jax import lax
from jax.experimental import pallas as pl
from jax.experimental.pallas import tpu as pltpu

EPS = 1e-5
LANE = 128
_HALO_PAD = 8          # front/back sublane padding of the h1 scratch


def _round_up(c, m=LANE):
    return ((c + m - 1) // m) * m


def _const_spec(shape):
    """BlockSpec for a grid-invariant operand (weights/biases).

    Constant index_map => the block never changes; a single buffer is enough
    (saves one full copy of each weight in VMEM).  Falls back to the default
    double-buffered spec if this JAX version lacks pipeline_mode/Buffered.
    """
    idx = lambda b, t: (0,) * len(shape)
    try:
        return pl.BlockSpec(shape, idx, pipeline_mode=pl.Buffered(1))
    except (TypeError, AttributeError):
        return pl.BlockSpec(shape, idx)


def _vmem_limit_bytes():
    # Derive the scoped-VMEM limit from the hardware instead of hardcoding:
    # ~80% of physical leaves headroom for compiler scratch
    # (v7x: ~51 of 64 MiB; v5e/v6e: ~102 of 128 MiB).
    try:
        cap = pltpu.get_tpu_info().vmem_capacity_bytes
    except Exception:
        cap = 128 * 1024 * 1024
    return int(cap * 0.8)


def _pick_rows_per_tile(H, W):
    """Largest divisor of H such that a spatial tile is <= ~2048 pixels."""
    target_px = 2048
    best = 1
    for th in range(1, H + 1):
        if H % th == 0 and th * W <= max(target_px, W):
            best = th
    return best


def _bottleneck_kernel(H, W, TH,
                       x_ref, xhbm_ref,
                       w1_ref, b1_ref, w2_ref, b2_ref, w3_ref, b3_ref,
                       o_ref,
                       xh_scr, h1s, sem):
    """One (batch, spatial-tile) grid step of the fused Bottleneck."""
    THW = TH * W
    Pp = w1_ref.shape[1]
    cdt = x_ref.dtype
    f32 = jnp.float32
    OFF = _HALO_PAD

    b = pl.program_id(0)
    t = pl.program_id(1)
    n_tiles = pl.num_programs(1)

    # ---- 1. kick off the 2-row x halo fetch (hidden under conv1 below) ----
    # Row indices are clamped at the image boundary; the corresponding h1
    # halo rows are zeroed below, so the clamped data is never used.
    top_row = jnp.maximum(t * TH - 1, 0)
    bot_row = jnp.minimum((t + 1) * TH, H - 1)
    top_cp = pltpu.make_async_copy(
        xhbm_ref.at[b, pl.ds(pl.multiple_of(top_row * W, 8), W), :],
        xh_scr.at[0], sem.at[0])
    bot_cp = pltpu.make_async_copy(
        xhbm_ref.at[b, pl.ds(pl.multiple_of(bot_row * W, 8), W), :],
        xh_scr.at[1], sem.at[1])
    top_cp.start()
    bot_cp.start()

    # ---- 2. conv1 (1x1) + folded bn1 + relu on the central TH rows --------
    h1c = jnp.dot(x_ref[0], w1_ref[...], preferred_element_type=f32)
    h1c = jnp.maximum(h1c + b1_ref[...], 0.0)
    h1s[pl.ds(OFF + W, THW), :] = h1c

    # ---- 3. conv1 recomputed on the two halo rows --------------------------
    top_cp.wait()
    bot_cp.wait()
    h1t = jnp.dot(xh_scr[0], w1_ref[...], preferred_element_type=f32)
    h1t = jnp.maximum(h1t + b1_ref[...], 0.0)           # (W, Pp)
    h1b = jnp.dot(xh_scr[1], w1_ref[...], preferred_element_type=f32)
    h1b = jnp.maximum(h1b + b1_ref[...], 0.0)           # (W, Pp)
    h1s[pl.ds(OFF, W), :] = h1t
    h1s[pl.ds(OFF + (TH + 1) * W, W), :] = h1b

    # Zero-padding of the 3x3 conv at the image top/bottom: zero the halo h1
    # rows of boundary tiles (this replaces all dy masks of the tap loop).
    zero_row = jnp.zeros((W, Pp), f32)

    @pl.when(t == 0)
    def _():
        h1s[pl.ds(OFF, W), :] = zero_row

    @pl.when(t == n_tiles - 1)
    def _():
        h1s[pl.ds(OFF + (TH + 1) * W, W), :] = zero_row

    # The OFF guard rows at either end are only ever read at column-masked
    # output positions; keep them zero anyway (cheap, avoids stale garbage).
    zero_pad = jnp.zeros((OFF, Pp), f32)
    h1s[pl.ds(0, OFF), :] = zero_pad
    h1s[pl.ds(OFF + (TH + 2) * W, OFF), :] = zero_pad

    # ---- 4. conv2 (3x3, stride 1, pad 1) as 9 per-tap MXU accumulations ----
    # Column index (flat_idx mod W) via an exact float-reciprocal trick
    # (avoids vector integer div/mod).  Only dx masks remain: dx=0 taps are
    # invalid at output column 0, dx=2 taps at output column W-1 (the flat
    # shift wraps across row ends).
    lin = lax.broadcasted_iota(jnp.int32, (THW, 1), 0)
    q = jnp.floor((lin.astype(f32) + 0.5) * (1.0 / W)).astype(jnp.int32)
    col = lin - q * W
    mask_l = col > 0
    mask_r = col < (W - 1)

    def tap(dy, dx):
        v = h1s[pl.ds(OFF + dy * W + (dx - 1), THW), :]   # static shifted slice
        if dx == 0:
            v = jnp.where(mask_l, v, 0.0)
        elif dx == 2:
            v = jnp.where(mask_r, v, 0.0)
        return v.astype(cdt)

    acc2 = jnp.dot(tap(1, 1), w2_ref[pl.ds(4 * Pp, Pp), :],
                   preferred_element_type=f32)
    for dy in range(3):
        for dx in range(3):
            if (dy, dx) == (1, 1):
                continue
            k = dy * 3 + dx
            acc2 += jnp.dot(tap(dy, dx), w2_ref[pl.ds(k * Pp, Pp), :],
                            preferred_element_type=f32)
    h2 = jnp.maximum(acc2 + b2_ref[...], 0.0).astype(cdt)

    # ---- 5. conv3 (1x1) + folded bn3 + residual + relu ---------------------
    h3 = jnp.dot(h2, w3_ref[...], preferred_element_type=f32)
    # Residual upcast only in the epilogue (keeps the f32 copy's live range
    # to the end of the step).
    h3 = h3 + b3_ref[...] + x_ref[0].astype(f32)
    o_ref[0] = jnp.maximum(h3, 0.0).astype(o_ref.dtype)


def bottleneck_flat(x_flat, H, W, params, compute_dtype=jnp.bfloat16,
                    rows_per_tile=None, out_dtype=None):
    """One Bottleneck block on channels-last activations (N, H*W, Cp)."""
    w1, b1, w2, b2, w3, b3 = params
    N, HW, Cp = x_flat.shape
    Pp = w1.shape[1]
    assert HW == H * W and w1.shape[0] == Cp and w3.shape == (Pp, Cp)
    assert Cp % LANE == 0 and Pp % LANE == 0
    assert W % 8 == 0, "image width must be sublane-aligned (multiple of 8)"

    if rows_per_tile is None:
        rows_per_tile = _pick_rows_per_tile(H, W)
    TH = int(rows_per_tile)
    assert 1 <= TH <= H and H % TH == 0
    T = H // TH
    THW = TH * W
    out_dtype = compute_dtype if out_dtype is None else out_dtype

    x_flat = x_flat.astype(compute_dtype)
    kernel = functools.partial(_bottleneck_kernel, H, W, TH)

    return pl.pallas_call(
        kernel,
        out_shape=jax.ShapeDtypeStruct((N, HW, Cp), out_dtype),
        grid_spec=pltpu.PrefetchScalarGridSpec(
            num_scalar_prefetch=0,
            grid=(N, T),
            in_specs=[
                pl.BlockSpec((1, THW, Cp), lambda b, t: (b, t, 0)),  # x tile
                pl.BlockSpec(memory_space=pl.ANY),                   # x (HBM, halo)
                _const_spec((Cp, Pp)),       # w1 (bn1 folded)
                _const_spec((1, Pp)),        # b1
                _const_spec((9 * Pp, Pp)),   # w2 (bn2 folded, tap-major rows)
                _const_spec((1, Pp)),        # b2
                _const_spec((Pp, Cp)),       # w3 (bn3 folded)
                _const_spec((1, Cp)),        # b3
            ],
            out_specs=pl.BlockSpec((1, THW, Cp), lambda b, t: (b, t, 0)),
            scratch_shapes=[
                pltpu.VMEM((2, W, Cp), compute_dtype),                # x halo rows
                pltpu.VMEM((2 * _HALO_PAD + (TH + 2) * W, Pp),
                           jnp.float32),                              # haloed h1
                pltpu.SemaphoreType.DMA((2,)),
            ],
        ),
        compiler_params=pltpu.CompilerParams(
            dimension_semantics=("parallel", "parallel"),
            vmem_limit_bytes=_vmem_limit_bytes(),
        ),
    )(x_flat, x_flat,
      w1.astype(compute_dtype), b1,
      w2.astype(compute_dtype), b2,
      w3.astype(compute_dtype), b3)


def bottleneck_pallas(x_nchw, params, compute_dtype=jnp.bfloat16,
                      rows_per_tile=None):
    """x_nchw: (N, Cin, H, W) float32. Returns (N, Cout, H, W) float32.

    NOTE: for chained blocks (23x in own_reslayer_3) call bottleneck_flat
    directly and keep the (N, H*W, Cp) layout between blocks; this wrapper's
    transpose/pad/slice should run once per stage, not once per block.
    """
    w1 = params[0]
    N, Cin, H, W = x_nchw.shape
    Cp = w1.shape[0]
    assert Cp >= Cin

    x = jnp.transpose(x_nchw, (0, 2, 3, 1)).reshape(N, H * W, Cin)
    if Cp > Cin:
        x = jnp.pad(x, ((0, 0), (0, 0), (0, Cp - Cin)))

    out = bottleneck_flat(x, H, W, params, compute_dtype, rows_per_tile)

    out = out.astype(jnp.float32)[:, :, :Cin]
    return jnp.transpose(out.reshape(N, H, W, Cin), (0, 3, 1, 2))


def _fold_bn(gamma, beta, mean, var):
    scale = gamma / jnp.sqrt(var + EPS)
    return scale, beta - mean * scale


def make_params(key, inplanes, planes):
    """Deterministic synthetic parameters (PyTorch OIHW convs + BN stats)."""
    expansion = 4
    cout = planes * expansion
    assert cout == inplanes, "downsample=None requires inplanes == planes * 4"
    ks = jax.random.split(key, 6)
    w1_oihw = 0.2 * jax.random.normal(ks[0], (planes, inplanes, 1, 1), jnp.float32)
    w2_oihw = 0.2 * jax.random.normal(ks[1], (planes, planes, 3, 3), jnp.float32)
    w3_oihw = 0.2 * jax.random.normal(ks[2], (cout, planes, 1, 1), jnp.float32)

    def bn_params(k, c):
        k1, k2, k3, k4 = jax.random.split(k, 4)
        gamma = 1.0 + 0.1 * jax.random.normal(k1, (c,), jnp.float32)
        beta = 0.1 * jax.random.normal(k2, (c,), jnp.float32)
        mean = 0.1 * jax.random.normal(k3, (c,), jnp.float32)
        var = jax.random.uniform(k4, (c,), jnp.float32, 0.5, 1.5)
        return gamma, beta, mean, var

    bn1 = bn_params(ks[3], planes)
    bn2 = bn_params(ks[4], planes)
    bn3 = bn_params(ks[5], cout)
    s1, b1 = _fold_bn(*bn1)
    s2, b2 = _fold_bn(*bn2)
    s3, b3 = _fold_bn(*bn3)

    Cp = _round_up(inplanes)
    Pp = _round_up(planes)

    # Channels-last matmul weights with the BN scale folded in on the host,
    # zero-padded so every matmul dim is a multiple of 128 lanes.
    # (Padding wastes MXU work when planes < 128; this kernel targets the
    # layer3 stage where planes = 256.)
    w1 = jnp.transpose(w1_oihw, (2, 3, 1, 0)).reshape(inplanes, planes) * s1[None, :]
    w1 = jnp.pad(w1, ((0, Cp - inplanes), (0, Pp - planes)))

    w2 = jnp.transpose(w2_oihw, (2, 3, 1, 0)) * s2[None, None, None, :]   # (ky,kx,in,out)
    w2 = jnp.pad(w2, ((0, 0), (0, 0), (0, Pp - planes), (0, Pp - planes)))
    w2 = w2.reshape(9 * Pp, Pp)                                           # tap-major rows

    w3 = jnp.transpose(w3_oihw, (2, 3, 1, 0)).reshape(planes, cout) * s3[None, :]
    w3 = jnp.pad(w3, ((0, Pp - planes), (0, Cp - cout)))

    b1p = jnp.pad(b1, (0, Pp - planes)).reshape(1, Pp)
    b2p = jnp.pad(b2, (0, Pp - planes)).reshape(1, Pp)
    b3p = jnp.pad(b3, (0, Cp - cout)).reshape(1, Cp)

    pallas_params = (w1, b1p, w2, b2p, w3, b3p)

    # HWIO weights + raw BN stats for the pure-JAX reference (PyTorch semantics).
    ref_params = dict(
        w1=jnp.transpose(w1_oihw, (2, 3, 1, 0)),
        w2=jnp.transpose(w2_oihw, (2, 3, 1, 0)),
        w3=jnp.transpose(w3_oihw, (2, 3, 1, 0)),
        bn1=bn1, bn2=bn2, bn3=bn3,
    )
    return pallas_params, ref_params


def bottleneck_reference(x_nchw, rp):
    """Pure-JAX (XLA) reference of the PyTorch forward, eval-mode BN."""
    x = jnp.transpose(x_nchw, (0, 2, 3, 1))  # NHWC

    def conv(h, w_hwio):
        return jax.lax.conv_general_dilated(
            h, w_hwio, (1, 1), "SAME",
            dimension_numbers=("NHWC", "HWIO", "NHWC"))

    def bn(h, p):
        gamma, beta, mean, var = p
        return (h - mean) * gamma / jnp.sqrt(var + EPS) + beta

    out = jax.nn.relu(bn(conv(x, rp["w1"]), rp["bn1"]))
    out = jax.nn.relu(bn(conv(out, rp["w2"]), rp["bn2"]))
    out = bn(conv(out, rp["w3"]), rp["bn3"])
    out = jax.nn.relu(out + x)
    return jnp.transpose(out, (0, 3, 1, 2))


if __name__ == "__main__":
    N, H, W = 2, 16, 16
    planes = 4
    inplanes = planes * 4   # residual add requires Cin == planes*4 (no downsample)

    key = jax.random.PRNGKey(0)
    kx, kp = jax.random.split(key)
    x = jax.random.normal(kx, (N, inplanes, H, W), jnp.float32)
    pallas_params, ref_params = make_params(kp, inplanes, planes)

    y_ref = jax.block_until_ready(bottleneck_reference(x, ref_params))

    # f32 compute, 2 spatial tiles: exercises the halo DMA / boundary logic.
    y32 = jax.block_until_ready(
        bottleneck_pallas(x, pallas_params, compute_dtype=jnp.float32,
                          rows_per_tile=8))
    assert y32.shape == (N, inplanes, H, W)
    assert jnp.allclose(y32, y_ref, rtol=1e-2, atol=1e-2), (
        float(jnp.max(jnp.abs(y32 - y_ref))))

    # f32 compute, single tile (T == 1 degenerate path).
    y32s = jax.block_until_ready(
        bottleneck_pallas(x, pallas_params, compute_dtype=jnp.float32,
                          rows_per_tile=H))
    assert jnp.allclose(y32s, y_ref, rtol=1e-2, atol=1e-2), (
        float(jnp.max(jnp.abs(y32s - y_ref))))

    # bf16 compute path (default / fast): f32 accumulation, looser tolerance.
    ybf = jax.block_until_ready(bottleneck_pallas(x, pallas_params))
    assert ybf.shape == (N, inplanes, H, W)
    assert jnp.allclose(ybf, y_ref, rtol=5e-2, atol=5e-2), (
        float(jnp.max(jnp.abs(ybf - y_ref))))

    print("KERNEL_OK")
</pallas_src>

<mosaic_0001>
module attributes {stable_mosaic.version = 11 : i64} {
  func.func @_bottleneck_kernel(%arg0: i32, %arg1: i32, %arg2: memref<1x128x128xf32, #tpu.memory_space<vmem>>, %arg3: memref<2x256x128xf32, #tpu.memory_space<any>>, %arg4: memref<128x128xf32, #tpu.memory_space<vmem>>, %arg5: memref<1x128xf32, #tpu.memory_space<vmem>>, %arg6: memref<1152x128xf32, #tpu.memory_space<vmem>>, %arg7: memref<1x128xf32, #tpu.memory_space<vmem>>, %arg8: memref<128x128xf32, #tpu.memory_space<vmem>>, %arg9: memref<1x128xf32, #tpu.memory_space<vmem>>, %arg10: memref<1x128x128xf32, #tpu.memory_space<vmem>>, %arg11: memref<2x16x128xf32, #tpu.memory_space<vmem>>, %arg12: memref<176x128xf32, #tpu.memory_space<vmem>>, %arg13: memref<2x!tpu.dma_semaphore, #tpu.memory_space<semaphore_mem>>) attributes {dimension_semantics = [#tpu.dimension_semantics<parallel>, #tpu.dimension_semantics<parallel>], iteration_bounds = array<i64: 2, 2>, scalar_prefetch = 0 : i64, scratch_operands = 3 : i64, tpu.core_type = #tpu.core_type<tc>, window_params = [{transform_indices = @transform_0, window_bounds = array<i64: 1, 128, 128>}, {}, {pipeline_mode = #tpu.pipeline_mode<synchronous>, transform_indices = @transform_2, window_bounds = array<i64: 128, 128>}, {pipeline_mode = #tpu.pipeline_mode<synchronous>, transform_indices = @transform_3, window_bounds = array<i64: 1, 128>}, {pipeline_mode = #tpu.pipeline_mode<synchronous>, transform_indices = @transform_4, window_bounds = array<i64: 1152, 128>}, {pipeline_mode = #tpu.pipeline_mode<synchronous>, transform_indices = @transform_5, window_bounds = array<i64: 1, 128>}, {pipeline_mode = #tpu.pipeline_mode<synchronous>, transform_indices = @transform_6, window_bounds = array<i64: 128, 128>}, {pipeline_mode = #tpu.pipeline_mode<synchronous>, transform_indices = @transform_7, window_bounds = array<i64: 1, 128>}, {transform_indices = @transform_8, window_bounds = array<i64: 1, 128, 128>}]} {
    %c8_i32 = arith.constant 8 : i32
    %0 = arith.muli %arg1, %c8_i32 : i32
    %c1_i32 = arith.constant 1 : i32
    %1 = arith.subi %0, %c1_i32 : i32
    %c0_i32 = arith.constant 0 : i32
    %2 = arith.maxsi %1, %c0_i32 : i32
    %c1_i32_0 = arith.constant 1 : i32
    %3 = arith.addi %arg1, %c1_i32_0 : i32
    %c8_i32_1 = arith.constant 8 : i32
    %4 = arith.muli %3, %c8_i32_1 : i32
    %c15_i32 = arith.constant 15 : i32
    %5 = arith.minsi %4, %c15_i32 : i32
    %c16_i32 = arith.constant 16 : i32
    %6 = arith.muli %2, %c16_i32 : i32
    %7 = tpu.assume_multiple %6, 8 : i32
    %c16_i32_2 = arith.constant 16 : i32
    %8 = arith.muli %5, %c16_i32_2 : i32
    %9 = tpu.assume_multiple %8, 8 : i32
    %c0_i32_3 = arith.constant 0 : i32
    %c0_i32_4 = arith.constant 0 : i32
    %c0_i32_5 = arith.constant 0 : i32
    %10 = tpu.memref_slice %arg3[%arg0, %7, %c0_i32_5] : memref<2x256x128xf32, #tpu.memory_space<any>> -> memref<1x16x128xf32, #tpu.memory_space<any>>
    %11 = tpu.memref_squeeze %10 : memref<1x16x128xf32, #tpu.memory_space<any>> -> memref<16x128xf32, #tpu.memory_space<any>>
    %c0_i32_6 = arith.constant 0 : i32
    %c0_i32_7 = arith.constant 0 : i32
    %12 = tpu.memref_slice %arg11[%c0_i32_3, %c0_i32_6, %c0_i32_7] : memref<2x16x128xf32, #tpu.memory_space<vmem>> -> memref<1x16x128xf32, #tpu.memory_space<vmem>>
    %13 = tpu.memref_squeeze %12 : memref<1x16x128xf32, #tpu.memory_space<vmem>> -> memref<16x128xf32, #tpu.memory_space<vmem>>
    %14 = tpu.memref_slice %arg13[%c0_i32_4] : memref<2x!tpu.dma_semaphore, #tpu.memory_space<semaphore_mem>> -> memref<1x!tpu.dma_semaphore, #tpu.memory_space<semaphore_mem>>
    %15 = tpu.memref_squeeze %14 : memref<1x!tpu.dma_semaphore, #tpu.memory_space<semaphore_mem>> -> memref<!tpu.dma_semaphore, #tpu.memory_space<semaphore_mem>>
    tpu.enqueue_dma source(%11 : memref<16x128xf32, #tpu.memory_space<any>>) target(%13 : memref<16x128xf32, #tpu.memory_space<vmem>>) target_semaphore(%15 : memref<!tpu.dma_semaphore, #tpu.memory_space<semaphore_mem>>)
    %c1_i32_8 = arith.constant 1 : i32
    %c1_i32_9 = arith.constant 1 : i32
    %c0_i32_10 = arith.constant 0 : i32
    %16 = tpu.memref_slice %arg3[%arg0, %9, %c0_i32_10] : memref<2x256x128xf32, #tpu.memory_space<any>> -> memref<1x16x128xf32, #tpu.memory_space<any>>
    %17 = tpu.memref_squeeze %16 : memref<1x16x128xf32, #tpu.memory_space<any>> -> memref<16x128xf32, #tpu.memory_space<any>>
    %c0_i32_11 = arith.constant 0 : i32
    %c0_i32_12 = arith.constant 0 : i32
    %18 = tpu.memref_slice %arg11[%c1_i32_8, %c0_i32_11, %c0_i32_12] : memref<2x16x128xf32, #tpu.memory_space<vmem>> -> memref<1x16x128xf32, #tpu.memory_space<vmem>>
    %19 = tpu.memref_squeeze %18 : memref<1x16x128xf32, #tpu.memory_space<vmem>> -> memref<16x128xf32, #tpu.memory_space<vmem>>
    %20 = tpu.memref_slice %arg13[%c1_i32_9] : memref<2x!tpu.dma_semaphore, #tpu.memory_space<semaphore_mem>> -> memref<1x!tpu.dma_semaphore, #tpu.memory_space<semaphore_mem>>
    %21 = tpu.memref_squeeze %20 : memref<1x!tpu.dma_semaphore, #tpu.memory_space<semaphore_mem>> -> memref<!tpu.dma_semaphore, #tpu.memory_space<semaphore_mem>>
    tpu.enqueue_dma source(%17 : memref<16x128xf32, #tpu.memory_space<any>>) target(%19 : memref<16x128xf32, #tpu.memory_space<vmem>>) target_semaphore(%21 : memref<!tpu.dma_semaphore, #tpu.memory_space<semaphore_mem>>)
    %c0 = arith.constant 0 : index
    %c0_13 = arith.constant 0 : index
    %c0_14 = arith.constant 0 : index
    %22 = vector.load %arg2[%c0, %c0_13, %c0_14] : memref<1x128x128xf32, #tpu.memory_space<vmem>>, vector<1x128x128xf32>
    %23 = vector.shape_cast %22 : vector<1x128x128xf32> to vector<128x128xf32>
    %c0_15 = arith.constant 0 : index
    %c0_16 = arith.constant 0 : index
    %24 = vector.load %arg4[%c0_15, %c0_16] : memref<128x128xf32, #tpu.memory_space<vmem>>, vector<128x128xf32>
    %cst = arith.constant dense<0.000000e+00> : vector<128x128xf32>
    %25 = tpu.matmul %23, %24, %cst {dimension_numbers = #tpu.dot_dimension_numbers<[1], [0], [0], [1], [0, 0, 1, 1], [], []>} : vector<128x128xf32>, vector<128x128xf32>, vector<128x128xf32> -> vector<128x128xf32>
    %c0_17 = arith.constant 0 : index
    %c0_18 = arith.constant 0 : index
    %26 = vector.load %arg5[%c0_17, %c0_18] : memref<1x128xf32, #tpu.memory_space<vmem>>, vector<1x128xf32>
    %27 = vector.broadcast %26 : vector<1x128xf32> to vector<128x128xf32>
    %28 = arith.addf %25, %27 : vector<128x128xf32>
    %cst_19 = arith.constant 0.000000e+00 : f32
    %29 = vector.broadcast %cst_19 : f32 to vector<128x128xf32>
    %30 = arith.maximumf %28, %29 : vector<128x128xf32>
    %c24 = arith.constant 24 : index
    %c0_20 = arith.constant 0 : index
    %31 = vector.load %arg12[%c24, %c0_20] : memref<176x128xf32, #tpu.memory_space<vmem>>, vector<128x128xf32>
    tpu.vector_store %arg12[%c24, %c0_20], %30 {strides = array<i32>} : memref<176x128xf32, #tpu.memory_space<vmem>>, vector<128x128xf32>,
    %c0_i32_21 = arith.constant 0 : i32
    %c0_i32_22 = arith.constant 0 : i32
    %c0_i32_23 = arith.constant 0 : i32
    %32 = tpu.memref_slice %arg3[%arg0, %7, %c0_i32_23] : memref<2x256x128xf32, #tpu.memory_space<any>> -> memref<1x16x128xf32, #tpu.memory_space<any>>
    %33 = tpu.memref_squeeze %32 : memref<1x16x128xf32, #tpu.memory_space<any>> -> memref<16x128xf32, #tpu.memory_space<any>>
    %c0_i32_24 = arith.constant 0 : i32
    %c0_i32_25 = arith.constant 0 : i32
    %34 = tpu.memref_slice %arg11[%c0_i32_21, %c0_i32_24, %c0_i32_25] : memref<2x16x128xf32, #tpu.memory_space<vmem>> -> memref<1x16x128xf32, #tpu.memory_space<vmem>>
    %35 = tpu.memref_squeeze %34 : memref<1x16x128xf32, #tpu.memory_space<vmem>> -> memref<16x128xf32, #tpu.memory_space<vmem>>
    %36 = tpu.memref_slice %arg13[%c0_i32_22] : memref<2x!tpu.dma_semaphore, #tpu.memory_space<semaphore_mem>> -> memref<1x!tpu.dma_semaphore, #tpu.memory_space<semaphore_mem>>
    %37 = tpu.memref_squeeze %36 : memref<1x!tpu.dma_semaphore, #tpu.memory_space<semaphore_mem>> -> memref<!tpu.dma_semaphore, #tpu.memory_space<semaphore_mem>>
    tpu.wait_dma2 semaphore(%37 : memref<!tpu.dma_semaphore, #tpu.memory_space<semaphore_mem>>) src(%33 : memref<16x128xf32, #tpu.memory_space<any>>) dst(%35 : memref<16x128xf32, #tpu.memory_space<vmem>>)
    %c1_i32_26 = arith.constant 1 : i32
    %c1_i32_27 = arith.constant 1 : i32
    %c0_i32_28 = arith.constant 0 : i32
    %38 = tpu.memref_slice %arg3[%arg0, %9, %c0_i32_28] : memref<2x256x128xf32, #tpu.memory_space<any>> -> memref<1x16x128xf32, #tpu.memory_space<any>>
    %39 = tpu.memref_squeeze %38 : memref<1x16x128xf32, #tpu.memory_space<any>> -> memref<16x128xf32, #tpu.memory_space<any>>
    %c0_i32_29 = arith.constant 0 : i32
    %c0_i32_30 = arith.constant 0 : i32
    %40 = tpu.memref_slice %arg11[%c1_i32_26, %c0_i32_29, %c0_i32_30] : memref<2x16x128xf32, #tpu.memory_space<vmem>> -> memref<1x16x128xf32, #tpu.memory_space<vmem>>
    %41 = tpu.memref_squeeze %40 : memref<1x16x128xf32, #tpu.memory_space<vmem>> -> memref<16x128xf32, #tpu.memory_space<vmem>>
    %42 = tpu.memref_slice %arg13[%c1_i32_27] : memref<2x!tpu.dma_semaphore, #tpu.memory_space<semaphore_mem>> -> memref<1x!tpu.dma_semaphore, #tpu.memory_space<semaphore_mem>>
    %43 = tpu.memref_squeeze %42 : memref<1x!tpu.dma_semaphore, #tpu.memory_space<semaphore_mem>> -> memref<!tpu.dma_semaphore, #tpu.memory_space<semaphore_mem>>
    tpu.wait_dma2 semaphore(%43 : memref<!tpu.dma_semaphore, #tpu.memory_space<semaphore_mem>>) src(%39 : memref<16x128xf32, #tpu.memory_space<any>>) dst(%41 : memref<16x128xf32, #tpu.memory_space<vmem>>)
    %c0_31 = arith.constant 0 : index
    %c0_32 = arith.constant 0 : index
    %c0_33 = arith.constant 0 : index
    %44 = vector.load %arg11[%c0_31, %c0_32, %c0_33] : memref<2x16x128xf32, #tpu.memory_space<vmem>>, vector<1x16x128xf32>
    %45 = vector.shape_cast %44 : vector<1x16x128xf32> to vector<16x128xf32>
    %c0_34 = arith.constant 0 : index
    %c0_35 = arith.constant 0 : index
    %46 = vector.load %arg4[%c0_34, %c0_35] : memref<128x128xf32, #tpu.memory_space<vmem>>, vector<128x128xf32>
    %cst_36 = arith.constant dense<0.000000e+00> : vector<16x128xf32>
    %47 = tpu.matmul %45, %46, %cst_36 {dimension_numbers = #tpu.dot_dimension_numbers<[1], [0], [0], [1], [0, 0, 1, 1], [], []>} : vector<16x128xf32>, vector<128x128xf32>, vector<16x128xf32> -> vector<16x128xf32>
    %c0_37 = arith.constant 0 : index
    %c0_38 = arith.constant 0 : index
    %48 = vector.load %arg5[%c0_37, %c0_38] : memref<1x128xf32, #tpu.memory_space<vmem>>, vector<1x128xf32>
    %49 = vector.broadcast %48 : vector<1x128xf32> to vector<16x128xf32>
    %50 = arith.addf %47, %49 : vector<16x128xf32>
    %cst_39 = arith.constant 0.000000e+00 : f32
    %51 = vector.broadcast %cst_39 : f32 to vector<16x128xf32>
    %52 = arith.maximumf %50, %51 : vector<16x128xf32>
    %c1 = arith.constant 1 : index
    %c0_40 = arith.constant 0 : index
    %c0_41 = arith.constant 0 : index
    %53 = vector.load %arg11[%c1, %c0_40, %c0_41] : memref<2x16x128xf32, #tpu.memory_space<vmem>>, vector<1x16x128xf32>
    %54 = vector.shape_cast %53 : vector<1x16x128xf32> to vector<16x128xf32>
    %c0_42 = arith.constant 0 : index
    %c0_43 = arith.constant 0 : index
    %55 = vector.load %arg4[%c0_42, %c0_43] : memref<128x128xf32, #tpu.memory_space<vmem>>, vector<128x128xf32>
    %cst_44 = arith.constant dense<0.000000e+00> : vector<16x128xf32>
    %56 = tpu.matmul %54, %55, %cst_44 {dimension_numbers = #tpu.dot_dimension_numbers<[1], [0], [0], [1], [0, 0, 1, 1], [], []>} : vector<16x128xf32>, vector<128x128xf32>, vector<16x128xf32> -> vector<16x128xf32>
    %c0_45 = arith.constant 0 : index
    %c0_46 = arith.constant 0 : index
    %57 = vector.load %arg5[%c0_45, %c0_46] : memref<1x128xf32, #tpu.memory_space<vmem>>, vector<1x128xf32>
    %58 = vector.broadcast %57 : vector<1x128xf32> to vector<16x128xf32>
    %59 = arith.addf %56, %58 : vector<16x128xf32>
    %cst_47 = arith.constant 0.000000e+00 : f32
    %60 = vector.broadcast %cst_47 : f32 to vector<16x128xf32>
    %61 = arith.maximumf %59, %60 : vector<16x128xf32>
    %c8 = arith.constant 8 : index
    %c0_48 = arith.constant 0 : index
    %62 = vector.load %arg12[%c8, %c0_48] : memref<176x128xf32, #tpu.memory_space<vmem>>, vector<16x128xf32>
    tpu.vector_store %arg12[%c8, %c0_48], %52 {strides = array<i32>} : memref<176x128xf32, #tpu.memory_space<vmem>>, vector<16x128xf32>,
    %c152 = arith.constant 152 : index
    %c0_49 = arith.constant 0 : index
    %63 = vector.load %arg12[%c152, %c0_49] : memref<176x128xf32, #tpu.memory_space<vmem>>, vector<16x128xf32>
    tpu.vector_store %arg12[%c152, %c0_49], %61 {strides = array<i32>} : memref<176x128xf32, #tpu.memory_space<vmem>>, vector<16x128xf32>,
    %cst_50 = arith.constant 0.000000e+00 : f32
    %64 = vector.broadcast %cst_50 : f32 to vector<16x128xf32>
    %c0_i32_51 = arith.constant 0 : i32
    %65 = arith.cmpi eq, %arg1, %c0_i32_51 : i32
    %66 = arith.extui %65 : i1 to i32
    %c0_i32_52 = arith.constant 0 : i32
    %67 = arith.cmpi ne, %66, %c0_i32_52 : i32
    scf.if %67 {
      %c8_115 = arith.constant 8 : index
      %c0_116 = arith.constant 0 : index
      %166 = vector.load %arg12[%c8_115, %c0_116] : memref<176x128xf32, #tpu.memory_space<vmem>>, vector<16x128xf32>
      tpu.vector_store %arg12[%c8_115, %c0_116], %64 {strides = array<i32>} : memref<176x128xf32, #tpu.memory_space<vmem>>, vector<16x128xf32>,
    } else {
    }
    %c1_i32_53 = arith.constant 1 : i32
    %68 = arith.cmpi eq, %arg1, %c1_i32_53 : i32
    %69 = arith.extui %68 : i1 to i32
    %c0_i32_54 = arith.constant 0 : i32
    %70 = arith.cmpi ne, %69, %c0_i32_54 : i32
    scf.if %70 {
      %c152_115 = arith.constant 152 : index
      %c0_116 = arith.constant 0 : index
      %166 = vector.load %arg12[%c152_115, %c0_116] : memref<176x128xf32, #tpu.memory_space<vmem>>, vector<16x128xf32>
      tpu.vector_store %arg12[%c152_115, %c0_116], %64 {strides = array<i32>} : memref<176x128xf32, #tpu.memory_space<vmem>>, vector<16x128xf32>,
    } else {
    }
    %cst_55 = arith.constant 0.000000e+00 : f32
    %71 = vector.broadcast %cst_55 : f32 to vector<8x128xf32>
    %c0_56 = arith.constant 0 : index
    %c0_57 = arith.constant 0 : index
    %72 = vector.load %arg12[%c0_56, %c0_57] : memref<176x128xf32, #tpu.memory_space<vmem>>, vector<8x128xf32>
    tpu.vector_store %arg12[%c0_56, %c0_57], %71 {strides = array<i32>} : memref<176x128xf32, #tpu.memory_space<vmem>>, vector<8x128xf32>,
    %c168 = arith.constant 168 : index
    %c0_58 = arith.constant 0 : index
    %73 = vector.load %arg12[%c168, %c0_58] : memref<176x128xf32, #tpu.memory_space<vmem>>, vector<8x128xf32>
    tpu.vector_store %arg12[%c168, %c0_58], %71 {strides = array<i32>} : memref<176x128xf32, #tpu.memory_space<vmem>>, vector<8x128xf32>,
    %74 = tpu.iota {dimensions = array<i32: 0>} : vector<128x1xi32>
    %75 = arith.sitofp %74 : vector<128x1xi32> to vector<128x1xf32>
    %cst_59 = arith.constant 5.000000e-01 : f32
    %76 = vector.broadcast %cst_59 : f32 to vector<128x1xf32>
    %77 = arith.addf %75, %76 : vector<128x1xf32>
    %cst_60 = arith.constant 6.250000e-02 : f32
    %78 = vector.broadcast %cst_60 : f32 to vector<128x1xf32>
    %79 = arith.mulf %77, %78 : vector<128x1xf32>
    %80 = math.floor %79 : vector<128x1xf32>
    %81 = arith.fptosi %80 : vector<128x1xf32> to vector<128x1xi32>
    %c16_i32_61 = arith.constant 16 : i32
    %82 = vector.broadcast %c16_i32_61 : i32 to vector<128x1xi32>
    %83 = arith.muli %81, %82 : vector<128x1xi32>
    %84 = arith.subi %74, %83 : vector<128x1xi32>
    %c0_i32_62 = arith.constant 0 : i32
    %85 = vector.broadcast %c0_i32_62 : i32 to vector<128x1xi32>
    %86 = arith.cmpi sgt, %84, %85 : vector<128x1xi32>
    %c15_i32_63 = arith.constant 15 : i32
    %87 = vector.broadcast %c15_i32_63 : i32 to vector<128x1xi32>
    %88 = arith.cmpi slt, %84, %87 : vector<128x1xi32>
    %c24_64 = arith.constant 24 : index
    %c0_65 = arith.constant 0 : index
    %89 = vector.load %arg12[%c24_64, %c0_65] : memref<176x128xf32, #tpu.memory_space<vmem>>, vector<128x128xf32>
    %c512 = arith.constant 512 : index
    %c0_66 = arith.constant 0 : index
    %90 = vector.load %arg6[%c512, %c0_66] : memref<1152x128xf32, #tpu.memory_space<vmem>>, vector<128x128xf32>
    %cst_67 = arith.constant dense<0.000000e+00> : vector<128x128xf32>
    %91 = tpu.matmul %89, %90, %cst_67 {dimension_numbers = #tpu.dot_dimension_numbers<[1], [0], [0], [1], [0, 0, 1, 1], [], []>} : vector<128x128xf32>, vector<128x128xf32>, vector<128x128xf32> -> vector<128x128xf32>
    %c7 = arith.constant 7 : index
    %c0_68 = arith.constant 0 : index
    %92 = vector.load %arg12[%c7, %c0_68] : memref<176x128xf32, #tpu.memory_space<vmem>>, vector<128x128xf32>
    %cst_69 = arith.constant 0.000000e+00 : f32
    %93 = vector.shape_cast %86 : vector<128x1xi1> to vector<128x1xi1>
    %94 = vector.broadcast %93 : vector<128x1xi1> to vector<128x128xi1>
    %95 = vector.broadcast %cst_69 : f32 to vector<128x128xf32>
    %96 = arith.select %94, %92, %95 : vector<128x128xi1>, vector<128x128xf32>
    %c0_70 = arith.constant 0 : index
    %c0_71 = arith.constant 0 : index
    %97 = vector.load %arg6[%c0_70, %c0_71] : memref<1152x128xf32, #tpu.memory_space<vmem>>, vector<128x128xf32>
    %cst_72 = arith.constant dense<0.000000e+00> : vector<128x128xf32>
    %98 = tpu.matmul %96, %97, %cst_72 {dimension_numbers = #tpu.dot_dimension_numbers<[1], [0], [0], [1], [0, 0, 1, 1], [], []>} : vector<128x128xf32>, vector<128x128xf32>, vector<128x128xf32> -> vector<128x128xf32>
    %99 = arith.addf %91, %98 : vector<128x128xf32>
    %c8_73 = arith.constant 8 : index
    %c0_74 = arith.constant 0 : index
    %100 = vector.load %arg12[%c8_73, %c0_74] : memref<176x128xf32, #tpu.memory_space<vmem>>, vector<128x128xf32>
    %c128 = arith.constant 128 : index
    %c0_75 = arith.constant 0 : index
    %101 = vector.load %arg6[%c128, %c0_75] : memref<1152x128xf32, #tpu.memory_space<vmem>>, vector<128x128xf32>
    %cst_76 = arith.constant dense<0.000000e+00> : vector<128x128xf32>
    %102 = tpu.matmul %100, %101, %cst_76 {dimension_numbers = #tpu.dot_dimension_numbers<[1], [0], [0], [1], [0, 0, 1, 1], [], []>} : vector<128x128xf32>, vector<128x128xf32>, vector<128x128xf32> -> vector<128x128xf32>
    %103 = arith.addf %99, %102 : vector<128x128xf32>
    %c9 = arith.constant 9 : index
    %c0_77 = arith.constant 0 : index
    %104 = vector.load %arg12[%c9, %c0_77] : memref<176x128xf32, #tpu.memory_space<vmem>>, vector<128x128xf32>
    %cst_78 = arith.constant 0.000000e+00 : f32
    %105 = vector.shape_cast %88 : vector<128x1xi1> to vector<128x1xi1>
    %106 = vector.broadcast %105 : vector<128x1xi1> to vector<128x128xi1>
    %107 = vector.broadcast %cst_78 : f32 to vector<128x128xf32>
    %108 = arith.select %106, %104, %107 : vector<128x128xi1>, vector<128x128xf32>
    %c256 = arith.constant 256 : index
    %c0_79 = arith.constant 0 : index
    %109 = vector.load %arg6[%c256, %c0_79] : memref<1152x128xf32, #tpu.memory_space<vmem>>, vector<128x128xf32>
    %cst_80 = arith.constant dense<0.000000e+00> : vector<128x128xf32>
    %110 = tpu.matmul %108, %109, %cst_80 {dimension_numbers = #tpu.dot_dimension_numbers<[1], [0], [0], [1], [0, 0, 1, 1], [], []>} : vector<128x128xf32>, vector<128x128xf32>, vector<128x128xf32> -> vector<128x128xf32>
    %111 = arith.addf %103, %110 : vector<128x128xf32>
    %c23 = arith.constant 23 : index
    %c0_81 = arith.constant 0 : index
    %112 = vector.load %arg12[%c23, %c0_81] : memref<176x128xf32, #tpu.memory_space<vmem>>, vector<128x128xf32>
    %cst_82 = arith.constant 0.000000e+00 : f32
    %113 = vector.shape_cast %86 : vector<128x1xi1> to vector<128x1xi1>
    %114 = vector.broadcast %113 : vector<128x1xi1> to vector<128x128xi1>
    %115 = vector.broadcast %cst_82 : f32 to vector<128x128xf32>
    %116 = arith.select %114, %112, %115 : vector<128x128xi1>, vector<128x128xf32>
    %c384 = arith.constant 384 : index
    %c0_83 = arith.constant 0 : index
    %117 = vector.load %arg6[%c384, %c0_83] : memref<1152x128xf32, #tpu.memory_space<vmem>>, vector<128x128xf32>
    %cst_84 = arith.constant dense<0.000000e+00> : vector<128x128xf32>
    %118 = tpu.matmul %116, %117, %cst_84 {dimension_numbers = #tpu.dot_dimension_numbers<[1], [0], [0], [1], [0, 0, 1, 1], [], []>} : vector<128x128xf32>, vector<128x128xf32>, vector<128x128xf32> -> vector<128x128xf32>
    %119 = arith.addf %111, %118 : vector<128x128xf32>
    %c25 = arith.constant 25 : index
    %c0_85 = arith.constant 0 : index
    %120 = vector.load %arg12[%c25, %c0_85] : memref<176x128xf32, #tpu.memory_space<vmem>>, vector<128x128xf32>
    %cst_86 = arith.constant 0.000000e+00 : f32
    %121 = vector.shape_cast %88 : vector<128x1xi1> to vector<128x1xi1>
    %122 = vector.broadcast %121 : vector<128x1xi1> to vector<128x128xi1>
    %123 = vector.broadcast %cst_86 : f32 to vector<128x128xf32>
    %124 = arith.select %122, %120, %123 : vector<128x128xi1>, vector<128x128xf32>
    %c640 = arith.constant 640 : index
    %c0_87 = arith.constant 0 : index
    %125 = vector.load %arg6[%c640, %c0_87] : memref<1152x128xf32, #tpu.memory_space<vmem>>, vector<128x128xf32>
    %cst_88 = arith.constant dense<0.000000e+00> : vector<128x128xf32>
    %126 = tpu.matmul %124, %125, %cst_88 {dimension_numbers = #tpu.dot_dimension_numbers<[1], [0], [0], [1], [0, 0, 1, 1], [], []>} : vector<128x128xf32>, vector<128x128xf32>, vector<128x128xf32> -> vector<128x128xf32>
    %127 = arith.addf %119, %126 : vector<128x128xf32>
    %c39 = arith.constant 39 : index
    %c0_89 = arith.constant 0 : index
    %128 = vector.load %arg12[%c39, %c0_89] : memref<176x128xf32, #tpu.memory_space<vmem>>, vector<128x128xf32>
    %cst_90 = arith.constant 0.000000e+00 : f32
    %129 = vector.shape_cast %86 : vector<128x1xi1> to vector<128x1xi1>
    %130 = vector.broadcast %129 : vector<128x1xi1> to vector<128x128xi1>
    %131 = vector.broadcast %cst_90 : f32 to vector<128x128xf32>
    %132 = arith.select %130, %128, %131 : vector<128x128xi1>, vector<128x128xf32>
    %c768 = arith.constant 768 : index
    %c0_91 = arith.constant 0 : index
    %133 = vector.load %arg6[%c768, %c0_91] : memref<1152x128xf32, #tpu.memory_space<vmem>>, vector<128x128xf32>
    %cst_92 = arith.constant dense<0.000000e+00> : vector<128x128xf32>
    %134 = tpu.matmul %132, %133, %cst_92 {dimension_numbers = #tpu.dot_dimension_numbers<[1], [0], [0], [1], [0, 0, 1, 1], [], []>} : vector<128x128xf32>, vector<128x128xf32>, vector<128x128xf32> -> vector<128x128xf32>
    %135 = arith.addf %127, %134 : vector<128x128xf32>
    %c40 = arith.constant 40 : index
    %c0_93 = arith.constant 0 : index
    %136 = vector.load %arg12[%c40, %c0_93] : memref<176x128xf32, #tpu.memory_space<vmem>>, vector<128x128xf32>
    %c896 = arith.constant 896 : index
    %c0_94 = arith.constant 0 : index
    %137 = vector.load %arg6[%c896, %c0_94] : memref<1152x128xf32, #tpu.memory_space<vmem>>, vector<128x128xf32>
    %cst_95 = arith.constant dense<0.000000e+00> : vector<128x128xf32>
    %138 = tpu.matmul %136, %137, %cst_95 {dimension_numbers = #tpu.dot_dimension_numbers<[1], [0], [0], [1], [0, 0, 1, 1], [], []>} : vector<128x128xf32>, vector<128x128xf32>, vector<128x128xf32> -> vector<128x128xf32>
    %139 = arith.addf %135, %138 : vector<128x128xf32>
    %c41 = arith.constant 41 : index
    %c0_96 = arith.constant 0 : index
    %140 = vector.load %arg12[%c41, %c0_96] : memref<176x128xf32, #tpu.memory_space<vmem>>, vector<128x128xf32>
    %cst_97 = arith.constant 0.000000e+00 : f32
    %141 = vector.shape_cast %88 : vector<128x1xi1> to vector<128x1xi1>
    %142 = vector.broadcast %141 : vector<128x1xi1> to vector<128x128xi1>
    %143 = vector.broadcast %cst_97 : f32 to vector<128x128xf32>
    %144 = arith.select %142, %140, %143 : vector<128x128xi1>, vector<128x128xf32>
    %c1024 = arith.constant 1024 : index
    %c0_98 = arith.constant 0 : index
    %145 = vector.load %arg6[%c1024, %c0_98] : memref<1152x128xf32, #tpu.memory_space<vmem>>, vector<128x128xf32>
    %cst_99 = arith.constant dense<0.000000e+00> : vector<128x128xf32>
    %146 = tpu.matmul %144, %145, %cst_99 {dimension_numbers = #tpu.dot_dimension_numbers<[1], [0], [0], [1], [0, 0, 1, 1], [], []>} : vector<128x128xf32>, vector<128x128xf32>, vector<128x128xf32> -> vector<128x128xf32>
    %147 = arith.addf %139, %146 : vector<128x128xf32>
    %c0_100 = arith.constant 0 : index
    %c0_101 = arith.constant 0 : index
    %148 = vector.load %arg7[%c0_100, %c0_101] : memref<1x128xf32, #tpu.memory_space<vmem>>, vector<1x128xf32>
    %149 = vector.broadcast %148 : vector<1x128xf32> to vector<128x128xf32>
    %150 = arith.addf %147, %149 : vector<128x128xf32>
    %cst_102 = arith.constant 0.000000e+00 : f32
    %151 = vector.broadcast %cst_102 : f32 to vector<128x128xf32>
    %152 = arith.maximumf %150, %151 : vector<128x128xf32>
    %c0_103 = arith.constant 0 : index
    %c0_104 = arith.constant 0 : index
    %153 = vector.load %arg8[%c0_103, %c0_104] : memref<128x128xf32, #tpu.memory_space<vmem>>, vector<128x128xf32>
    %cst_105 = arith.constant dense<0.000000e+00> : vector<128x128xf32>
    %154 = tpu.matmul %152, %153, %cst_105 {dimension_numbers = #tpu.dot_dimension_numbers<[1], [0], [0], [1], [0, 0, 1, 1], [], []>} : vector<128x128xf32>, vector<128x128xf32>, vector<128x128xf32> -> vector<128x128xf32>
    %c0_106 = arith.constant 0 : index
    %c0_107 = arith.constant 0 : index
    %155 = vector.load %arg9[%c0_106, %c0_107] : memref<1x128xf32, #tpu.memory_space<vmem>>, vector<1x128xf32>
    %156 = vector.broadcast %155 : vector<1x128xf32> to vector<128x128xf32>
    %157 = arith.addf %154, %156 : vector<128x128xf32>
    %c0_108 = arith.constant 0 : index
    %c0_109 = arith.constant 0 : index
    %c0_110 = arith.constant 0 : index
    %158 = vector.load %arg2[%c0_108, %c0_109, %c0_110] : memref<1x128x128xf32, #tpu.memory_space<vmem>>, vector<1x128x128xf32>
    %159 = vector.shape_cast %158 : vector<1x128x128xf32> to vector<128x128xf32>
    %160 = arith.addf %157, %159 : vector<128x128xf32>
    %cst_111 = arith.constant 0.000000e+00 : f32
    %161 = vector.broadcast %cst_111 : f32 to vector<128x128xf32>
    %162 = arith.maximumf %160, %161 : vector<128x128xf32>
    %c0_112 = arith.constant 0 : index
    %c0_113 = arith.constant 0 : index
    %c0_114 = arith.constant 0 : index
    %163 = vector.load %arg10[%c0_112, %c0_113, %c0_114] : memref<1x128x128xf32, #tpu.memory_space<vmem>>, vector<1x128x128xf32>
    %164 = vector.shape_cast %163 : vector<1x128x128xf32> to vector<128x128xf32>
    %165 = vector.shape_cast %162 : vector<128x128xf32> to vector<1x128x128xf32>
    tpu.vector_store %arg10[%c0_112, %c0_113, %c0_114], %165 {strides = array<i32>} : memref<1x128x128xf32, #tpu.memory_space<vmem>>, vector<1x128x128xf32>,
    return
  }
  func.func @transform_0(%arg0: i32, %arg1: i32) -> (i32, i32, i32) {
    %c0_i32 = arith.constant 0 : i32
    %c0_i32_0 = arith.constant 0 : i32
    return %arg0, %arg1, %c0_i32 : i32, i32, i32
  }
  func.func @transform_2(%arg0: i32, %arg1: i32) -> (i32, i32) {
    %c0_i32 = arith.constant 0 : i32
    %c0_i32_0 = arith.constant 0 : i32
    %c0_i32_1 = arith.constant 0 : i32
    return %c0_i32, %c0_i32_0 : i32, i32
  }
  func.func @transform_3(%arg0: i32, %arg1: i32) -> (i32, i32) {
    %c0_i32 = arith.constant 0 : i32
    %c0_i32_0 = arith.constant 0 : i32
    %c0_i32_1 = arith.constant 0 : i32
    return %c0_i32, %c0_i32_0 : i32, i32
  }
  func.func @transform_4(%arg0: i32, %arg1: i32) -> (i32, i32) {
    %c0_i32 = arith.constant 0 : i32
    %c0_i32_0 = arith.constant 0 : i32
    %c0_i32_1 = arith.constant 0 : i32
    return %c0_i32, %c0_i32_0 : i32, i32
  }
  func.func @transform_5(%arg0: i32, %arg1: i32) -> (i32, i32) {
    %c0_i32 = arith.constant 0 : i32
    %c0_i32_0 = arith.constant 0 : i32
    %c0_i32_1 = arith.constant 0 : i32
    return %c0_i32, %c0_i32_0 : i32, i32
  }
  func.func @transform_6(%arg0: i32, %arg1: i32) -> (i32, i32) {
    %c0_i32 = arith.constant 0 : i32
    %c0_i32_0 = arith.constant 0 : i32
    %c0_i32_1 = arith.constant 0 : i32
    return %c0_i32, %c0_i32_0 : i32, i32
  }
  func.func @transform_7(%arg0: i32, %arg1: i32) -> (i32, i32) {
    %c0_i32 = arith.constant 0 : i32
    %c0_i32_0 = arith.constant 0 : i32
    %c0_i32_1 = arith.constant 0 : i32
    return %c0_i32, %c0_i32_0 : i32, i32
  }
  func.func @transform_8(%arg0: i32, %arg1: i32) -> (i32, i32, i32) {
    %c0_i32 = arith.constant 0 : i32
    %c0_i32_0 = arith.constant 0 : i32
    return %arg0, %arg1, %c0_i32 : i32, i32, i32
  }
}

</mosaic_0001>

<bundles_post_ra>
// kernel: tpu_custom_call.1
= control target key start
LH: loop header
LB: loop body
LE: loop exit
PB: predicated region body
PF: predicated region fallthrough
CT: control target
= control target key end

     0   :  { %s6768_s0 = inlined_call_operand.hbm [shape: f32[2,256,128], index: 0, kind: input, shape index: {}]   ;;  %s6769_s1 = inlined_call_operand.hbm [shape: f32[2,256,128], index: 1, kind: input, shape index: {}]   ;;  %s6770_s2 = inlined_call_operand.hbm [shape: f32[128,128], index: 2, kind: input, shape index: {}]   ;;  %s6771_s3 = inlined_call_operand.hbm [shape: f32[1,128], index: 3, kind: input, shape index: {}]   ;;  %s6772_s4 = inlined_call_operand.hbm [shape: f32[1152,128], index: 4, kind: input, shape index: {}]   ;;  %s6773_s5 = inlined_call_operand.hbm [shape: f32[1,128], index: 5, kind: input, shape index: {}]   ;;  %s6774_s6 = inlined_call_operand.hbm [shape: f32[128,128], index: 6, kind: input, shape index: {}]   ;;  %s6775_s7 = inlined_call_operand.hbm [shape: f32[1,128], index: 7, kind: input, shape index: {}]   ;;  %s6776_s8 = inlined_call_operand.hbm [shape: f32[2,256,128], index: 8, kind: output, shape index: {}]  }
   0x1   :  { %6810 = sst [smem:[#allocation35_spill]] %s6768_s0 }
   0x2   :  { %6811 = sst [smem:[#allocation36_spill]] %s6769_s1 }
   0x3   :  { %6812 = sst [smem:[#allocation37_spill]] %s6770_s2 }
   0x4   :  { %6813 = sst [smem:[#allocation38_spill]] %s6771_s3 }
   0x5   :  { %6814 = sst [smem:[#allocation39_spill]] %s6772_s4 }
   0x6   :  { %6815 = sst [smem:[#allocation40_spill]] %s6773_s5 }
   0x7   :  { %6816 = sst [smem:[#allocation41_spill]] %s6774_s6 }
   0x8   :  { %6817 = sst [smem:[#allocation42_spill]] %s6775_s7 }
   0x9   :  { %6818 = sst [smem:[#allocation43_spill]] %s6776_s8 }
   0xa   :  { %13 = vsyncpa [#allocation6], 0 }
   0xb   :  { %15 = vsyncpa [#allocation6 + $0x1], 0 }
   0xc   :  { %16 = vsyncpa [#allocation9], 0 }
   0xd   :  { %17 = vsyncpa [#allocation12], 0 }
   0xe   :  { %18 = vsyncpa [#allocation15], 0 }
   0xf   :  { %19 = vsyncpa [#allocation7], 0 }
  0x10   :  { %21 = vsyncpa [#allocation7 + $0x1], 0  ;;  %s5708_s27 = smov 0   ;;  %s5710_s28 = smov 0  }
  0x11   :  { %s5712_s29 = smov 0   ;;  %s5714_s30 = smov 0  }
  0x12   :  { %s5716_s9 = smov 0   ;;  %s5718_s10 = smov 0  }
  0x13   :  { %s5720_s11 = smov 0   ;;  %s5722_s12 = smov 0  }
  0x14 LB: > { %6819 = sst [smem:[#allocation31_spill]] %s5628_s30  ;;  %s6777_s13 = sadd.s32 4294967295, %s5644_s12   ;;  %s5644_s12 = sphi %s5722_s12, %s27_s12   ;;  %s5640_s11 = sphi %s5720_s11, %s6892_s11   ;;  %s5636_s10 = sphi %s5718_s10, %s6891_s10   ;;  %s5632_s9 = sphi %s5716_s9, %s6890_s9   ;;  %s5628_s30 = sphi %s5714_s30, %s6889_s30   ;;  %s5624_s29 = sphi %s5712_s29, %s6888_s29   ;;  %s5620_s28 = sphi %s5710_s28, %s6887_s28   ;;  %s5616_s27 = sphi %s5708_s27, %s6886_s27  }
  0x15   : > { %6820 = sst [smem:[#allocation32_spill]] %s5632_s9  ;;  %p3345_p0 = scmp.ge.s32.totalorder %s5644_s12, 1 }
  0x16   : > { %p5752_p1 = scmp.eq.s32.totalorder %s6777_s13, 0  ;;  %p226_p2 = scmp.lt.s32.totalorder %s5644_s12, 5 }
  0x17   : > { %s5646_s16 = smov [#allocation8]   ;;  %s5647_s19 = smov [#allocation11]  }
  0x18   : > { %s6821_s14 = scalar_select %p5752_p1, 1, 0 }
  0x19   : > { %p5757_p3 = pnand %p3345_p0, %p226_p2  ;;  %s238_s17 = sshll.u32 %s5646_s16, 4  ;;  %s5761_s17 = int_to_ptr.vmem [resolvable:$true] %s238_s17 }
  0x1a   : > { %s262_s20 = sshll.u32 %s5647_s19, 4  ;;  %s5648_s21 = smov [#allocation14]   ;;  %s5771_s20 = int_to_ptr.vmem [resolvable:$true] %s262_s20 }
  0x1b   : > { %s6822_s15 = scalar_select %p5757_p3, 1, 0 }
  0x1c   : > { %p5164_p4 = pneg %p5757_p3  ;;  %s5773_s22 = sshll.u32 %s5648_s21, 4  ;;  %s287_s22 = int_to_ptr.vmem [resolvable:$true] %s5773_s22 }
  0x1d   : > { %s6824_s2 = sld [smem:[#allocation37_spill]] }
  0x1e   : > { %p5767_p5 = pnand %p5164_p4, %p5752_p1 }
  0x20   : > { %p5783_p7 = pneg %p5767_p5 }
  0x23   : > { %s5284_s25 = scalar_lea.hbm %s6824_s2, 2048 }
  0x24   : > { %p5285_p6 = scmp.ne.s32.totalorder %s6824_s2, %s5284_s25  ;;  %p5291_p10 = scmp.lt.u32.totalorder %s5284_s25, %s6824_s2 }
  0x26   : > { %p5287_p8 = pnand %p5783_p7, %p5285_p6 }
  0x28   : > { %p5288_p9 = pneg %p5287_p8 }
  0x2a   : > { %p5293_p11 = pnand %p5291_p10, %p5288_p9 }
  0x2c   : > { %5296 = shalt.err (!%p5293_p11)
}
  0x2d   : > { %s5297_s23 = scalar_lea.vmem %s5761_s17, 2048  ;;  %p5305_p2 = scmp.lt.s32.totalorder %s5761_s17, %s5761_s17 }
  0x2e   : > { %p5298_p12 = scmp.ne.s32.totalorder %s5761_s17, %s5297_s23  ;;  %p5306_p4 = scmp.lt.s32.totalorder %s5297_s23, %s5297_s23 }
  0x30   : > { %p5300_p13 = pnand %p5298_p12, %p5783_p7  ;;  %p5307_p6 = por %p5306_p4, %p5305_p2 }
  0x32   : > { %p5301_p0 = pneg %p5300_p13 }
  0x34   : > { %p5308_p8 = pnand %p5307_p6, %p5301_p0 }
  0x36   : > { %5311 = shalt.err (!%p5308_p8)
}
  0x37   : > { %s6784_s24 = smov 128   ;;  %s6785_s25 = smov 8  }
  0x38   : > { %5167 = dma.hbm_to_vmem [thread:$0]  (!%p5767_p5), %s6824_s2, 2048, %s5761_s17, [#allocation9], %s6784_s24, %s6784_s24, %s6785_s25  }
  0x39   : > { %s6826_s4 = sld [smem:[#allocation39_spill]] }
  0x3f   : > { %s5312_s23 = scalar_lea.hbm %s6826_s4, 18432 }
  0x40   : > { %p5313_p9 = scmp.ne.s32.totalorder %s6826_s4, %s5312_s23  ;;  %p5319_p12 = scmp.lt.u32.totalorder %s5312_s23, %s6826_s4 }
  0x42   : > { %p5315_p10 = pnand %p5313_p9, %p5783_p7 }
  0x44   : > { %p5316_p11 = pneg %p5315_p10 }
  0x46   : > { %p5321_p13 = pnand %p5319_p12, %p5316_p11 }
  0x48   : > { %5324 = shalt.err (!%p5321_p13)
}
  0x49   : > { %s5325_s17 = scalar_lea.vmem %s5771_s20, 18432  ;;  %p5333_p6 = scmp.lt.s32.totalorder %s5771_s20, %s5771_s20 }
  0x4a   : > { %p5326_p0 = scmp.ne.s32.totalorder %s5771_s20, %s5325_s17  ;;  %p5334_p8 = scmp.lt.s32.totalorder %s5325_s17, %s5325_s17 }
  0x4c   : > { %p5328_p2 = pnand %p5326_p0, %p5783_p7  ;;  %p5335_p9 = por %p5334_p8, %p5333_p6 }
  0x4e   : > { %p5329_p4 = pneg %p5328_p2 }
  0x50   : > { %p5336_p10 = pnand %p5335_p9, %p5329_p4 }
  0x52   : > { %5339 = shalt.err (!%p5336_p10)
}
  0x53   : > { %5173 = dma.hbm_to_vmem [thread:$0]  (!%p5767_p5), %s6826_s4, 18432, %s5771_s20, [#allocation12], %s6784_s24, %s6784_s24, %s6785_s25  }
  0x54   : > { %s6827_s6 = sld [smem:[#allocation41_spill]] }
  0x5a   : > { %s5340_s26 = scalar_lea.hbm %s6827_s6, 2048 }
  0x5b   : > { %p5341_p11 = scmp.ne.s32.totalorder %s6827_s6, %s5340_s26  ;;  %p5347_p0 = scmp.lt.u32.totalorder %s5340_s26, %s6827_s6 }
  0x5d   : > { %p5343_p12 = pnand %p5341_p11, %p5783_p7 }
  0x5f   : > { %p5344_p13 = pneg %p5343_p12 }
  0x61   : > { %p5349_p2 = pnand %p5347_p0, %p5344_p13 }
  0x63   : > { %5352 = shalt.err (!%p5349_p2)
}
  0x64   : > { %s5353_s17 = scalar_lea.vmem %s287_s22, 2048  ;;  %p5361_p9 = scmp.lt.s32.totalorder %s287_s22, %s287_s22 }
  0x65   : > { %p5354_p4 = scmp.ne.s32.totalorder %s287_s22, %s5353_s17  ;;  %p5362_p10 = scmp.lt.s32.totalorder %s5353_s17, %s5353_s17 }
  0x67   : > { %p5356_p6 = pnand %p5354_p4, %p5783_p7  ;;  %p5363_p3 = por %p5362_p10, %p5361_p9 }
  0x69   : > { %p5357_p8 = pneg %p5356_p6 }
  0x6b   : > { %p5364_p1 = pnand %p5363_p3, %p5357_p8 }
  0x6d   : > { %5367 = shalt.err (!%p5364_p1)
}
  0x6e   : > { %5179 = dma.hbm_to_vmem [thread:$0]  (!%p5767_p5), %s6827_s6, 2048, %s287_s22, [#allocation15], %s6784_s24, %s6784_s24, %s6785_s25  }
  0x6f   : > { %s5651_s8 = smov [#allocation10]   ;;  %s5652_s9 = smov [#allocation13]  }
  0x70   : > { %s252_s30 = sshll.u32 %s5651_s8, 4  ;;  %s276_s26 = sshll.u32 %s5652_s9, 4  ;;  %s253_s30 = int_to_ptr.vmem [resolvable:$true] %s252_s30  ;;  %s277_s26 = int_to_ptr.vmem [resolvable:$true] %s276_s26 }
  0x71   : > { %s6828_s3 = sld [smem:[#allocation38_spill]] }
  0x77   : > { %s5368_s21 = scalar_lea.hbm %s6828_s3, 16 }
  0x78   : > { %p5369_p1 = scmp.ne.s32.totalorder %s6828_s3, %s5368_s21  ;;  %p5375_p12 = scmp.lt.u32.totalorder %s5368_s21, %s6828_s3 }
  0x7a   : > { %p5371_p3 = pnand %p5369_p1, %p5783_p7 }
  0x7c   : > { %p5372_p11 = pneg %p5371_p3 }
  0x7e   : > { %p5377_p13 = pnand %p5375_p12, %p5372_p11 }
  0x80   : > { %5380 = shalt.err (!%p5377_p13)
}
  0x81   : > { %s5381_s22 = scalar_lea.vmem %s253_s30, 16  ;;  %s5388_s1 = scalar_lea.vmem %s253_s30, 32 }
  0x82   : > { %p5382_p0 = scmp.ne.s32.totalorder %s253_s30, %s5381_s22  ;;  %p5389_p6 = scmp.lt.s32.totalorder %s253_s30, %s253_s30 }
  0x83   : > { %p5390_p8 = scmp.lt.s32.totalorder %s5388_s1, %s5381_s22 }
  0x84   : > { %p5384_p2 = pnand %p5382_p0, %p5783_p7 }
  0x85   : > { %p5391_p9 = por %p5390_p8, %p5389_p6 }
  0x86   : > { %p5385_p4 = pneg %p5384_p2 }
  0x88   : > { %p5392_p10 = pnand %p5391_p9, %p5385_p4 }
  0x8a   : > { %5395 = shalt.err (!%p5392_p10)
}
  0x8b   : > { %5170 = dma.hbm_to_vmem [thread:$0]  (!%p5767_p5), %s6828_s3, 16, %s253_s30, [#allocation9]  }
  0x8c   : > { %s6829_s5 = sld [smem:[#allocation40_spill]] }
  0x92   : > { %s5396_s19 = scalar_lea.hbm %s6829_s5, 16 }
  0x93   : > { %p5397_p1 = scmp.ne.s32.totalorder %s6829_s5, %s5396_s19  ;;  %p5403_p12 = scmp.lt.u32.totalorder %s5396_s19, %s6829_s5 }
  0x95   : > { %p5399_p3 = pnand %p5397_p1, %p5783_p7 }
  0x97   : > { %p5400_p11 = pneg %p5399_p3 }
  0x99   : > { %p5405_p13 = pnand %p5403_p12, %p5400_p11 }
  0x9b   : > { %5408 = shalt.err (!%p5405_p13)
}
  0x9c   : > { %s5409_s22 = scalar_lea.vmem %s277_s26, 16  ;;  %s5416_s30 = scalar_lea.vmem %s277_s26, 32 }
  0x9d   : > { %p5410_p0 = scmp.ne.s32.totalorder %s277_s26, %s5409_s22  ;;  %p5417_p6 = scmp.lt.s32.totalorder %s277_s26, %s277_s26 }
  0x9e   : > { %p5418_p8 = scmp.lt.s32.totalorder %s5416_s30, %s5409_s22 }
  0x9f   : > { %p5412_p2 = pnand %p5410_p0, %p5783_p7 }
  0xa0   : > { %p5419_p9 = por %p5418_p8, %p5417_p6 }
  0xa1   : > { %p5413_p4 = pneg %p5412_p2 }
  0xa3   : > { %p5420_p10 = pnand %p5419_p9, %p5413_p4 }
  0xa5   : > { %5423 = shalt.err (!%p5420_p10)
}
  0xa6   : > { %5176 = dma.hbm_to_vmem [thread:$0]  (!%p5767_p5), %s6829_s5, 16, %s277_s26, [#allocation12]  }
  0xa7   : > { %s5653_s9 = smov [#allocation16]   ;;  %s6830_s7 = sld [smem:[#allocation42_spill]] }
  0xa8   : > { %s300_s2 = sshll.u32 %s5653_s9, 4  ;;  %s301_s2 = int_to_ptr.vmem [resolvable:$true] %s300_s2 }
  0xad   : > { %s5424_s21 = scalar_lea.hbm %s6830_s7, 16 }
  0xae   : > { %p5425_p1 = scmp.ne.s32.totalorder %s6830_s7, %s5424_s21  ;;  %p5431_p12 = scmp.lt.u32.totalorder %s5424_s21, %s6830_s7 }
  0xb0   : > { %p5427_p3 = pnand %p5425_p1, %p5783_p7 }
  0xb2   : > { %p5428_p11 = pneg %p5427_p3 }
  0xb4   : > { %p5433_p13 = pnand %p5431_p12, %p5428_p11 }
  0xb6   : > { %5436 = shalt.err (!%p5433_p13)
}
  0xb7   : > { %s5437_s26 = scalar_lea.vmem %s301_s2, 16  ;;  %s5444_s30 = scalar_lea.vmem %s301_s2, 32 }
  0xb8   : > { %p5438_p0 = scmp.ne.s32.totalorder %s301_s2, %s5437_s26  ;;  %p5445_p6 = scmp.lt.s32.totalorder %s301_s2, %s301_s2 }
  0xb9   : > { %p5446_p8 = scmp.lt.s32.totalorder %s5444_s30, %s5437_s26 }
  0xba   : > { %p5440_p2 = pnand %p5438_p0, %p5783_p7 }
  0xbb   : > { %p5447_p9 = por %p5446_p8, %p5445_p6 }
  0xbc   : > { %p5441_p4 = pneg %p5440_p2 }
  0xbe   : > { %p5448_p10 = pnand %p5447_p9, %p5441_p4 }
  0xc0   : > { %5451 = shalt.err (!%p5448_p10)
}
  0xc1   : > { %5182 = dma.hbm_to_vmem [thread:$0]  (!%p5767_p5), %s6830_s7, 16, %s301_s2, [#allocation15]  }
  0xc2   : > { %s3344_s13 = sadd.s32 4294967294, %s5644_s12   ;;  %s36_s9 = sadd.s32 1, %s5636_s10 }
  0xc3   : > { %p37_p7 = scmp.ge.s32.totalorder %s36_s9, 2  ;;  %s39_s18 = sadd.s32 1, %s5640_s11 }
  0xc4   : > { %s48_s16 = sadd.s32 1, %s5624_s29  ;;  %p55_p1 = scmp.ne.s32.totalorder %s5624_s29, %s5620_s28 }
  0xc5   : > { %s6894_s9 = smov (%p37_p7, %s36_s9), 0  ;;  %s6896_s18 = smov (!%p37_p7, %s39_s18), %s5640_s11 }
  0xc6   : > { %6831 = sst [smem:[#allocation33_spill]] %s6894_s9  ;;  %s44_s19 = ssub.s32 %s5636_s10, %s6894_s9 }
  0xc7   : > { %p56_p3 = scmp.eq.s32.totalorder %s5644_s12, 0  ;;  %p41_p11 = scmp.ge.s32.totalorder %s6896_s18, 2 }
  0xc8   : > { %p61_p5 = scmp.ne.s32.totalorder %s5620_s28, %s5616_s27  ;;  %s6833_s21 = sadd.s32 4294967295, %s5644_s12  }
  0xc9   : > { %p5923_p12 = por %p56_p3, %p55_p1  ;;  %p213_p13 = scmp.eq.s32.totalorder %s6833_s21, 3 }
  0xca   : > { %s6898_s18 = smov (%p41_p11, %s6896_s18), 0  ;;  %p6835_p0 = scmp.ne.s32.totalorder %s6821_s14, 0 }
  0xcb   : > { %6834 = sst [smem:[#allocation34_spill]] %s6898_s18  ;;  %p5937_p4 = por %p213_p13, %p55_p1 }
  0xcc   : > { %p5933_p2 = por %p6835_p0, %p61_p5  ;;  %s43_s20 = ssub.s32 %s5640_s11, %s6898_s18 }
  0xcd   : > { %s6837_s17 = scalar_select %p5937_p4, 1, 0 }
  0xce   : > { %p219_p6 = scmp.eq.s32.totalorder %s3344_s13, 3  ;;  %s45_s22 = sor.u32 %s44_s19, %s43_s20 }
  0xcf   : > { %p5197_p8 = scmp.lt.s32.totalorder %s5644_s12, 4  ;;  %p46_p9 = scmp.eq.s32.totalorder %s45_s22, 0 }
  0xd0   : > { %p5944_p10 = por %p219_p6, %p61_p5  ;;  %s311_s30 = sand.u32 1, %s5624_s29  }
  0xd1   : > { %s3354_s1 = sshll.u32 %s5636_s10, 4  ;;  %s3353_s21 = sshll.u32 %s311_s30, 7 }
  0xd2   : > { %s6838_s26 = scalar_select %p5944_p10, 1, 0 }
  0xd3   : > { %s5951_s8 = scalar_select %p46_p9, %s5624_s29, %s48_s16  }
  0xd4   : > { %s3355_s24 = sshll.u32 %s5640_s11, 5  ;;  %s315_s3 = scalar_lea.vmem [#allocation5], %s3353_s21 }
  0xd5   : > { %s321_s25 = sadd.s32 %s3355_s24, %s3354_s1  ;;  %s324_s4 = sshll.u32 %s315_s3, 4  ;;  %s5954_s4 = int_to_ptr.vmem [resolvable:$true] %s324_s4 }
  0xd6   : > { %s3356_s5 = sshll.u32 %s321_s25, 7  ;;  %s6839_s0 = sld [smem:[#allocation35_spill]] }
  0xd7   : > { %p5965_p7 = pnand %p5197_p8, %p5923_p12  ;;  %s5969_s3 = scalar_lea.sflag [#allocation6], %s311_s30 }
  0xd9   : > { %p5454_p3 = pneg %p5965_p7 }
  0xdc   : > { %s5959_s20 = scalar_lea.hbm %s6839_s0, %s3356_s5  ;;  %s5457_s2 = scalar_lea.hbm %s6839_s0, 8192 }
  0xdd   : > { %s5452_s24 = scalar_lea.hbm %s5959_s20, 2048  ;;  %p5458_p12 = scmp.lt.u32.totalorder %s5959_s20, %s6839_s0 }
  0xde   : > { %p5453_p1 = scmp.ne.s32.totalorder %s5959_s20, %s5452_s24  ;;  %p5459_p13 = scmp.lt.u32.totalorder %s5457_s2, %s5452_s24 }
  0xdf   : > { %p5461_p6 = scmp.lt.u32.totalorder %s5452_s24, %s5959_s20 }
  0xe0   : > { %p5455_p11 = pnand %p5454_p3, %p5453_p1  ;;  %p5460_p0 = por %p5459_p13, %p5458_p12 }
  0xe2   : > { %p5456_p5 = pneg %p5455_p11  ;;  %p5462_p8 = por %p5461_p6, %p5460_p0 }
  0xe4   : > { %p5463_p9 = pnand %p5462_p8, %p5456_p5 }
  0xe6   : > { %5466 = shalt.err (!%p5463_p9)
}
  0xe7   : > { %s5467_s30 = scalar_lea.vmem %s5954_s4, 2048  ;;  %s5654_s21 = smov [#allocation5]  }
  0xe8   : > { %p5468_p1 = scmp.ne.s32.totalorder %s5954_s4, %s5467_s30  ;;  %s5472_s13 = sshll.u32 %s5654_s21, 4  ;;  %s5473_s13 = int_to_ptr.vmem [resolvable:$false] %s5472_s13 }
  0xe9   : > { %s5474_s19 = scalar_lea.vmem %s5473_s13, 4096  ;;  %p5475_p4 = scmp.lt.s32.totalorder %s5954_s4, %s5473_s13 }
  0xea   : > { %p5470_p11 = pnand %p5468_p1, %p5454_p3  ;;  %p5476_p12 = scmp.lt.s32.totalorder %s5474_s19, %s5467_s30 }
  0xec   : > { %p5471_p10 = pneg %p5470_p11  ;;  %p5477_p13 = por %p5476_p12, %p5475_p4 }
  0xee   : > { %p5478_p0 = pnand %p5477_p13, %p5471_p10 }
  0xf0   : > { %5481 = shalt.err (!%p5478_p0)
}
  0xf1   : > { %s6841_s24 = smov 8   ;;  %s6842_s5 = smov 128  }
  0xf2   : > { %5186 = dma.hbm_to_vmem [thread:$0]  (!%p5965_p7), %s5959_s20, 2048, %s5954_s4, %s5969_s3, %s6842_s5, %s6842_s5, %s6841_s24  }
  0xf3   : > { %p6843_p3 = scmp.ne.s32.totalorder %s6822_s15, 0 }
  0xf4   : > { %s6003_s25 = sand.u32 (!%p6843_p3), 1, %s5620_s28  }
  0xf5   : > { %336 = sbr.rel (%p6843_p3) target bundleno = 1553 (0x611), region = 48  ;;  %s6787_s2 = sshll.u32 (!%p6843_p3), %s6003_s25, 7 }
  0xf6   : > { %s339_s22 = scalar_lea.sflag (!%p6843_p3), [#allocation6], %s6003_s25  ;;  %s6009_s16 = scalar_lea.vmem (!%p6843_p3), [#allocation5], %s6787_s2 }
  0xfc   : > { %5591 = dma.done.wait (%p5933_p2), %s339_s22, 2048  }
  0xfd   : > { %5593 = vsyncadd (%p5933_p2), %s339_s22, 4294965248  ;;  %p6844_p4 = scmp.ne.s32.totalorder %s6821_s14, 0 }
  0xff   : > { %5595 = dma.done.wait (%p6844_p4), [#allocation9], 2064  }
 0x100   : > { %5597 = vsyncadd (%p6844_p4), [#allocation9], 4294965232 }
 0x101   : > { %5599 = dma.done.wait (%p6844_p4), [#allocation12], 18448  }
 0x102   : > { %5601 = vsyncadd (%p6844_p4), [#allocation12], 4294948848 }
 0x103   : > { %5603 = dma.done.wait (%p6844_p4), [#allocation15], 2064  }
 0x104   : > { %5605 = vsyncadd (%p6844_p4), [#allocation15], 4294965232  ;;  %v456_v0 = vld [vmem:[#allocation8] sm:$0xff]  ;;  %v457_v1 = vld [vmem:[#allocation8 + $0x8] sm:$0xff]  ;;  %s6845_s4 = sld [smem:[#allocation31_spill]]  ;;  %s6846_s14 = sld [smem:[#allocation32_spill]] }
 0x105   : > { %v458_v2 = vld [vmem:[#allocation8 + $0x10] sm:$0xff]  ;;  %v4560_v3 = vpack.c.bf16 %v457_v1, %v456_v0  ;;  %v459_v4 = vld [vmem:[#allocation8 + $0x18] sm:$0xff]  ;;  %v460_v6 = vld [vmem:[#allocation8 + $0x20] sm:$0xff]  ;;  %s5655_s13 = smov [#allocation2]   ;;  %s6847_s22 = sld [smem:[#allocation36_spill]] }
 0x106   : > { %v4564_v5 = vpack.c.bf16 %v459_v4, %v458_v2  ;;  %v461_v7 = vld [vmem:[#allocation8 + $0x28] sm:$0xff]  ;;  %v440_v9 = vld [vmem:[%s6009_s16] sm:$0xff]  ;;  %v462_v10 = vld [vmem:[#allocation8 + $0x30] sm:$0xff]  ;;  %s420_s19 = sshll.u32 %s5655_s13, 4  ;;  %s6050_s19 = int_to_ptr.vmem [resolvable:$true] %s420_s19 }
 0x107   : > { %4561 = vmatprep.subr.bf16.mxu0 %v4560_v3  ;;  %v4568_v8 = vpack.c.bf16 %v461_v7, %v460_v6  ;;  %v463_v11 = vld [vmem:[#allocation8 + $0x38] sm:$0xff]  ;;  %3906 = vmatprep.mubr.f32.mxu0 %v440_v9  ;;  %v464_v13 = vld [vmem:[#allocation8 + $0x40] sm:$0xff]  ;;  %v465_v14 = vld [vmem:[#allocation8 + $0x48] sm:$0xff] }
 0x108   : > { %4563 = vmatpush3.bf16.msra.mxu0 %v4560_v3  ;;  %v4572_v12 = vpack.c.bf16 %v463_v11, %v462_v10  ;;  %v4576_v15 = vpack.c.bf16 %v465_v14, %v464_v13  ;;  %v466_v16 = vld [vmem:[#allocation8 + $0x50] sm:$0xff]  ;;  %v467_v17 = vld [vmem:[#allocation8 + $0x58] sm:$0xff]  ;;  %v468_v19 = vld [vmem:[#allocation8 + $0x60] sm:$0xff] }
 0x109   : > { %4565 = vmatprep.subr.bf16.mxu0 %v4564_v5  ;;  %v4580_v18 = vpack.c.bf16 %v467_v17, %v466_v16  ;;  %v469_v20 = vld [vmem:[#allocation8 + $0x68] sm:$0xff]  ;;  %v470_v22 = vld [vmem:[#allocation8 + $0x70] sm:$0xff]  ;;  %v471_v23 = vld [vmem:[#allocation8 + $0x78] sm:$0xff] }
 0x10a   : > { %v4584_v21 = vpack.c.bf16 %v469_v20, %v468_v19  ;;  %v4588_v24 = vpack.c.bf16 %v471_v23, %v470_v22  ;;  %v441_v25 = vld [vmem:[%s6009_s16 + $0x8] sm:$0xff]  ;;  %v442_v26 = vld [vmem:[%s6009_s16 + $0x10] sm:$0xff]  ;;  %v443_v27 = vld [vmem:[%s6009_s16 + $0x18] sm:$0xff]  ;;  %s3366_s15 = sshll.u32 %s6845_s4, 3  ;;  %s3371_s1 = sshll.u32 %s6846_s14, 8 }
 0x10b   : > { %v444_v28 = vld [vmem:[%s6009_s16 + $0x20] sm:$0xff]  ;;  %v445_v29 = vld [vmem:[%s6009_s16 + $0x28] sm:$0xff]  ;;  %v446_v30 = vld [vmem:[%s6009_s16 + $0x30] sm:$0xff]  ;;  %s3367_s23 = sadd.s32 4294967295, %s3366_s15  ;;  %s3485_s20 = sadd.s32 8, %s3366_s15 }
 0x10c   : > { %4567 = vmatpush3.bf16.msra.mxu0 %v4564_v5  ;;  %v447_v31 = vld [vmem:[%s6009_s16 + $0x38] sm:$0xff]  ;;  %v448_v32 = vld [vmem:[%s6009_s16 + $0x40] sm:$0xff]  ;;  %v449_v33 = vld [vmem:[%s6009_s16 + $0x48] sm:$0xff]  ;;  %p401_p2 = scmp.gt.s32.totalorder %s3367_s23, 0  ;;  %p405_p10 = scmp.lt.s32.totalorder %s3485_s20, 15 }
 0x10d   : > { %4569 = vmatprep.subr.bf16.mxu0 %v4568_v8  ;;  %v450_v34 = vld [vmem:[%s6009_s16 + $0x50] sm:$0xff]  ;;  %v451_v35 = vld [vmem:[%s6009_s16 + $0x58] sm:$0xff]  ;;  %v452_v36 = vld [vmem:[%s6009_s16 + $0x60] sm:$0xff]  ;;  %s5484_s7 = scalar_lea.hbm %s6847_s22, 8192 }
 0x10e   : > { %v453_v37 = vld [vmem:[%s6009_s16 + $0x68] sm:$0xff]  ;;  %v454_v38 = vld [vmem:[%s6009_s16 + $0x70] sm:$0xff]  ;;  %v455_v39 = vld [vmem:[%s6009_s16 + $0x78] sm:$0xff]  ;;  %s6900_s23 = smov (!%p401_p2, %s3367_s23), 0  ;;  %s6902_s20 = smov (!%p405_p10, %s3485_s20), 15 }
 0x10f   : > { %s3369_s3 = sshll.u32 %s6900_s23, 4 }
 0x110   : > { %4571 = vmatpush3.bf16.msra.mxu0 %v4568_v8  ;;  %s410_s30 = sadd.s32 %s3371_s1, %s3369_s3 }
 0x111   : > { %4573 = vmatprep.subr.bf16.mxu0 %v4572_v12  ;;  %s3372_s21 = sshll.u32 %s410_s30, 4 }
 0x112   : > { %s412_s2 = scalar_lea.hbm %s6847_s22, %s3372_s21 }
 0x113   : > { %s5482_s0 = scalar_lea.hbm %s412_s2, 256  ;;  %p5485_p5 = scmp.lt.u32.totalorder %s412_s2, %s6847_s22 }
 0x114   : > { %4575 = vmatpush3.bf16.msra.mxu0 %v4572_v12  ;;  %p5483_p7 = scmp.ne.s32.totalorder %s412_s2, %s5482_s0  ;;  %p5486_p6 = scmp.lt.u32.totalorder %s5484_s7, %s5482_s0 }
 0x115   : > { %4577 = vmatprep.subr.bf16.mxu0 %v4576_v15  ;;  %p5488_p9 = scmp.lt.u32.totalorder %s5482_s0, %s412_s2 }
 0x116   : > { %p5487_p8 = por %p5486_p6, %p5485_p5 }
 0x118   : > { %4579 = vmatpush3.bf16.msra.mxu0 %v4576_v15  ;;  %p5489_p1 = por %p5488_p9, %p5487_p8 }
 0x119   : > { %4581 = vmatprep.subr.bf16.mxu0 %v4580_v18 }
 0x11a   : > { %p5490_p11 = pnand %p5489_p1, %p5483_p7 }
 0x11c   : > { %4583 = vmatpush3.bf16.msra.mxu0 %v4580_v18 }
 0x11d   : > { %4585 = vmatprep.subr.bf16.mxu0 %v4584_v21 }
 0x120   : > { %4587 = vmatpush3.bf16.msra.mxu0 %v4584_v21 }
 0x121   : > { %4589 = vmatprep.subr.bf16.mxu0 %v4588_v24 }
 0x124   : > { %4591 = vmatpush3.bf16.msra.mxu0 %v4588_v24 }
 0x127   : > { %3907 = vmatmul.mubr.f32.vlgmr.msra.gmra.mrb[0].mxu0 %v441_v25 }
 0x128   : > { %3909 = vmatprep.mubr.f32.mxu0 %v442_v26 }
 0x12b   : > { %3910 = vmatmul.mubr.f32.gmra.mrb[2].mxu0 %v443_v27 }
 0x12c   : > { %3912 = vmatprep.mubr.f32.mxu0 %v444_v28 }
 0x12f   : > { %3913 = vmatmul.mubr.f32.gmra.mrb[4].mxu0 %v445_v29 }
 0x130   : > { %3915 = vmatprep.mubr.f32.mxu0 %v446_v30 }
 0x133   : > { %3916 = vmatmul.mubr.f32.gmra.mrb[6].mxu0 %v447_v31 }
 0x134   : > { %3918 = vmatprep.mubr.f32.mxu0 %v448_v32 }
 0x137   : > { %3919 = vmatmul.mubr.f32.gmra.mrb[8].mxu0 %v449_v33 }
 0x138   : > { %3921 = vmatprep.mubr.f32.mxu0 %v450_v34 }
 0x13b   : > { %3922 = vmatmul.mubr.f32.gmra.mrb[10].mxu0 %v451_v35 }
 0x13c   : > { %3924 = vmatprep.mubr.f32.mxu0 %v452_v36 }
 0x13f   : > { %3925 = vmatmul.mubr.f32.gmra.mrb[12].mxu0 %v453_v37 }
 0x140   : > { %3927 = vmatprep.mubr.f32.mxu0 %v454_v38 }
 0x143   : > { %3928 = vmatmul.mubr.f32.gmra.mrb[14].mxu0 %v455_v39 }
 0x144   : > { %5493 = shalt.err (!%p5490_p11)  }
 0x145   : > { %s5494_s14 = scalar_lea.vmem %s6050_s19, 256  ;;  %s5498_s23 = scalar_lea.vmem %s6050_s19, 512 }
 0x146   : > { %p5495_p12 = scmp.ne.s32.totalorder %s6050_s19, %s5494_s14  ;;  %p5499_p13 = scmp.lt.s32.totalorder %s6050_s19, %s6050_s19 }
 0x147   : > { %p5500_p0 = scmp.lt.s32.totalorder %s5498_s23, %s5494_s14 }
 0x149   : > { %p5501_p3 = por %p5500_p0, %p5499_p13 }
 0x14b   : > { %p5502_p4 = pnand %p5501_p3, %p5495_p12 }
 0x14d   : > { %5505 = shalt.err (!%p5502_p4)  }
 0x14e   : > { %423 = dma.hbm_to_vmem [thread:$0]  %s412_s2, 256, %s6050_s19, [#allocation4] }
 0x14f   : > { %s3370_s0 = sshll.u32 %s6902_s20, 4  ;;  %s5656_s18 = smov [#allocation2 + $0x10]  }
 0x150   : > { %s424_s6 = sadd.s32 %s3371_s1, %s3370_s0  ;;  %s436_s3 = sshll.u32 %s5656_s18, 4  ;;  %s437_s3 = int_to_ptr.vmem [resolvable:$true] %s436_s3 }
 0x151   : > { %s3373_s9 = sshll.u32 %s424_s6, 4 }
 0x152   : > { %s426_s13 = scalar_lea.hbm %s6847_s22, %s3373_s9 }
 0x153   : > { %s5506_s24 = scalar_lea.hbm %s426_s13, 256  ;;  %p5509_p10 = scmp.lt.u32.totalorder %s426_s13, %s6847_s22 }
 0x154   : > { %p5507_p2 = scmp.ne.s32.totalorder %s426_s13, %s5506_s24  ;;  %p5510_p7 = scmp.lt.u32.totalorder %s5484_s7, %s5506_s24 }
 0x155   : > { %p5512_p6 = scmp.lt.u32.totalorder %s5506_s24, %s426_s13 }
 0x156   : > { %p5511_p5 = por %p5510_p7, %p5509_p10 }
 0x158   : > { %p5513_p8 = por %p5512_p6, %p5511_p5 }
 0x15a   : > { %p5514_p9 = pnand %p5513_p8, %p5507_p2 }
 0x15c   : > { %5517 = shalt.err (!%p5514_p9)  }
 0x15d   : > { %s5518_s2 = scalar_lea.vmem %s437_s3, 256  ;;  %p5523_p11 = scmp.lt.s32.totalorder %s437_s3, %s6050_s19 }
 0x15e   : > { %p5519_p1 = scmp.ne.s32.totalorder %s437_s3, %s5518_s2  ;;  %p5524_p12 = scmp.lt.s32.totalorder %s5498_s23, %s5518_s2 }
 0x160   : > { %p5525_p13 = por %p5524_p12, %p5523_p11 }
 0x162   : > { %p5526_p0 = pnand %p5525_p13, %p5519_p1 }
 0x164   : > { %5529 = shalt.err (!%p5526_p0)  }
 0x165   : > { %439 = dma.hbm_to_vmem [thread:$0]  %s426_s13, 256, %s437_s3, [#allocation4 + $0x1]  ;;  %v3374_v40 = vld [vmem:[#allocation10] ss:$0 sm:$0xff] }
 0x166   : > { %s6848_s7 = sshll.u32 %s6003_s25, 7 }
 0x167   : > { %s6074_s20 = scalar_lea.vmem [#allocation17], %s6848_s7 }
 0x1fa   : > { %v3908_v41 = vpop.f32.mrb[0].mxu0 }
 0x1fb   : > { %v551_v42 = vadd.f32 %v3908_v41, %v3374_v40  ;;  %v545_v43 = vpop.f32.mrb[1].mxu0 }
 0x1fc   : > { %v546_v44 = vadd.f32 %v3374_v40, %v545_v43 }
 0x1fd   : > { %v625_v45 = vmax.f32 %v551_v42, 0.0 }
 0x1fe   : > { %v624_v46 = vmax.f32 %v546_v44, 0.0  ;;  %v3911_v47 = vpop.f32.mrb[2].mxu0 }
 0x1ff   : > { %641 = vst [vmem:[#allocation3 + $0x20] sm:$0xff] %v625_v45  ;;  %v561_v48 = vadd.f32 %v3911_v47, %v3374_v40  ;;  %v555_v49 = vpop.f32.mrb[3].mxu0 }
 0x200   : > { %640 = vst [vmem:[#allocation3 + $0x18] sm:$0xff] %v624_v46  ;;  %v556_v50 = vadd.f32 %v3374_v40, %v555_v49 }
 0x201   : > { %v627_v51 = vmax.f32 %v561_v48, 0.0 }
 0x202   : > { %v626_v52 = vmax.f32 %v556_v50, 0.0  ;;  %v3914_v53 = vpop.f32.mrb[4].mxu0 }
 0x203   : > { %643 = vst [vmem:[#allocation3 + $0x30] sm:$0xff] %v627_v51  ;;  %v571_v54 = vadd.f32 %v3914_v53, %v3374_v40  ;;  %v565_v55 = vpop.f32.mrb[5].mxu0 }
 0x204   : > { %642 = vst [vmem:[#allocation3 + $0x28] sm:$0xff] %v626_v52  ;;  %v566_v56 = vadd.f32 %v3374_v40, %v565_v55 }
 0x205   : > { %v629_v57 = vmax.f32 %v571_v54, 0.0 }
 0x206   : > { %v628_v58 = vmax.f32 %v566_v56, 0.0  ;;  %v3917_v59 = vpop.f32.mrb[6].mxu0 }
 0x207   : > { %645 = vst [vmem:[#allocation3 + $0x40] sm:$0xff] %v629_v57  ;;  %v581_v60 = vadd.f32 %v3917_v59, %v3374_v40  ;;  %v575_v61 = vpop.f32.mrb[7].mxu0 }
 0x208   : > { %644 = vst [vmem:[#allocation3 + $0x38] sm:$0xff] %v628_v58  ;;  %v576_v62 = vadd.f32 %v3374_v40, %v575_v61 }
 0x209   : > { %v631_v63 = vmax.f32 %v581_v60, 0.0 }
 0x20a   : > { %v630_v0 = vmax.f32 %v576_v62, 0.0  ;;  %v3920_v1 = vpop.f32.mrb[8].mxu0 }
 0x20b   : > { %647 = vst [vmem:[#allocation3 + $0x50] sm:$0xff] %v631_v63  ;;  %v591_v2 = vadd.f32 %v3920_v1, %v3374_v40  ;;  %v585_v3 = vpop.f32.mrb[9].mxu0 }
 0x20c   : > { %646 = vst [vmem:[#allocation3 + $0x48] sm:$0xff] %v630_v0  ;;  %v586_v4 = vadd.f32 %v3374_v40, %v585_v3 }
 0x20d   : > { %v633_v5 = vmax.f32 %v591_v2, 0.0 }
 0x20e   : > { %v632_v6 = vmax.f32 %v586_v4, 0.0  ;;  %v3923_v7 = vpop.f32.mrb[10].mxu0 }
 0x20f   : > { %649 = vst [vmem:[#allocation3 + $0x60] sm:$0xff] %v633_v5  ;;  %v601_v8 = vadd.f32 %v3923_v7, %v3374_v40  ;;  %v595_v9 = vpop.f32.mrb[11].mxu0 }
 0x210   : > { %648 = vst [vmem:[#allocation3 + $0x58] sm:$0xff] %v632_v6  ;;  %v596_v10 = vadd.f32 %v3374_v40, %v595_v9 }
 0x211   : > { %v635_v11 = vmax.f32 %v601_v8, 0.0 }
 0x212   : > { %v634_v12 = vmax.f32 %v596_v10, 0.0  ;;  %v3926_v13 = vpop.f32.mrb[12].mxu0 }
 0x213   : > { %651 = vst [vmem:[#allocation3 + $0x70] sm:$0xff] %v635_v11  ;;  %v611_v14 = vadd.f32 %v3926_v13, %v3374_v40  ;;  %v605_v15 = vpop.f32.mrb[13].mxu0 }
 0x214   : > { %650 = vst [vmem:[#allocation3 + $0x68] sm:$0xff] %v634_v12  ;;  %v606_v16 = vadd.f32 %v3374_v40, %v605_v15 }
 0x215   : > { %v637_v17 = vmax.f32 %v611_v14, 0.0 }
 0x216   : > { %v636_v18 = vmax.f32 %v606_v16, 0.0  ;;  %v3929_v19 = vpop.f32.mrb[14].mxu0 }
 0x217   : > { %653 = vst [vmem:[#allocation3 + $0x80] sm:$0xff] %v637_v17  ;;  %v621_v20 = vadd.f32 %v3929_v19, %v3374_v40  ;;  %v615_v21 = vpop.f32.mrb[15].mxu0 }
 0x218   : > { %652 = vst [vmem:[#allocation3 + $0x78] sm:$0xff] %v636_v18  ;;  %v616_v22 = vadd.f32 %v3374_v40, %v615_v21 }
 0x219   : > { %v639_v23 = vmax.f32 %v621_v20, 0.0 }
 0x21a   : > { %v638_v24 = vmax.f32 %v616_v22, 0.0 }
 0x21b   : > { %655 = vst [vmem:[#allocation3 + $0x90] sm:$0xff] %v639_v23 }
 0x21c   : > { %654 = vst [vmem:[#allocation3 + $0x88] sm:$0xff] %v638_v24 }
 0x21d   : > { %5606 = dma.done.wait [#allocation4], 256 }
 0x21e   : > { %5607 = vsyncadd [#allocation4], 4294967040 }
 0x21f   : > { %5608 = dma.done.wait [#allocation4 + $0x1], 256 }
 0x220   : > { %5609 = vsyncadd [#allocation4 + $0x1], 4294967040  ;;  %v663_v25 = vld [vmem:[#allocation8] sm:$0xff]  ;;  %v664_v26 = vld [vmem:[#allocation8 + $0x8] sm:$0xff]  ;;  %p3376_p3 = scmp.ne.s32.totalorder %s6845_s4, 0 }
 0x221   : > { %v665_v27 = vld [vmem:[#allocation8 + $0x10] sm:$0xff]  ;;  %v4592_v28 = vpack.c.bf16 %v664_v26, %v663_v25  ;;  %v666_v29 = vld [vmem:[#allocation8 + $0x18] sm:$0xff]  ;;  %v667_v31 = vld [vmem:[#allocation8 + $0x20] sm:$0xff]  ;;  %v5657_v2 = vmov (!%p3376_p3), 0.0  }
 0x222   : > { %v4596_v30 = vpack.c.bf16 %v666_v29, %v665_v27  ;;  %v668_v32 = vld [vmem:[#allocation8 + $0x28] sm:$0xff]  ;;  %v661_v34 = vld [vmem:[#allocation2] sm:$0xff]  ;;  %v670_v36 = vld [vmem:[#allocation8 + $0x38] sm:$0xff] }
 0x223   : > { %4593 = vmatprep.subr.bf16.mxu0 %v4592_v28  ;;  %v4600_v33 = vpack.c.bf16 %v668_v32, %v667_v31  ;;  %v669_v35 = vld [vmem:[#allocation8 + $0x30] sm:$0xff]  ;;  %3962 = vmatprep.mubr.f32.mxu0 %v661_v34  ;;  %v671_v38 = vld [vmem:[#allocation8 + $0x40] sm:$0xff]  ;;  %v672_v39 = vld [vmem:[#allocation8 + $0x48] sm:$0xff] }
 0x224   : > { %4595 = vmatpush3.bf16.msra.mxu0 %v4592_v28  ;;  %v4604_v37 = vpack.c.bf16 %v670_v36, %v669_v35  ;;  %v4608_v40 = vpack.c.bf16 %v672_v39, %v671_v38  ;;  %v673_v41 = vld [vmem:[#allocation8 + $0x50] sm:$0xff]  ;;  %v674_v42 = vld [vmem:[#allocation8 + $0x58] sm:$0xff]  ;;  %v675_v44 = vld [vmem:[#allocation8 + $0x60] sm:$0xff] }
 0x225   : > { %4597 = vmatprep.subr.bf16.mxu0 %v4596_v30  ;;  %v4612_v43 = vpack.c.bf16 %v674_v42, %v673_v41  ;;  %v676_v45 = vld [vmem:[#allocation8 + $0x68] sm:$0xff]  ;;  %v677_v47 = vld [vmem:[#allocation8 + $0x70] sm:$0xff]  ;;  %v678_v48 = vld [vmem:[#allocation8 + $0x78] sm:$0xff] }
 0x226   : > { %v4616_v46 = vpack.c.bf16 %v676_v45, %v675_v44  ;;  %v4620_v49 = vpack.c.bf16 %v678_v48, %v677_v47  ;;  %v662_v50 = vld [vmem:[#allocation2 + $0x8] sm:$0xff]  ;;  %v763_v51 = vld [vmem:[#allocation2 + $0x10] sm:$0xff]  ;;  %v764_v52 = vld [vmem:[#allocation2 + $0x18] sm:$0xff] }
 0x227   : > { %v3375_v53 = vld [vmem:[#allocation10] ss:$0 sm:$0xff] }
 0x228   : > { %4599 = vmatpush3.bf16.msra.mxu0 %v4596_v30 }
 0x229   : > { %4601 = vmatprep.subr.bf16.mxu0 %v4600_v33 }
 0x22c   : > { %4603 = vmatpush3.bf16.msra.mxu0 %v4600_v33 }
 0x22d   : > { %4605 = vmatprep.subr.bf16.mxu0 %v4604_v37 }
 0x230   : > { %4607 = vmatpush3.bf16.msra.mxu0 %v4604_v37 }
 0x231   : > { %4609 = vmatprep.subr.bf16.mxu0 %v4608_v40 }
 0x234   : > { %4611 = vmatpush3.bf16.msra.mxu0 %v4608_v40 }
 0x235   : > { %4613 = vmatprep.subr.bf16.mxu0 %v4612_v43 }
 0x238   : > { %4615 = vmatpush3.bf16.msra.mxu0 %v4612_v43 }
 0x239   : > { %4617 = vmatprep.subr.bf16.mxu0 %v4616_v46 }
 0x23c   : > { %4619 = vmatpush3.bf16.msra.mxu0 %v4616_v46 }
 0x23d   : > { %4621 = vmatprep.subr.bf16.mxu0 %v4620_v49 }
 0x240   : > { %4623 = vmatpush3.bf16.msra.mxu0 %v4620_v49 }
 0x241   : > { %4625 = vmatprep.subr.bf16.mxu0 %v4592_v28 }
 0x243   : > { %3963 = vmatmul.mubr.f32.vlgmr.msra.gmra.mrb[16].mxu0 %v662_v50 }
 0x244   : > { %4627 = vmatpush3.bf16.msra.mxu0 %v4592_v28  ;;  %3997 = vmatprep.mubr.f32.mxu0 %v763_v51 }
 0x245   : > { %4629 = vmatprep.subr.bf16.mxu0 %v4596_v30 }
 0x248   : > { %4631 = vmatpush3.bf16.msra.mxu0 %v4596_v30 }
 0x249   : > { %4633 = vmatprep.subr.bf16.mxu0 %v4600_v33 }
 0x24c   : > { %4635 = vmatpush3.bf16.msra.mxu0 %v4600_v33 }
 0x24d   : > { %4637 = vmatprep.subr.bf16.mxu0 %v4604_v37 }
 0x250   : > { %4639 = vmatpush3.bf16.msra.mxu0 %v4604_v37 }
 0x251   : > { %4641 = vmatprep.subr.bf16.mxu0 %v4608_v40 }
 0x254   : > { %4643 = vmatpush3.bf16.msra.mxu0 %v4608_v40 }
 0x255   : > { %4645 = vmatprep.subr.bf16.mxu0 %v4612_v43 }
 0x258   : > { %4647 = vmatpush3.bf16.msra.mxu0 %v4612_v43 }
 0x259   : > { %4649 = vmatprep.subr.bf16.mxu0 %v4616_v46 }
 0x25c   : > { %4651 = vmatpush3.bf16.msra.mxu0 %v4616_v46 }
 0x25d   : > { %4653 = vmatprep.subr.bf16.mxu0 %v4620_v49 }
 0x260   : > { %4655 = vmatpush3.bf16.msra.mxu0 %v4620_v49 }
 0x263   : > { %3998 = vmatmul.mubr.f32.vlgmr.msra.gmra.mrb[18].mxu0 %v764_v52 }
 0x316   : > { %v3964_v54 = vpop.f32.mrb[16].mxu0 }
 0x317   : > { %v758_v55 = vadd.f32 %v3964_v54, %v3375_v53  ;;  %v752_v56 = vpop.f32.mrb[17].mxu0 }
 0x318   : > { %v753_v57 = vadd.f32 %v3375_v53, %v752_v56 }
 0x319   : > { %v762_v58 = vmax.f32 %v758_v55, 0.0 }
 0x31a   : > { %v761_v59 = vmax.f32 %v753_v57, 0.0 }
 0x31b   : > { %843 = vst [vmem:[#allocation3 + $0x10] sm:$0xff] %v762_v58 }
 0x31c   : > { %842 = vst [vmem:[#allocation3 + $0x8] sm:$0xff] %v761_v59  ;;  %851 = vst [vmem:[#allocation3 + $0x10] sm:$0xff] (!%p3376_p3), %v5657_v2 }
 0x31d   : > { %850 = vst [vmem:[#allocation3 + $0x8] sm:$0xff] (!%p3376_p3), %v5657_v2 }
 0x336   : > { %v3999_v60 = vpop.f32.mrb[18].mxu0  ;;  %849 = sbr.rel (%p3376_p3) target bundleno = 829 (0x33d), region = 88 }
 0x337   : > { %v837_v61 = vadd.f32 %v3999_v60, %v3375_v53  ;;  %v831_v62 = vpop.f32.mrb[19].mxu0 }
 0x338   : > { %v832_v63 = vadd.f32 %v3375_v53, %v831_v62 }
 0x339   : > { %v841_v0 = vmax.f32 %v837_v61, 0.0 }
 0x33a   : > { %v840_v1 = vmax.f32 %v832_v63, 0.0 }
 0x33b   : > { %845 = vst [vmem:[#allocation3 + $0xa0] sm:$0xff] %v841_v0 }
 0x33c   : > { %844 = vst [vmem:[#allocation3 + $0x98] sm:$0xff] %v840_v1 }
 0x33d PF: > { %s6849_s1 = sld [smem:[#allocation31_spill]] }
 0x343   : > { %p3377_p4 = scmp.ne.s32.totalorder %s6849_s1, 1 }
 0x344   : > { %v5658_v3 = vmov (!%p3377_p4), 0.0  }
 0x345   : > { %855 = sbr.rel (%p3377_p4) target bundleno = 844 (0x34c), region = 92  ;;  %856 = vst [vmem:[#allocation3 + $0x98] sm:$0xff] (!%p3377_p4), %v5658_v3  ;;  %857 = vst [vmem:[#allocation3 + $0xa0] sm:$0xff] (!%p3377_p4), %v5658_v3 }
 0x34c PF: > { %v1439_v4 = vld [vmem:[#allocation11 + $0x80] sm:$0xff]  ;;  %v1440_v5 = vld [vmem:[#allocation11 + $0x88] sm:$0xff]  ;;  %v1441_v6 = vld [vmem:[#allocation11 + $0x90] sm:$0xff]  ;;  %v860_v22 = vlaneseq  ;;  %s6878_s4 = sld [smem:[#allocation31_spill]]  ;;  %s6879_s19 = sld [smem:[#allocation32_spill]] }
 0x34d   : > { %v4720_v7 = vpack.c.bf16 %v1440_v5, %v1439_v4  ;;  %v1442_v8 = vld [vmem:[#allocation11 + $0x98] sm:$0xff]  ;;  %v1443_v10 = vld [vmem:[#allocation11 + $0xa0] sm:$0xff]  ;;  %v1444_v11 = vld [vmem:[#allocation11 + $0xa8] sm:$0xff]  ;;  %s3173_s9 = sshll.u32 %s6074_s20, 4  ;;  %s6880_s30 = sld [smem:[#allocation43_spill]]  ;;  %s6712_s9 = int_to_ptr.vmem [resolvable:$true] %s3173_s9 }
 0x34e   : > { %v4724_v9 = vpack.c.bf16 %v1442_v8, %v1441_v6  ;;  %v4728_v12 = vpack.c.bf16 %v1444_v11, %v1443_v10  ;;  %v1423_v13 = vld [vmem:[#allocation3 + $0x8] sm:$0xff]  ;;  %v1447_v17 = vld [vmem:[#allocation11 + $0xc0] sm:$0xff]  ;;  %v1448_v18 = vld [vmem:[#allocation11 + $0xc8] sm:$0xff]  ;;  %v6078_v26 = vshrl.u32 %v860_v22, 7  ;;  %s5530_s24 = scalar_lea.vmem %s6712_s9, 2048  ;;  %p6882_p10 = scmp.ne.s32.totalorder %s6837_s17, 0 }
 0x34f   : > { %4721 = vmatprep.subr.bf16.mxu1 %v4720_v7  ;;  %v1445_v14 = vld [vmem:[#allocation11 + $0xb0] sm:$0xff]  ;;  %v1446_v15 = vld [vmem:[#allocation11 + $0xb8] sm:$0xff]  ;;  %4144 = vmatprep.mubr.f32.mxu1 %v1423_v13  ;;  %v4736_v19 = vpack.c.bf16 %v1448_v18, %v1447_v17  ;;  %v1451_v24 = vld [vmem:[#allocation11 + $0xe0] sm:$0xff]  ;;  %p5531_p2 = scmp.ne.s32.totalorder %s6712_s9, %s5530_s24  ;;  %s5660_s5 = smov [#allocation17]  }
 0x350   : > { %4723 = vmatpush3.bf16.msra.mxu1 %v4720_v7  ;;  %v4732_v16 = vpack.c.bf16 %v1446_v15, %v1445_v14  ;;  %v1449_v20 = vld [vmem:[#allocation11 + $0xd0] sm:$0xff]  ;;  %v1450_v21 = vld [vmem:[#allocation11 + $0xd8] sm:$0xff]  ;;  %v1452_v25 = vld [vmem:[#allocation11 + $0xe8] sm:$0xff]  ;;  %v877_v30 = vcvt.s32.f32 %v6078_v26  ;;  %v6082_v31 = vadd.s32 8, %v6078_v26  ;;  %v6085_v36 = vadd.s32 16, %v6078_v26  ;;  %s5534_s15 = sshll.u32 %s5660_s5, 4  ;;  %s5535_s15 = int_to_ptr.vmem [resolvable:$false] %s5534_s15 }
 0x351   : > { %4725 = vmatprep.subr.bf16.mxu1 %v4724_v9  ;;  %v4740_v23 = vpack.c.bf16 %v1450_v21, %v1449_v20  ;;  %v4744_v27 = vpack.c.bf16 %v1452_v25, %v1451_v24  ;;  %v1453_v28 = vld [vmem:[#allocation11 + $0xf0] sm:$0xff]  ;;  %v1454_v29 = vld [vmem:[#allocation11 + $0xf8] sm:$0xff]  ;;  %v1680_v33 = vld [vmem:[#allocation11 + $0x100] sm:$0xff]  ;;  %v6088_v37 = vadd.s32 24, %v6078_v26  ;;  %v6091_v38 = vadd.s32 32, %v6078_v26  ;;  %p5532_p7 = pnand %p5531_p2, %p6882_p10  ;;  %s5536_s2 = scalar_lea.vmem %s5535_s15, 4096 }
 0x352   : > { %v4748_v32 = vpack.c.bf16 %v1454_v29, %v1453_v28  ;;  %v1681_v34 = vld [vmem:[#allocation11 + $0x108] sm:$0xff]  ;;  %v893_v35 = vadd.f32 0.5, %v877_v30  ;;  %v878_v39 = vcvt.s32.f32 %v6082_v31  ;;  %v6095_v41 = vadd.s32 40, %v6078_v26  ;;  %v1682_v42 = vld [vmem:[#allocation11 + $0x110] sm:$0xff]  ;;  %v1683_v43 = vld [vmem:[#allocation11 + $0x118] sm:$0xff]  ;;  %s3477_s14 = sshll.u32 %s6878_s4, 4  ;;  %p5537_p6 = scmp.lt.s32.totalorder %s6712_s9, %s5535_s15 }
 0x353   : > { %v4752_v40 = vpack.c.bf16 %v1681_v34, %v1680_v33  ;;  %v879_v45 = vcvt.s32.f32 %v6085_v36  ;;  %v880_v46 = vcvt.s32.f32 %v6088_v37  ;;  %v881_v47 = vcvt.s32.f32 %v6091_v38  ;;  %v1424_v49 = vld [vmem:[#allocation3 + $0x10] sm:$0xff]  ;;  %v1425_v50 = vld [vmem:[#allocation3 + $0x18] sm:$0xff]  ;;  %v1426_v61 = vld [vmem:[#allocation3 + $0x20] sm:$0xff]  ;;  %s3478_s23 = sshll.u32 %s6879_s19, 5  ;;  %s6881_s21 = smov %s6880_s30 }
 0x354   : > { %4727 = vmatpush3.bf16.msra.mxu1 %v4724_v9  ;;  %v909_v44 = vmul.f32 0.0625, %v893_v35  ;;  %v894_v48 = vadd.f32 0.5, %v878_v39  ;;  %v4756_v51 = vpack.c.bf16 %v1683_v43, %v1682_v42  ;;  %v882_v52 = vcvt.s32.f32 %v6095_v41  ;;  %v1684_v53 = vld [vmem:[#allocation11 + $0x120] sm:$0xff]  ;;  %v1685_v54 = vld [vmem:[#allocation11 + $0x128] sm:$0xff]  ;;  %v1427_v62 = vld [vmem:[#allocation3 + $0x28] sm:$0xff]  ;;  %s3170_s0 = sadd.s32 %s3478_s23, %s3477_s14  ;;  %p5533_p5 = pneg %p5532_p7 }
 0x355   : > { %4729 = vmatprep.subr.bf16.mxu1 %v4728_v12  ;;  %v895_v56 = vadd.f32 0.5, %v879_v45  ;;  %v896_v57 = vadd.f32 0.5, %v880_v46  ;;  %v897_v58 = vadd.f32 0.5, %v881_v47  ;;  %v6102_v60 = vadd.s32 48, %v6078_v26  ;;  %v1686_v1 = vld [vmem:[#allocation11 + $0x130] sm:$0xff]  ;;  %v1687_v2 = vld [vmem:[#allocation11 + $0x138] sm:$0xff]  ;;  %p5538_p8 = scmp.lt.s32.totalorder %s5536_s2, %s5530_s24 }
 0x356   : > { %v925_v55 = vfloor.f32 %v909_v44  ;;  %v910_v59 = vmul.f32 0.0625, %v894_v48  ;;  %v4760_v63 = vpack.c.bf16 %v1685_v54, %v1684_v53  ;;  %v898_v0 = vadd.f32 0.5, %v882_v52  ;;  %v1428_v10 = vld [vmem:[#allocation3 + $0x30] sm:$0xff]  ;;  %v1429_v11 = vld [vmem:[#allocation3 + $0x38] sm:$0xff]  ;;  %v1430_v24 = vld [vmem:[#allocation3 + $0x40] sm:$0xff]  ;;  %s3479_s6 = sshll.u32 %s3170_s0, 7 }
 0x357   : > { %v911_v4 = vmul.f32 0.0625, %v895_v56  ;;  %v912_v5 = vmul.f32 0.0625, %v896_v57  ;;  %v913_v6 = vmul.f32 0.0625, %v897_v58  ;;  %v883_v8 = vcvt.s32.f32 %v6102_v60  ;;  %v1688_v15 = vld [vmem:[#allocation11 + $0x140] sm:$0xff]  ;;  %v1431_v25 = vld [vmem:[#allocation3 + $0x48] sm:$0xff]  ;;  %v1693_v34 = vld [vmem:[#allocation11 + $0x168] sm:$0xff]  ;;  %s6710_s13 = scalar_lea.hbm %s6880_s30, %s3479_s6  ;;  %p5539_p9 = por %p5538_p8, %p5537_p6 }
 0x358   : > { %4731 = vmatpush3.bf16.msra.mxu1 %v4728_v12  ;;  %v5104_v3 = vtrunc.f32 %v925_v55  ;;  %v926_v7 = vfloor.f32 %v910_v59  ;;  %v6106_v9 = vadd.s32 56, %v6078_v26  ;;  %v4764_v12 = vpack.c.bf16 %v1687_v2, %v1686_v1  ;;  %v1692_v33 = vld [vmem:[#allocation11 + $0x160] sm:$0xff]  ;;  %v1695_v42 = vld [vmem:[#allocation11 + $0x178] sm:$0xff]  ;;  %v1890_v59 = vld [vmem:[#allocation11 + $0x188] sm:$0xff] }
 0x359   : > { %4733 = vmatprep.subr.bf16.mxu1 %v4732_v16  ;;  %v914_v13 = vmul.f32 0.0625, %v898_v0  ;;  %v6109_v14 = vadd.s32 64, %v6078_v26  ;;  %v927_v18 = vfloor.f32 %v911_v4  ;;  %v929_v20 = vfloor.f32 %v913_v6  ;;  %v1433_v56 = vld [vmem:[#allocation3 + $0x58] sm:$0xff]  ;;  %p5540_p1 = pnand %p5539_p9, %p5533_p5 }
 0x35a   : > { %v5105_v17 = vcvt.f32.s32 %v5104_v3  ;;  %v5106_v21 = vtrunc.f32 %v926_v7  ;;  %v899_v22 = vadd.f32 0.5, %v883_v8  ;;  %v6113_v28 = vadd.s32 72, %v6078_v26  ;;  %v1889_v58 = vld [vmem:[#allocation11 + $0x180] sm:$0xff] }
 0x35b   : > { %v6116_v29 = vadd.s32 80, %v6078_v26  ;;  %v930_v35 = vfloor.f32 %v914_v13  ;;  %v885_v39 = vcvt.s32.f32 %v6109_v14  ;;  %v5108_v44 = vtrunc.f32 %v927_v18  ;;  %v1117_v4 = vld [vmem:[#allocation11] sm:$0xff]  ;;  %v1434_v13 = vld [vmem:[#allocation3 + $0x60] sm:$0xff] }
 0x35c   : > { %4735 = vmatpush3.bf16.msra.mxu1 %v4732_v16  ;;  %v1689_v16 = vld [vmem:[#allocation11 + $0x148] sm:$0xff]  ;;  %v957_v43 = vmul.u32 16, %v5105_v17  ;;  %v6119_v46 = vtrunc.f32 %v929_v20  ;;  %v5107_v47 = vcvt.f32.s32 %v5106_v21  ;;  %v915_v48 = vmul.f32 0.0625, %v899_v22  ;;  %v1892_v17 = vld [vmem:[#allocation11 + $0x198] sm:$0xff] }
 0x35d   : > { %4737 = vmatprep.subr.bf16.mxu1 %v4736_v19  ;;  %v4768_v30 = vpack.c.bf16 %v1689_v16, %v1688_v15  ;;  %v6124_v53 = vpack.c.bf16 %v1693_v34, %v1692_v33  ;;  %v886_v54 = vcvt.s32.f32 %v6113_v28  ;;  %v887_v55 = vcvt.s32.f32 %v6116_v29  ;;  %v1891_v16 = vld [vmem:[#allocation11 + $0x190] sm:$0xff] }
 0x35e   : > { %v6136_v0 = vsub.s32 %v6078_v26, %v957_v43  ;;  %v5109_v1 = vcvt.f32.s32 %v5108_v44  ;;  %v5113_v3 = vcvt.f32.s32 %v6119_v46  ;;  %v958_v6 = vmul.u32 16, %v5107_v47  ;;  %v1435_v21 = vld [vmem:[#allocation3 + $0x68] sm:$0xff]  ;;  %v1122_v43 = vld [vmem:[#allocation11 + $0x28] sm:$0xff]  ;;  %v1436_v44 = vld [vmem:[#allocation3 + $0x70] sm:$0xff] }
 0x35f   : > { %v931_v7 = vfloor.f32 %v915_v48  ;;  %v6140_v15 = vpack.c.bf16 %v1890_v59, %v1889_v58  ;;  %v902_v18 = vadd.f32 0.5, %v886_v54  ;;  %v6143_v20 = vadd.s32 104, %v6078_v26 }
 0x360   : > { %4739 = vmatpush3.bf16.msra.mxu1 %v4736_v19  ;;  %v928_v19 = vfloor.f32 %v912_v5  ;;  %v1118_v5 = vld [vmem:[#allocation11 + $0x8] sm:$0xff]  ;;  %v6150_v34 = vpack.c.bf16 %v1892_v17, %v1891_v16  ;;  %v6154_v48 = vadd.s32 120, %v6078_v26  ;;  %vm1005_vm0 = vcmp.lt.s32.totalorder %v6136_v0, 15  ;;  %v1893_v16 = vld [vmem:[#allocation11 + $0x1a0] sm:$0xff] }
 0x361   : > { %4741 = vmatprep.subr.bf16.mxu1 %v4740_v23  ;;  %v890_v47 = vcvt.s32.f32 %v6143_v20  ;;  %v5659_v59 = vmov 0.0   ;;  %vm6797_vm3 = vcmp.gt.s32.totalorder %v6136_v0, 0 }
 0x362   : > { %v5110_v45 = vtrunc.f32 %v928_v19  ;;  %v903_v19 = vadd.f32 0.5, %v887_v55  ;;  %858 = vst [vmem:[#allocation3] sm:$0xff] %v5659_v59  ;;  %859 = vst [vmem:[#allocation3 + $0xa8] sm:$0xff] %v5659_v59 }
 0x364   : > { %4743 = vmatpush3.bf16.msra.mxu1 %v4740_v23  ;;  %v884_v23 = vcvt.s32.f32 %v6106_v9  ;;  %v5111_v2 = vcvt.f32.s32 %v5110_v45  ;;  %v918_v45 = vmul.f32 0.0625, %v902_v18  ;;  %v919_v46 = vmul.f32 0.0625, %v903_v19  ;;  %v1894_v18 = vld [vmem:[#allocation11 + $0x1a8] sm:$0xff] }
 0x365   : > { %4745 = vmatprep.subr.bf16.mxu1 %v4744_v27 }
 0x368   : > { %4747 = vmatpush3.bf16.msra.mxu1 %v4744_v27  ;;  %v1690_v27 = vld [vmem:[#allocation11 + $0x150] sm:$0xff] }
 0x369   : > { %4749 = vmatprep.subr.bf16.mxu1 %v4748_v32 }
 0x36c   : > { %4751 = vmatpush3.bf16.msra.mxu1 %v4748_v32  ;;  %v1691_v32 = vld [vmem:[#allocation11 + $0x158] sm:$0xff] }
 0x36d   : > { %4753 = vmatprep.subr.bf16.mxu1 %v4752_v40  ;;  %v4772_v52 = vpack.c.bf16 %v1691_v32, %v1690_v27  ;;  %v959_v27 = vmul.u32 16, %v5109_v1 }
 0x36f   : > { %4145 = vmatmul.mubr.f32.vlgmr.msra.gmra.mrb[0].mxu1 %v1424_v49  ;;  %v900_v49 = vadd.f32 0.5, %v884_v23 }
 0x370   : > { %4755 = vmatpush3.bf16.msra.mxu1 %v4752_v40  ;;  %4147 = vmatprep.mubr.f32.mxu1 %v1425_v50  ;;  %v1694_v40 = vld [vmem:[#allocation11 + $0x170] sm:$0xff]  ;;  %v6122_v50 = vadd.s32 88, %v6078_v26 }
 0x371   : > { %4757 = vmatprep.subr.bf16.mxu1 %v4756_v51  ;;  %v6128_v57 = vpack.c.bf16 %v1695_v42, %v1694_v40  ;;  %v916_v8 = vmul.f32 0.0625, %v900_v49  ;;  %v1121_v42 = vld [vmem:[#allocation11 + $0x20] sm:$0xff] }
 0x372   : > { %v1437_v49 = vld [vmem:[#allocation3 + $0x78] sm:$0xff]  ;;  %v4664_v58 = vpack.c.bf16 %v1122_v43, %v1121_v42  ;;  %v1053_v42 = vld [vmem:[#allocation3 + $0x7] sm:$0xff]  ;;  %v4792_v43 = vpack.c.bf16 %v1894_v18, %v1893_v16 }
 0x373   : > { %4148 = vmatmul.mubr.f32.gmra.mrb[2].mxu1 %v1426_v61  ;;  %v6130_v61 = vtrunc.f32 %v930_v35  ;;  %v5116_v35 = vtrunc.f32 %v931_v7  ;;  %v892_v7 = vcvt.s32.f32 %v6154_v48  ;;  %4032 = vmatprep.mubr.msk.f32.mxu0 %vm6797_vm3, %v1053_v42  ;;  %v1900_v42 = vld [vmem:[#allocation11 + $0x1d8] sm:$0xff] }
 0x374   : > { %4759 = vmatpush3.bf16.msra.mxu1 %v4756_v51  ;;  %4150 = vmatprep.mubr.f32.mxu1 %v1427_v62  ;;  %v1432_v51 = vld [vmem:[#allocation3 + $0x50] sm:$0xff]  ;;  %v901_v62 = vadd.f32 0.5, %v885_v39  ;;  %v932_v39 = vfloor.f32 %v916_v8 }
 0x375   : > { %4761 = vmatprep.subr.bf16.mxu1 %v4760_v63  ;;  %v5115_v32 = vcvt.f32.s32 %v6130_v61  ;;  %v5117_v61 = vcvt.f32.s32 %v5116_v35  ;;  %v1616_v8 = vld [vmem:[#allocation3 + $0x9] sm:$0xff] }
 0x376   : > { %v917_v22 = vmul.f32 0.0625, %v901_v62  ;;  %v5118_v62 = vtrunc.f32 %v932_v39 }
 0x377   : > { %4151 = vmatmul.mubr.f32.gmra.mrb[4].mxu1 %v1428_v10  ;;  %v888_v10 = vcvt.s32.f32 %v6122_v50  ;;  %v963_v19 = vmul.u32 16, %v5117_v61 }
 0x378   : > { %4763 = vmatpush3.bf16.msra.mxu1 %v4760_v63  ;;  %4153 = vmatprep.mubr.f32.mxu1 %v1429_v11  ;;  %v6133_v63 = vadd.s32 96, %v6078_v26  ;;  %v1119_v11 = vld [vmem:[#allocation11 + $0x10] sm:$0xff] }
 0x379   : > { %4765 = vmatprep.subr.bf16.mxu1 %v4764_v12  ;;  %v904_v40 = vadd.f32 0.5, %v888_v10 }
 0x37a   : > { %v889_v23 = vcvt.s32.f32 %v6133_v63 }
 0x37b   : > { %4154 = vmatmul.mubr.f32.gmra.mrb[6].mxu1 %v1430_v24  ;;  %v6147_v24 = vadd.s32 112, %v6078_v26  ;;  %v6163_v26 = vsub.s32 %v6085_v36, %v959_v27  ;;  %v6165_v1 = vmul.f32 0.0625, %v904_v40  ;;  %v962_v36 = vmul.u32 16, %v5115_v32 }
 0x37c   : > { %4767 = vmatpush3.bf16.msra.mxu1 %v4764_v12  ;;  %4156 = vmatprep.mubr.f32.mxu1 %v1431_v25  ;;  %v1120_v12 = vld [vmem:[#allocation11 + $0x18] sm:$0xff]  ;;  %v4656_v25 = vpack.c.bf16 %v1118_v5, %v1117_v4  ;;  %v905_v54 = vadd.f32 0.5, %v889_v23  ;;  %v935_v5 = vfloor.f32 %v919_v46  ;;  %v1125_v23 = vld [vmem:[#allocation11 + $0x40] sm:$0xff]  ;;  %v908_v32 = vadd.f32 0.5, %v892_v7 }
 0x37d   : > { %4769 = vmatprep.subr.bf16.mxu1 %v4768_v30  ;;  %v4660_v33 = vpack.c.bf16 %v1120_v12, %v1119_v11  ;;  %v891_v55 = vcvt.s32.f32 %v6147_v24  ;;  %v1124_v4 = vld [vmem:[#allocation11 + $0x38] sm:$0xff]  ;;  %vm1007_vm2 = vcmp.lt.s32.totalorder %v6163_v26, 15 }
 0x37e   : > { %4657 = vmatprep.subr.bf16.mxu0 %v4656_v25  ;;  %v921_v11 = vmul.f32 0.0625, %v905_v54  ;;  %v5124_v27 = vtrunc.f32 %v935_v5  ;;  %v1896_v54 = vld [vmem:[#allocation11 + $0x1b8] sm:$0xff]  ;;  %v924_v59 = vmul.f32 0.0625, %v908_v32  ;;  %v1130_v5 = vld [vmem:[#allocation11 + $0x68] sm:$0xff] }
 0x37f   : > { %4157 = vmatmul.mubr.f32.gmra.mrb[8].mxu1 %v1432_v51  ;;  %v933_v51 = vfloor.f32 %v917_v22  ;;  %4659 = vmatpush3.bf16.msra.mxu0 %v4656_v25  ;;  %v907_v12 = vadd.f32 0.5, %v891_v55  ;;  %v936_v22 = vfloor.f32 %v6165_v1  ;;  %v1126_v25 = vld [vmem:[#allocation11 + $0x48] sm:$0xff] }
 0x380   : > { %4771 = vmatpush3.bf16.msra.mxu1 %v4768_v30  ;;  %4159 = vmatprep.mubr.f32.mxu1 %v1433_v56  ;;  %v960_v30 = vmul.u32 16, %v5111_v2  ;;  %v961_v56 = vmul.u32 16, %v5113_v3  ;;  %v1123_v2 = vld [vmem:[#allocation11 + $0x30] sm:$0xff]  ;;  %v934_v3 = vfloor.f32 %v918_v45  ;;  %v937_v39 = vfloor.f32 %v921_v11 }
 0x381   : > { %4773 = vmatprep.subr.bf16.mxu1 %v4772_v52  ;;  %4661 = vmatprep.subr.bf16.mxu0 %v4660_v33  ;;  %v5120_v10 = vtrunc.f32 %v933_v51  ;;  %v4668_v17 = vpack.c.bf16 %v1124_v4, %v1123_v2  ;;  %v923_v40 = vmul.f32 0.0625, %v907_v12  ;;  %v6196_v45 = vsub.s32 %v6102_v60, %v963_v19  ;;  %v1895_v51 = vld [vmem:[#allocation11 + $0x1b0] sm:$0xff] }
 0x382   : > { %v6205_v60 = vld [vmem:[#allocation3 + $0x29] sm:$0xff]  ;;  %v5128_v1 = vtrunc.f32 %v937_v39  ;;  %v940_v12 = vfloor.f32 %v924_v59  ;;  %v1902_v59 = vld [vmem:[#allocation11 + $0x1e8] sm:$0xff] }
 0x383   : > { %4160 = vmatmul.mubr.f32.gmra.mrb[10].mxu1 %v1434_v13  ;;  %4663 = vmatpush3.bf16.msra.mxu0 %v4660_v33  ;;  %v6172_v13 = vsub.s32 %v6088_v37, %v960_v30  ;;  %v1617_v37 = vld [vmem:[#allocation3 + $0x11] sm:$0xff]  ;;  %v6183_v33 = vld [vmem:[#allocation3 + $0x19] sm:$0xff]  ;;  %v5121_v35 = vcvt.f32.s32 %v5120_v10  ;;  %vm6806_vm7 = vcmp.lt.s32.totalorder %v6196_v45, 15 }
 0x384   : > { %4775 = vmatpush3.bf16.msra.mxu1 %v4772_v52  ;;  %4162 = vmatprep.mubr.f32.mxu1 %v1435_v21  ;;  %v6160_v52 = vsub.s32 %v6082_v31, %v958_v6  ;;  %v1438_v31 = vld [vmem:[#allocation3 + $0x80] sm:$0xff]  ;;  %v906_v6 = vadd.f32 0.5, %v890_v47  ;;  %v5119_v21 = vcvt.f32.s32 %v5118_v62  ;;  %v5125_v62 = vcvt.f32.s32 %v5124_v27 }
 0x385   : > { %4777 = vmatprep.subr.bf16.mxu1 %v6124_v53  ;;  %4665 = vmatprep.subr.bf16.mxu0 %v4664_v58  ;;  %vm1008_vm4 = vcmp.lt.s32.totalorder %v6172_v13, 15  ;;  %v1127_v47 = vld [vmem:[#allocation11 + $0x50] sm:$0xff]  ;;  %v965_v61 = vmul.u32 16, %v5121_v35  ;;  %v5134_v27 = vtrunc.f32 %v940_v12  ;;  %v6294_v12 = vld [vmem:[#allocation3 + $0x79] sm:$0xff] }
 0x386   : > { %vm1006_vm1 = vcmp.lt.s32.totalorder %v6160_v52, 15  ;;  %v922_v30 = vmul.f32 0.0625, %v906_v6  ;;  %v964_v46 = vmul.u32 16, %v5119_v21  ;;  %v6219_v6 = vld [vmem:[#allocation3 + $0x31] sm:$0xff]  ;;  %vm6800_vm15 = vcmp.gt.s32.totalorder %v6160_v52, 0 }
 0x387   : > { %4163 = vmatmul.mubr.f32.gmra.mrb[12].mxu1 %v1436_v44  ;;  %4667 = vmatpush3.bf16.msra.mxu0 %v4664_v58  ;;  %v4672_v44 = vpack.c.bf16 %v1126_v25, %v1125_v23  ;;  %v6224_v16 = vsub.s32 %v6109_v14, %v965_v61  ;;  %v1132_v23 = vld [vmem:[#allocation11 + $0x78] sm:$0xff]  ;;  %v6233_v14 = vld [vmem:[#allocation3 + $0x41] sm:$0xff] }
 0x388   : > { %4779 = vmatpush3.bf16.msra.mxu1 %v6124_v53  ;;  %4165 = vmatprep.mubr.f32.mxu1 %v1437_v49  ;;  %v6175_v53 = vsub.s32 %v6091_v38, %v961_v56  ;;  %v5122_v38 = vtrunc.f32 %v934_v3  ;;  %v6202_v49 = vld [vmem:[#allocation3 + $0x21] sm:$0xff]  ;;  %v5126_v56 = vtrunc.f32 %v936_v22  ;;  %v938_v58 = vfloor.f32 %v922_v30  ;;  %v1129_v3 = vld [vmem:[#allocation11 + $0x60] sm:$0xff]  ;;  %v6239_v30 = vld [vmem:[#allocation3 + $0x49] sm:$0xff] }
 0x389   : > { %4781 = vmatprep.subr.bf16.mxu1 %v6128_v57  ;;  %4669 = vmatprep.subr.bf16.mxu0 %v4668_v17  ;;  %v6213_v4 = vsub.s32 %v6106_v9, %v964_v46  ;;  %v6221_v9 = vld [vmem:[#allocation3 + $0x39] sm:$0xff]  ;;  %v4680_v19 = vpack.c.bf16 %v1130_v5, %v1129_v3  ;;  %v1131_v22 = vld [vmem:[#allocation11 + $0x70] sm:$0xff]  ;;  %vm6796_vm9 = vcmp.lt.s32.totalorder %v6224_v16, 15 }
 0x38a   : > { %vm6809_vm5 = vcmp.lt.s32.totalorder %v6175_v53, 15  ;;  %v5123_v55 = vcvt.f32.s32 %v5122_v38  ;;  %v5127_v10 = vcvt.f32.s32 %v5126_v56  ;;  %v5130_v11 = vtrunc.f32 %v938_v58  ;;  %v1901_v58 = vld [vmem:[#allocation11 + $0x1e0] sm:$0xff]  ;;  %v1903_v5 = vld [vmem:[#allocation11 + $0x1f0] sm:$0xff] }
 0x38b   : > { %4166 = vmatmul.mubr.f32.gmra.mrb[14].mxu1 %v1438_v31  ;;  %4671 = vmatpush3.bf16.msra.mxu0 %v4668_v17  ;;  %v4796_v31 = vpack.c.bf16 %v1896_v54, %v1895_v51  ;;  %v967_v17 = vmul.u32 16, %v5125_v62  ;;  %vm6807_vm8 = vcmp.lt.s32.totalorder %v6213_v4, 15  ;;  %v6257_v51 = vld [vmem:[#allocation3 + $0x59] sm:$0xff] }
 0x38c   : > { %4783 = vmatpush3.bf16.msra.mxu1 %v6128_v57  ;;  %4200 = vmatprep.mubr.msk.f32.mxu1 %vm1005_vm0, %v1616_v8  ;;  %v6187_v57 = vsub.s32 %v6095_v41, %v962_v36  ;;  %v1128_v41 = vld [vmem:[#allocation11 + $0x58] sm:$0xff]  ;;  %v966_v7 = vmul.u32 16, %v5123_v55  ;;  %v1897_v8 = vld [vmem:[#allocation11 + $0x1c0] sm:$0xff]  ;;  %v1898_v36 = vld [vmem:[#allocation11 + $0x1c8] sm:$0xff]  ;;  %v5131_v38 = vcvt.f32.s32 %v5130_v11 }
 0x38d   : > { %4785 = vmatprep.subr.bf16.mxu1 %v6140_v15  ;;  %4673 = vmatprep.subr.bf16.mxu0 %v4672_v44  ;;  %v4676_v2 = vpack.c.bf16 %v1128_v41, %v1127_v47  ;;  %v4800_v21 = vpack.c.bf16 %v1898_v36, %v1897_v8  ;;  %v6242_v32 = vsub.s32 %v6116_v29, %v967_v17  ;;  %v6251_v29 = vld [vmem:[#allocation3 + $0x51] sm:$0xff]  ;;  %v5135_v41 = vcvt.f32.s32 %v5134_v27  ;;  %v1042_v11 = vld [vmem:[#allocation11 + $0x228] sm:$0xff]  ;;  %v6311_v27 = vld [vmem:[#allocation3 + $0x27] sm:$0xff] }
 0x38e   : > { %vm6808_vm6 = vcmp.lt.s32.totalorder %v6187_v57, 15  ;;  %v6236_v25 = vsub.s32 %v6113_v28, %v966_v7  ;;  %v1037_v28 = vld [vmem:[#allocation11 + $0x200] sm:$0xff]  ;;  %v970_v47 = vmul.u32 16, %v5131_v38  ;;  %v1904_v7 = vld [vmem:[#allocation11 + $0x1f8] sm:$0xff] }
 0x38f   : > { %4201 = vmatmul.mubr.msk.f32.vlgmr.msra.gmra.mrb[0].mxu1 %vm1006_vm1, %v1617_v37  ;;  %4675 = vmatpush3.bf16.msra.mxu0 %v4672_v44  ;;  %v968_v37 = vmul.u32 16, %v5127_v10  ;;  %v1038_v44 = vld [vmem:[#allocation11 + $0x208] sm:$0xff]  ;;  %vm6792_vm11 = vcmp.lt.s32.totalorder %v6242_v32, 15  ;;  %v972_v62 = vmul.u32 16, %v5135_v41  ;;  %v1054_v8 = vld [vmem:[#allocation3 + $0xf] sm:$0xff]  ;;  %v4812_v17 = vpack.c.bf16 %v1904_v7, %v1903_v5 }
 0x390   : > { %4787 = vmatpush3.bf16.msra.mxu1 %v6140_v15  ;;  %4203 = vmatprep.mubr.msk.f32.mxu1 %vm1007_vm2, %v6183_v33  ;;  %v939_v15 = vfloor.f32 %v923_v40  ;;  %v1899_v40 = vld [vmem:[#allocation11 + $0x1d0] sm:$0xff]  ;;  %vm6793_vm10 = vcmp.lt.s32.totalorder %v6236_v25, 15  ;;  %v4688_v61 = vpack.c.bf16 %v1038_v44, %v1037_v28  ;;  %v6287_v36 = vld [vmem:[#allocation3 + $0x71] sm:$0xff]  ;;  %v1046_v28 = vld [vmem:[#allocation11 + $0x248] sm:$0xff] }
 0x391   : > { %4789 = vmatprep.subr.bf16.mxu1 %v6150_v34  ;;  %4677 = vmatprep.subr.bf16.mxu0 %v4676_v2  ;;  %v6254_v46 = vsub.s32 %v6122_v50, %v968_v37  ;;  %v4804_v54 = vpack.c.bf16 %v1900_v42, %v1899_v40  ;;  %v6269_v50 = vld [vmem:[#allocation3 + $0x61] sm:$0xff]  ;;  %v1041_v10 = vld [vmem:[#allocation11 + $0x220] sm:$0xff]  ;;  %v1044_v37 = vld [vmem:[#allocation11 + $0x238] sm:$0xff] }
 0x392   : > { %v5132_v18 = vtrunc.f32 %v939_v15  ;;  %v1040_v15 = vld [vmem:[#allocation11 + $0x218] sm:$0xff]  ;;  %v2102_v41 = vld [vmem:[#allocation11 + $0x2a0] sm:$0xff] }
 0x393   : > { %4204 = vmatmul.mubr.msk.f32.gmra.mrb[2].mxu1 %vm1008_vm4, %v6202_v49  ;;  %4679 = vmatpush3.bf16.msra.mxu0 %v4676_v2  ;;  %vm6790_vm12 = vcmp.lt.s32.totalorder %v6254_v46, 15  ;;  %v6275_v2 = vld [vmem:[#allocation3 + $0x69] sm:$0xff] }
 0x394   : > { %4791 = vmatpush3.bf16.msra.mxu1 %v6150_v34  ;;  %4206 = vmatprep.mubr.msk.f32.mxu1 %vm6809_vm5, %v6205_v60  ;;  %v5129_v34 = vcvt.f32.s32 %v5128_v1  ;;  %v5133_v39 = vcvt.f32.s32 %v5132_v18  ;;  %v1039_v1 = vld [vmem:[#allocation11 + $0x210] sm:$0xff]  ;;  %v2098_v18 = vld [vmem:[#allocation11 + $0x280] sm:$0xff] }
 0x395   : > { %4793 = vmatprep.subr.bf16.mxu1 %v4792_v43  ;;  %4681 = vmatprep.subr.bf16.mxu0 %v4680_v19  ;;  %v6324_v42 = vld [vmem:[#allocation3 + $0x2f] sm:$0xff] }
 0x396   : > { %v969_v35 = vmul.u32 16, %v5129_v34  ;;  %v971_v56 = vmul.u32 16, %v5133_v39  ;;  %v1857_v34 = vld [vmem:[#allocation3 + $0x17] sm:$0xff]  ;;  %v2101_v39 = vld [vmem:[#allocation11 + $0x298] sm:$0xff] }
 0x397   : > { %4207 = vmatmul.mubr.msk.f32.gmra.mrb[4].mxu1 %vm6808_vm6, %v6219_v6  ;;  %4683 = vmatpush3.bf16.msra.mxu0 %v4680_v19  ;;  %v2099_v19 = vld [vmem:[#allocation11 + $0x288] sm:$0xff]  ;;  %v6359_v7 = vld [vmem:[#allocation3 + $0x4f] sm:$0xff] }
 0x398   : > { %4795 = vmatpush3.bf16.msra.mxu1 %v4792_v43  ;;  %4209 = vmatprep.mubr.msk.f32.mxu1 %vm6806_vm7, %v6221_v9  ;;  %v4684_v43 = vpack.c.bf16 %v1132_v23, %v1131_v22  ;;  %v6260_v55 = vsub.s32 %v6133_v63, %v969_v35  ;;  %v6272_v63 = vsub.s32 %v6143_v20, %v970_v47  ;;  %v1858_v22 = vld [vmem:[#allocation3 + $0x1f] sm:$0xff]  ;;  %v6327_v47 = vld [vmem:[#allocation3 + $0x37] sm:$0xff] }
 0x399   : > { %4797 = vmatprep.subr.bf16.mxu1 %v4796_v31  ;;  %v6278_v3 = vsub.s32 %v6147_v24, %v971_v56  ;;  %v4692_v20 = vpack.c.bf16 %v1040_v15, %v1039_v1  ;;  %v6290_v24 = vsub.s32 %v6154_v48, %v972_v62  ;;  %v6304_v48 = vld [vmem:[#allocation3 + $0x81] sm:$0xff]  ;;  %v4816_v38 = vpack.c.bf16 %v2099_v19, %v2098_v18 }
 0x39a   : > { %4685 = vmatprep.subr.bf16.mxu0 %v4684_v43  ;;  %vm6791_vm13 = vcmp.lt.s32.totalorder %v6260_v55, 15  ;;  %vm6794_vm14 = vcmp.lt.s32.totalorder %v6272_v63, 15  ;;  %v1043_v23 = vld [vmem:[#allocation11 + $0x230] sm:$0xff] }
 0x39b   : > { %4210 = vmatmul.mubr.msk.f32.gmra.mrb[6].mxu1 %vm6807_vm8, %v6233_v14  ;;  %4687 = vmatpush3.bf16.msra.mxu0 %v4684_v43  ;;  %v2100_v35 = vld [vmem:[#allocation11 + $0x290] sm:$0xff]  ;;  %v4700_v40 = vpack.c.bf16 %v1044_v37, %v1043_v23  ;;  %v1045_v43 = vld [vmem:[#allocation11 + $0x240] sm:$0xff] }
 0x39c   : > { %4799 = vmatpush3.bf16.msra.mxu1 %v4796_v31  ;;  %4212 = vmatprep.mubr.msk.f32.mxu1 %vm6796_vm9, %v6239_v30  ;;  %v4808_v31 = vpack.c.bf16 %v1902_v59, %v1901_v58  ;;  %v4820_v44 = vpack.c.bf16 %v2101_v39, %v2100_v35  ;;  %vm6803_vm9 = vcmp.gt.s32.totalorder %v6196_v45, 0  ;;  %v4704_v56 = vpack.c.bf16 %v1046_v28, %v1045_v43  ;;  %v6341_v58 = vld [vmem:[#allocation3 + $0x3f] sm:$0xff]  ;;  %v6344_v1 = vld [vmem:[#allocation3 + $0x47] sm:$0xff]  ;;  %v6398_v28 = vld [vmem:[#allocation3 + $0x77] sm:$0xff] }
 0x39d   : > { %4801 = vmatprep.subr.bf16.mxu1 %v4800_v21  ;;  %4689 = vmatprep.subr.bf16.mxu0 %v4688_v61  ;;  %v1047_v59 = vld [vmem:[#allocation11 + $0x250] sm:$0xff]  ;;  %v2109_v35 = vld [vmem:[#allocation11 + $0x2d8] sm:$0xff] }
 0x39e   : > { %4033 = vmatmul.mubr.msk.f32.vlgmr.msra.gmra.mrb[20].mxu0 %vm6800_vm15, %v1054_v8  ;;  %v2104_v15 = vld [vmem:[#allocation11 + $0x2b0] sm:$0xff]  ;;  %v1049_v8 = vld [vmem:[#allocation11 + $0x260] sm:$0xff] }
 0x39f   : > { %4213 = vmatmul.mubr.msk.f32.gmra.mrb[8].mxu1 %vm6793_vm10, %v6251_v29  ;;  %4691 = vmatpush3.bf16.msra.mxu0 %v4688_v61  ;;  %vm6802_vm10 = vcmp.gt.s32.totalorder %v6172_v13, 0  ;;  %v1048_v61 = vld [vmem:[#allocation11 + $0x258] sm:$0xff]  ;;  %v6377_v19 = vld [vmem:[#allocation3 + $0x5f] sm:$0xff] }
 0x3a0   : > { %4803 = vmatpush3.bf16.msra.mxu1 %v4800_v21  ;;  %4215 = vmatprep.mubr.msk.f32.mxu1 %vm6792_vm11, %v6257_v51  ;;  %v4696_v21 = vpack.c.bf16 %v1042_v11, %v1041_v10  ;;  %vm6798_vm11 = vcmp.lt.s32.totalorder %v6290_v24, 15  ;;  %v4708_v5 = vpack.c.bf16 %v1048_v61, %v1047_v59  ;;  %v6362_v11 = vld [vmem:[#allocation3 + $0x57] sm:$0xff]  ;;  %v6380_v37 = vld [vmem:[#allocation3 + $0x67] sm:$0xff] }
 0x3a1   : > { %4805 = vmatprep.subr.bf16.mxu1 %v4804_v54  ;;  %4693 = vmatprep.subr.bf16.mxu0 %v4692_v20  ;;  %v2112_v61 = vld [vmem:[#allocation11 + $0x2f0] sm:$0xff] }
 0x3a3   : > { %4216 = vmatmul.mubr.msk.f32.gmra.mrb[10].mxu1 %vm6790_vm12, %v6269_v50  ;;  %vm6795_vm12 = vcmp.lt.s32.totalorder %v6278_v3, 15  ;;  %4695 = vmatpush3.bf16.msra.mxu0 %v4692_v20  ;;  %v1050_v20 = vld [vmem:[#allocation11 + $0x268] sm:$0xff] }
 0x3a4   : > { %4807 = vmatpush3.bf16.msra.mxu1 %v4804_v54  ;;  %4218 = vmatprep.mubr.msk.f32.mxu1 %vm6791_vm13, %v6275_v2  ;;  %vm6799_vm13 = vcmp.gt.s32.totalorder %v6163_v26, 0  ;;  %v2103_v54 = vld [vmem:[#allocation11 + $0x2a8] sm:$0xff]  ;;  %v4712_v18 = vpack.c.bf16 %v1050_v20, %v1049_v8  ;;  %v6427_v8 = vld [vmem:[#allocation3 + $0x28] sm:$0xff]  ;;  %v2307_v20 = vld [vmem:[#allocation11 + $0x300] sm:$0xff] }
 0x3a5   : > { %4809 = vmatprep.subr.bf16.mxu1 %v4808_v31  ;;  %4035 = vmatprep.mubr.msk.f32.mxu0 %vm6799_vm13, %v1857_v34  ;;  %v4824_v62 = vpack.c.bf16 %v2103_v54, %v2102_v41  ;;  %v2111_v41 = vld [vmem:[#allocation11 + $0x2e8] sm:$0xff] }
 0x3a6   : > { %4036 = vmatmul.mubr.msk.f32.gmra.mrb[22].mxu0 %vm6802_vm10, %v1858_v22  ;;  %4697 = vmatprep.subr.bf16.mxu0 %v4696_v21  ;;  %v1021_v54 = vld [vmem:[#allocation3 + $0x18] sm:$0xff] }
 0x3a7   : > { %4219 = vmatmul.mubr.msk.f32.gmra.mrb[12].mxu1 %vm6794_vm14, %v6287_v36  ;;  %vm6801_vm14 = vcmp.gt.s32.totalorder %v6175_v53, 0  ;;  %4699 = vmatpush3.bf16.msra.mxu0 %v4696_v21  ;;  %v1051_v21 = vld [vmem:[#allocation11 + $0x270] sm:$0xff] }
 0x3a8   : > { %4811 = vmatpush3.bf16.msra.mxu1 %v4808_v31  ;;  %4221 = vmatprep.mubr.msk.f32.mxu1 %vm6795_vm12, %v6294_v12  ;;  %vm6804_vm12 = vcmp.gt.s32.totalorder %v6187_v57, 0  ;;  %v2105_v31 = vld [vmem:[#allocation11 + $0x2b8] sm:$0xff] }
 0x3a9   : > { %4813 = vmatprep.subr.bf16.mxu1 %v4812_v17  ;;  %4038 = vmatprep.mubr.msk.f32.mxu0 %vm6801_vm14, %v6311_v27  ;;  %v4828_v10 = vpack.c.bf16 %v2105_v31, %v2104_v15  ;;  %v1022_v15 = vld [vmem:[#allocation3 + $0x20] sm:$0xff] }
 0x3aa   : > { %4039 = vmatmul.mubr.msk.f32.gmra.mrb[24].mxu0 %vm6804_vm12, %v6324_v42  ;;  %4701 = vmatprep.subr.bf16.mxu0 %v4700_v40  ;;  %v6425_v31 = vld [vmem:[#allocation3 + $0x87] sm:$0xff] }
 0x3ab   : > { %4222 = vmatmul.mubr.msk.f32.gmra.mrb[14].mxu1 %vm6798_vm11, %v6304_v48  ;;  %4041 = vmatprep.mubr.msk.f32.mxu0 %vm6803_vm9, %v6327_v47  ;;  %vm6805_vm11 = vcmp.gt.s32.totalorder %v6224_v16, 0 }
 0x3ac   : > { %4815 = vmatpush3.bf16.msra.mxu1 %v4812_v17  ;;  %4256 = vmatprep.mubr.msk.f32.mxu1 %vm6797_vm3, %v1857_v34  ;;  %vm996_vm3 = vcmp.gt.s32.totalorder %v6213_v4, 0  ;;  %v2106_v17 = vld [vmem:[#allocation11 + $0x2c0] sm:$0xff]  ;;  %v2107_v34 = vld [vmem:[#allocation11 + $0x2c8] sm:$0xff] }
 0x3ad   : > { %4817 = vmatprep.subr.bf16.mxu1 %v4816_v38  ;;  %4703 = vmatpush3.bf16.msra.mxu0 %v4700_v40  ;;  %v4832_v23 = vpack.c.bf16 %v2107_v34, %v2106_v17  ;;  %v6395_v40 = vld [vmem:[#allocation3 + $0x6f] sm:$0xff] }
 0x3ae   : > { %4042 = vmatmul.mubr.msk.f32.gmra.mrb[26].mxu0 %vm996_vm3, %v6341_v58  ;;  %4705 = vmatprep.subr.bf16.mxu0 %v4704_v56  ;;  %v6436_v17 = vld [vmem:[#allocation3 + $0x8f] sm:$0xff] }
 0x3af   : > { %4257 = vmatmul.mubr.msk.f32.vlgmr.msra.gmra.mrb[0].mxu1 %vm6800_vm15, %v1858_v22  ;;  %4044 = vmatprep.mubr.msk.f32.mxu0 %vm6805_vm11, %v6344_v1  ;;  %vm999_vm15 = vcmp.gt.s32.totalorder %v6242_v32, 0  ;;  %v1052_v22 = vld [vmem:[#allocation11 + $0x278] sm:$0xff] }
 0x3b0   : > { %4819 = vmatpush3.bf16.msra.mxu1 %v4816_v38  ;;  %4259 = vmatprep.mubr.msk.f32.mxu1 %vm6799_vm13, %v6311_v27  ;;  %vm998_vm13 = vcmp.gt.s32.totalorder %v6236_v25, 0  ;;  %v2108_v38 = vld [vmem:[#allocation11 + $0x2d0] sm:$0xff]  ;;  %v4716_v39 = vpack.c.bf16 %v1052_v22, %v1051_v21  ;;  %v6438_v34 = vld [vmem:[#allocation3 + $0x30] sm:$0xff]  ;;  %v6440_v21 = vld [vmem:[#allocation3 + $0x38] sm:$0xff] }
 0x3b1   : > { %4821 = vmatprep.subr.bf16.mxu1 %v4820_v44  ;;  %4707 = vmatpush3.bf16.msra.mxu0 %v4704_v56  ;;  %v4836_v43 = vpack.c.bf16 %v2109_v35, %v2108_v38  ;;  %v6413_v56 = vld [vmem:[#allocation3 + $0x7f] sm:$0xff] }
 0x3b2   : > { %4045 = vmatmul.mubr.msk.f32.gmra.mrb[28].mxu0 %vm998_vm13, %v6359_v7  ;;  %4709 = vmatprep.subr.bf16.mxu0 %v4708_v5  ;;  %v2309_v22 = vld [vmem:[#allocation11 + $0x310] sm:$0xff] }
 0x3b3   : > { %4260 = vmatmul.mubr.msk.f32.gmra.mrb[2].mxu1 %vm6802_vm10, %v6324_v42  ;;  %4047 = vmatprep.mubr.msk.f32.mxu0 %vm999_vm15, %v6362_v11  ;;  %vm1001_vm10 = vcmp.gt.s32.totalorder %v6260_v55, 0  ;;  %v6450_v38 = vld [vmem:[#allocation3 + $0x40] sm:$0xff] }
 0x3b4   : > { %4823 = vmatpush3.bf16.msra.mxu1 %v4820_v44  ;;  %4262 = vmatprep.mubr.msk.f32.mxu1 %vm6801_vm14, %v6327_v47  ;;  %vm1000_vm14 = vcmp.gt.s32.totalorder %v6254_v46, 0  ;;  %v2110_v44 = vld [vmem:[#allocation11 + $0x2e0] sm:$0xff] }
 0x3b5   : > { %4825 = vmatprep.subr.bf16.mxu1 %v4824_v62  ;;  %4711 = vmatpush3.bf16.msra.mxu0 %v4708_v5  ;;  %v4840_v59 = vpack.c.bf16 %v2111_v41, %v2110_v44  ;;  %v2312_v44 = vld [vmem:[#allocation11 + $0x328] sm:$0xff] }
 0x3b6   : > { %4048 = vmatmul.mubr.msk.f32.gmra.mrb[30].mxu0 %vm1000_vm14, %v6377_v19  ;;  %4713 = vmatprep.subr.bf16.mxu0 %v4712_v18 }
 0x3b7   : > { %4263 = vmatmul.mubr.msk.f32.gmra.mrb[4].mxu1 %vm6804_vm12, %v6341_v58  ;;  %4050 = vmatprep.mubr.msk.f32.mxu0 %vm1001_vm10, %v6380_v37  ;;  %vm1003_vm12 = vcmp.gt.s32.totalorder %v6278_v3, 0 }
 0x3b8   : > { %4827 = vmatpush3.bf16.msra.mxu1 %v4824_v62  ;;  %4265 = vmatprep.mubr.msk.f32.mxu1 %vm6803_vm9, %v6344_v1  ;;  %vm1002_vm9 = vcmp.gt.s32.totalorder %v6272_v63, 0  ;;  %v2113_v62 = vld [vmem:[#allocation11 + $0x2f8] sm:$0xff] }
 0x3b9   : > { %4829 = vmatprep.subr.bf16.mxu1 %v4828_v10  ;;  %4715 = vmatpush3.bf16.msra.mxu0 %v4712_v18  ;;  %v4844_v5 = vpack.c.bf16 %v2113_v62, %v2112_v61  ;;  %v2314_v61 = vld [vmem:[#allocation11 + $0x338] sm:$0xff] }
 0x3ba   : > { %4051 = vmatmul.mubr.msk.f32.gmra.mrb[32].mxu0 %vm1002_vm9, %v6395_v40  ;;  %4717 = vmatprep.subr.bf16.mxu0 %v4716_v39  ;;  %v6476_v62 = vld [vmem:[#allocation3 + $0x68] sm:$0xff] }
 0x3bb   : > { %4266 = vmatmul.mubr.msk.f32.gmra.mrb[6].mxu1 %vm996_vm3, %v6359_v7  ;;  %4053 = vmatprep.mubr.msk.f32.mxu0 %vm1003_vm12, %v6398_v28 }
 0x3bc   : > { %4831 = vmatpush3.bf16.msra.mxu1 %v4828_v10  ;;  %4268 = vmatprep.mubr.msk.f32.mxu1 %vm6805_vm11, %v6362_v11  ;;  %vm1004_vm11 = vcmp.gt.s32.totalorder %v6290_v24, 0  ;;  %v2308_v10 = vld [vmem:[#allocation11 + $0x308] sm:$0xff] }
 0x3bd   : > { %4833 = vmatprep.subr.bf16.mxu1 %v4832_v23  ;;  %4719 = vmatpush3.bf16.msra.mxu0 %v4716_v39  ;;  %v4848_v18 = vpack.c.bf16 %v2308_v10, %v2307_v20  ;;  %v6452_v39 = vld [vmem:[#allocation3 + $0x48] sm:$0xff]  ;;  %v6488_v20 = vld [vmem:[#allocation3 + $0x78] sm:$0xff] }
 0x3be   : > { %4054 = vmatmul.mubr.msk.f32.gmra.mrb[34].mxu0 %vm1004_vm11, %v6413_v56  ;;  %v2317_v10 = vld [vmem:[#allocation11 + $0x350] sm:$0xff] }
 0x3bf   : > { %4269 = vmatmul.mubr.msk.f32.gmra.mrb[8].mxu1 %vm998_vm13, %v6377_v19  ;;  %4088 = vmatprep.mubr.f32.mxu0 %v1021_v54  ;;  %v6464_v54 = vld [vmem:[#allocation3 + $0x58] sm:$0xff] }
 0x3c0   : > { %4835 = vmatpush3.bf16.msra.mxu1 %v4832_v23  ;;  %4271 = vmatprep.mubr.msk.f32.mxu1 %vm999_vm15, %v6380_v37  ;;  %v2310_v23 = vld [vmem:[#allocation11 + $0x318] sm:$0xff] }
 0x3c1   : > { %4837 = vmatprep.subr.bf16.mxu1 %v4836_v43  ;;  %v4852_v35 = vpack.c.bf16 %v2310_v23, %v2309_v22  ;;  %v6500_v22 = vld [vmem:[#allocation3 + $0x88] sm:$0xff]  ;;  %v2319_v23 = vld [vmem:[#allocation11 + $0x360] sm:$0xff] }
 0x3c2   : > { %4089 = vmatmul.mubr.f32.vlgmr.msra.gmra.mrb[20].mxu0 %v1022_v15  ;;  %v2315_v15 = vld [vmem:[#allocation11 + $0x340] sm:$0xff] }
 0x3c3   : > { %4272 = vmatmul.mubr.msk.f32.gmra.mrb[10].mxu1 %vm1000_vm14, %v6395_v40  ;;  %4091 = vmatprep.mubr.f32.mxu0 %v6427_v8 }
 0x3c4   : > { %4839 = vmatpush3.bf16.msra.mxu1 %v4836_v43  ;;  %4274 = vmatprep.mubr.msk.f32.mxu1 %vm1001_vm10, %v6398_v28  ;;  %v2311_v43 = vld [vmem:[#allocation11 + $0x320] sm:$0xff] }
 0x3c5   : > { %4841 = vmatprep.subr.bf16.mxu1 %v4840_v59  ;;  %v4856_v41 = vpack.c.bf16 %v2312_v44, %v2311_v43  ;;  %v2321_v43 = vld [vmem:[#allocation11 + $0x370] sm:$0xff]  ;;  %v2322_v44 = vld [vmem:[#allocation11 + $0x378] sm:$0xff] }
 0x3c6   : > { %4092 = vmatmul.mubr.f32.gmra.mrb[22].mxu0 %v6438_v34 }
 0x3c7   : > { %4275 = vmatmul.mubr.msk.f32.gmra.mrb[12].mxu1 %vm1002_vm9, %v6413_v56  ;;  %4094 = vmatprep.mubr.f32.mxu0 %v6440_v21 }
 0x3c8   : > { %4843 = vmatpush3.bf16.msra.mxu1 %v4840_v59  ;;  %4277 = vmatprep.mubr.msk.f32.mxu1 %vm1003_vm12, %v6425_v31  ;;  %v2313_v59 = vld [vmem:[#allocation11 + $0x330] sm:$0xff] }
 0x3c9   : > { %4845 = vmatprep.subr.bf16.mxu1 %v4844_v5 }
 0x3ca   : > { %4095 = vmatmul.mubr.f32.gmra.mrb[24].mxu0 %v6450_v38 }
 0x3cb   : > { %4278 = vmatmul.mubr.msk.f32.gmra.mrb[14].mxu1 %vm1004_vm11, %v6436_v17  ;;  %4097 = vmatprep.mubr.f32.mxu0 %v6452_v39 }
 0x3cc   : > { %4847 = vmatpush3.bf16.msra.mxu1 %v4844_v5  ;;  %4312 = vmatprep.mubr.msk.f32.mxu1 %vm1005_vm0, %v6183_v33  ;;  %v6462_v33 = vld [vmem:[#allocation3 + $0x50] sm:$0xff]  ;;  %v2316_v5 = vld [vmem:[#allocation11 + $0x348] sm:$0xff] }
 0x3cd   : > { %4849 = vmatprep.subr.bf16.mxu1 %v4848_v18 }
 0x3ce   : > { %4098 = vmatmul.mubr.f32.gmra.mrb[26].mxu0 %v6462_v33 }
 0x3cf   : > { %4313 = vmatmul.mubr.msk.f32.vlgmr.msra.gmra.mrb[0].mxu1 %vm1006_vm1, %v6202_v49  ;;  %4100 = vmatprep.mubr.f32.mxu0 %v6464_v54  ;;  %v6474_v49 = vld [vmem:[#allocation3 + $0x60] sm:$0xff] }
 0x3d0   : > { %4851 = vmatpush3.bf16.msra.mxu1 %v4848_v18  ;;  %4315 = vmatprep.mubr.msk.f32.mxu1 %vm1007_vm2, %v6205_v60  ;;  %v4860_v60 = vpack.c.bf16 %v2314_v61, %v2313_v59  ;;  %v2318_v18 = vld [vmem:[#allocation11 + $0x358] sm:$0xff]  ;;  %v2501_v59 = vld [vmem:[#allocation11 + $0x388] sm:$0xff] }
 0x3d1   : > { %4853 = vmatprep.subr.bf16.mxu1 %v4852_v35  ;;  %v6527_v61 = vld [vmem:[#allocation3 + $0x91] sm:$0xff] }
 0x3d2   : > { %4101 = vmatmul.mubr.f32.gmra.mrb[28].mxu0 %v6474_v49 }
 0x3d3   : > { %4316 = vmatmul.mubr.msk.f32.gmra.mrb[2].mxu1 %vm1008_vm4, %v6219_v6  ;;  %4103 = vmatprep.mubr.f32.mxu0 %v6476_v62  ;;  %v6486_v6 = vld [vmem:[#allocation3 + $0x70] sm:$0xff] }
 0x3d4   : > { %4855 = vmatpush3.bf16.msra.mxu1 %v4852_v35  ;;  %4318 = vmatprep.mubr.msk.f32.mxu1 %vm6809_vm5, %v6221_v9  ;;  %v4864_v9 = vpack.c.bf16 %v2316_v5, %v2315_v15  ;;  %v2320_v35 = vld [vmem:[#allocation11 + $0x368] sm:$0xff]  ;;  %vm6856_vm5 = vcmp.lt.s32.totalorder %v6278_v3, 15  ;;  %v2502_v15 = vld [vmem:[#allocation11 + $0x390] sm:$0xff]  ;;  %v2503_v5 = vld [vmem:[#allocation11 + $0x398] sm:$0xff] }
 0x3d5   : > { %4857 = vmatprep.subr.bf16.mxu1 %v4856_v41 }
 0x3d6   : > { %4104 = vmatmul.mubr.f32.gmra.mrb[30].mxu0 %v6486_v6 }
 0x3d7   : > { %4319 = vmatmul.mubr.msk.f32.gmra.mrb[4].mxu1 %vm6808_vm6, %v6233_v14  ;;  %4106 = vmatprep.mubr.f32.mxu0 %v6488_v20  ;;  %v6498_v14 = vld [vmem:[#allocation3 + $0x80] sm:$0xff]  ;;  %vm6853_vm6 = vcmp.lt.s32.totalorder %v6254_v46, 15 }
 0x3d8   : > { %4859 = vmatpush3.bf16.msra.mxu1 %v4856_v41  ;;  %4321 = vmatprep.mubr.msk.f32.mxu1 %vm6806_vm7, %v6239_v30  ;;  %vm6850_vm7 = vcmp.lt.s32.totalorder %v6224_v16, 15  ;;  %v4868_v30 = vpack.c.bf16 %v2318_v18, %v2317_v10  ;;  %v2500_v41 = vld [vmem:[#allocation11 + $0x380] sm:$0xff]  ;;  %v2505_v18 = vld [vmem:[#allocation11 + $0x3a8] sm:$0xff] }
 0x3d9   : > { %4861 = vmatprep.subr.bf16.mxu1 %v4860_v60  ;;  %v2504_v10 = vld [vmem:[#allocation11 + $0x3a0] sm:$0xff] }
 0x3da   : > { %4107 = vmatmul.mubr.f32.gmra.mrb[32].mxu0 %v6498_v14 }
 0x3db   : > { %4322 = vmatmul.mubr.msk.f32.gmra.mrb[6].mxu1 %vm6807_vm8, %v6251_v29  ;;  %4109 = vmatprep.mubr.f32.mxu0 %v6500_v22  ;;  %vm6851_vm8 = vcmp.lt.s32.totalorder %v6236_v25, 15  ;;  %v6510_v29 = vld [vmem:[#allocation3 + $0x90] sm:$0xff] }
 0x3dc   : > { %4863 = vmatpush3.bf16.msra.mxu1 %v4860_v60  ;;  %4324 = vmatprep.mubr.msk.f32.mxu1 %vm6850_vm7, %v6257_v51  ;;  %vm6852_vm7 = vcmp.lt.s32.totalorder %v6242_v32, 15  ;;  %v4872_v51 = vpack.c.bf16 %v2320_v35, %v2319_v23  ;;  %v4880_v60 = vpack.c.bf16 %v2501_v59, %v2500_v41  ;;  %v2506_v23 = vld [vmem:[#allocation11 + $0x3b0] sm:$0xff]  ;;  %v2507_v35 = vld [vmem:[#allocation11 + $0x3b8] sm:$0xff]  ;;  %v2709_v41 = vld [vmem:[#allocation11 + $0x400] sm:$0xff] }
 0x3dd   : > { %4865 = vmatprep.subr.bf16.mxu1 %v4864_v9  ;;  %v2710_v59 = vld [vmem:[#allocation11 + $0x408] sm:$0xff] }
 0x3de   : > { %4110 = vmatmul.mubr.f32.gmra.mrb[34].mxu0 %v6510_v29 }
 0x3df   : > { %4325 = vmatmul.mubr.msk.f32.gmra.mrb[8].mxu1 %vm6851_vm8, %v6269_v50  ;;  %vm6854_vm8 = vcmp.lt.s32.totalorder %v6260_v55, 15  ;;  %v6519_v50 = vld [vmem:[#allocation3 + $0x89] sm:$0xff] }
 0x3e0   : > { %4867 = vmatpush3.bf16.msra.mxu1 %v4864_v9  ;;  %4327 = vmatprep.mubr.msk.f32.mxu1 %vm6852_vm7, %v6275_v2  ;;  %v4876_v2 = vpack.c.bf16 %v2322_v44, %v2321_v43  ;;  %vm6855_vm7 = vcmp.lt.s32.totalorder %v6272_v63, 15  ;;  %v4884_v9 = vpack.c.bf16 %v2503_v5, %v2502_v15  ;;  %v2511_v43 = vld [vmem:[#allocation11 + $0x3d8] sm:$0xff]  ;;  %v2513_v44 = vld [vmem:[#allocation11 + $0x3e8] sm:$0xff]  ;;  %v2713_v5 = vld [vmem:[#allocation11 + $0x420] sm:$0xff] }
 0x3e1   : > { %4869 = vmatprep.subr.bf16.mxu1 %v4868_v30  ;;  %v2712_v15 = vld [vmem:[#allocation11 + $0x418] sm:$0xff] }
 0x3e3   : > { %4328 = vmatmul.mubr.msk.f32.gmra.mrb[10].mxu1 %vm6853_vm6, %v6287_v36  ;;  %vm6857_vm6 = vcmp.lt.s32.totalorder %v6290_v24, 15 }
 0x3e4   : > { %4871 = vmatpush3.bf16.msra.mxu1 %v4868_v30  ;;  %4330 = vmatprep.mubr.msk.f32.mxu1 %vm6854_vm8, %v6294_v12  ;;  %vm6858_vm8 = vcmp.gt.s32.totalorder %v6136_v0, 0  ;;  %v4888_v30 = vpack.c.bf16 %v2505_v18, %v2504_v10  ;;  %v2715_v10 = vld [vmem:[#allocation11 + $0x430] sm:$0xff]  ;;  %v2716_v18 = vld [vmem:[#allocation11 + $0x438] sm:$0xff] }
 0x3e5   : > { %4873 = vmatprep.subr.bf16.mxu1 %v4872_v51 }
 0x3e7   : > { %4331 = vmatmul.mubr.msk.f32.gmra.mrb[12].mxu1 %vm6855_vm7, %v6304_v48  ;;  %vm6860_vm7 = vcmp.gt.s32.totalorder %v6163_v26, 0 }
 0x3e8   : > { %4875 = vmatpush3.bf16.msra.mxu1 %v4872_v51  ;;  %4333 = vmatprep.mubr.msk.f32.mxu1 %vm6856_vm5, %v6519_v50  ;;  %vm6859_vm5 = vcmp.gt.s32.totalorder %v6160_v52, 0  ;;  %v2509_v51 = vld [vmem:[#allocation11 + $0x3c8] sm:$0xff] }
 0x3e9   : > { %4877 = vmatprep.subr.bf16.mxu1 %v4876_v2  ;;  %v2683_v52 = vld [vmem:[#allocation3 + $0x59] sm:$0xff] }
 0x3eb   : > { %4334 = vmatmul.mubr.msk.f32.gmra.mrb[14].mxu1 %vm6857_vm6, %v6527_v61  ;;  %vm6861_vm6 = vcmp.gt.s32.totalorder %v6172_v13, 0  ;;  %v2685_v13 = vld [vmem:[#allocation3 + $0x69] sm:$0xff] }
 0x3ec   : > { %4879 = vmatpush3.bf16.msra.mxu1 %v4876_v2  ;;  %4368 = vmatprep.mubr.msk.f32.mxu1 %vm6858_vm8, %v6311_v27  ;;  %vm6862_vm8 = vcmp.gt.s32.totalorder %v6175_v53, 0  ;;  %v4892_v27 = vpack.c.bf16 %v2507_v35, %v2506_v23  ;;  %v2515_v2 = vld [vmem:[#allocation11 + $0x3f8] sm:$0xff]  ;;  %v2718_v23 = vld [vmem:[#allocation11 + $0x448] sm:$0xff] }
 0x3ed   : > { %4881 = vmatprep.subr.bf16.mxu1 %v4880_v60  ;;  %v2720_v35 = vld [vmem:[#allocation11 + $0x458] sm:$0xff] }
 0x3ef   : > { %4369 = vmatmul.mubr.msk.f32.vlgmr.msra.gmra.mrb[0].mxu1 %vm6859_vm5, %v6324_v42  ;;  %v2508_v42 = vld [vmem:[#allocation11 + $0x3c0] sm:$0xff]  ;;  %vm6863_vm5 = vcmp.gt.s32.totalorder %v6187_v57, 0 }
 0x3f0   : > { %4883 = vmatpush3.bf16.msra.mxu1 %v4880_v60  ;;  %4371 = vmatprep.mubr.msk.f32.mxu1 %vm6860_vm7, %v6327_v47  ;;  %vm6864_vm7 = vcmp.gt.s32.totalorder %v6196_v45, 0  ;;  %v4896_v47 = vpack.c.bf16 %v2509_v51, %v2508_v42  ;;  %v2711_v60 = vld [vmem:[#allocation11 + $0x410] sm:$0xff] }
 0x3f1   : > { %4885 = vmatprep.subr.bf16.mxu1 %v4884_v9  ;;  %v2926_v42 = vld [vmem:[#allocation14 + $0x8] sm:$0xff] }
 0x3f2   : > { %v2723_v51 = vld [vmem:[#allocation11 + $0x470] sm:$0xff] }
 0x3f3   : > { %4372 = vmatmul.mubr.msk.f32.gmra.mrb[2].mxu1 %vm6861_vm6, %v6341_v58  ;;  %v2510_v58 = vld [vmem:[#allocation11 + $0x3d0] sm:$0xff]  ;;  %vm6865_vm6 = vcmp.gt.s32.totalorder %v6224_v16, 0 }
 0x3f4   : > { %4887 = vmatpush3.bf16.msra.mxu1 %v4884_v9  ;;  %4374 = vmatprep.mubr.msk.f32.mxu1 %vm6862_vm8, %v6344_v1  ;;  %v4900_v1 = vpack.c.bf16 %v2511_v43, %v2510_v58  ;;  %v2714_v9 = vld [vmem:[#allocation11 + $0x428] sm:$0xff]  ;;  %v2928_v43 = vld [vmem:[#allocation14 + $0x18] sm:$0xff] }
 0x3f5   : > { %4889 = vmatprep.subr.bf16.mxu1 %v4888_v30 }
 0x3f7   : > { %4375 = vmatmul.mubr.msk.f32.gmra.mrb[4].mxu1 %vm6863_vm5, %v6359_v7  ;;  %v2512_v7 = vld [vmem:[#allocation11 + $0x3e0] sm:$0xff] }
 0x3f8   : > { %4891 = vmatpush3.bf16.msra.mxu1 %v4888_v30  ;;  %4377 = vmatprep.mubr.msk.f32.mxu1 %vm6864_vm7, %v6362_v11  ;;  %v4904_v11 = vpack.c.bf16 %v2513_v44, %v2512_v7  ;;  %v2717_v30 = vld [vmem:[#allocation11 + $0x440] sm:$0xff]  ;;  %v2677_v7 = vld [vmem:[#allocation3 + $0x29] sm:$0xff]  ;;  %v2930_v44 = vld [vmem:[#allocation14 + $0x28] sm:$0xff] }
 0x3f9   : > { %4893 = vmatprep.subr.bf16.mxu1 %v4892_v27 }
 0x3fb   : > { %4378 = vmatmul.mubr.msk.f32.gmra.mrb[6].mxu1 %vm996_vm3, %v6377_v19  ;;  %v2514_v19 = vld [vmem:[#allocation11 + $0x3f0] sm:$0xff]  ;;  %vm6869_vm3 = vcmp.lt.s32.totalorder %v6213_v4, 15 }
 0x3fc   : > { %4895 = vmatpush3.bf16.msra.mxu1 %v4892_v27  ;;  %4380 = vmatprep.mubr.msk.f32.mxu1 %vm6865_vm6, %v6380_v37  ;;  %v2289_v37 = vld [vmem:[#allocation3 + $0x97] sm:$0xff] }
 0x3fd   : > { %4897 = vmatprep.subr.bf16.mxu1 %v4896_v47  ;;  %v2722_v27 = vld [vmem:[#allocation11 + $0x468] sm:$0xff] }
 0x3fe   : > { %v2938_v4 = vld [vmem:[#allocation14 + $0x68] sm:$0xff] }
 0x3ff   : > { %4381 = vmatmul.mubr.msk.f32.gmra.mrb[8].mxu1 %vm998_vm13, %v6395_v40  ;;  %v4908_v40 = vpack.c.bf16 %v2515_v2, %v2514_v19  ;;  %v2679_v19 = vld [vmem:[#allocation3 + $0x39] sm:$0xff]  ;;  %v2931_v2 = vld [vmem:[#allocation14 + $0x30] sm:$0xff]  ;;  %vm6875_vm13 = vcmp.lt.s32.totalorder %v6272_v63, 15 }
 0x400   : > { %4899 = vmatpush3.bf16.msra.mxu1 %v4896_v47  ;;  %4383 = vmatprep.mubr.msk.f32.mxu1 %vm999_vm15, %v6398_v28  ;;  %v2290_v28 = vld [vmem:[#allocation3 + $0x9f] sm:$0xff]  ;;  %v2724_v47 = vld [vmem:[#allocation11 + $0x478] sm:$0xff]  ;;  %vm6877_vm15 = vcmp.lt.s32.totalorder %v6290_v24, 15 }
 0x401   : > { %4901 = vmatprep.subr.bf16.mxu1 %v4900_v1 }
 0x403   : > { %4384 = vmatmul.mubr.msk.f32.gmra.mrb[10].mxu1 %vm1000_vm14, %v6413_v56  ;;  %v4912_v56 = vpack.c.bf16 %v2710_v59, %v2709_v41  ;;  %v2681_v41 = vld [vmem:[#allocation3 + $0x49] sm:$0xff]  ;;  %v2933_v59 = vld [vmem:[#allocation14 + $0x40] sm:$0xff]  ;;  %vm6876_vm14 = vcmp.lt.s32.totalorder %v6278_v3, 15 }
 0x404   : > { %4903 = vmatpush3.bf16.msra.mxu1 %v4900_v1  ;;  %4386 = vmatprep.mubr.msk.f32.mxu1 %vm1001_vm10, %v6425_v31  ;;  %v4916_v31 = vpack.c.bf16 %v2712_v15, %v2711_v60  ;;  %v2499_v1 = vld [vmem:[#allocation3 + $0xa0] sm:$0xff]  ;;  %v2936_v15 = vld [vmem:[#allocation14 + $0x58] sm:$0xff]  ;;  %vm6872_vm10 = vcmp.lt.s32.totalorder %v6242_v32, 15 }
 0x405   : > { %4905 = vmatprep.subr.bf16.mxu1 %v4904_v11  ;;  %v2935_v60 = vld [vmem:[#allocation14 + $0x50] sm:$0xff]  ;;  %v2940_v32 = vld [vmem:[#allocation14 + $0x78] sm:$0xff] }
 0x406   : > { %v4964_v26 = vpack.c.bf16 %v2936_v15, %v2935_v60 }
 0x407   : > { %4387 = vmatmul.mubr.msk.f32.gmra.mrb[12].mxu1 %vm1002_vm9, %v6436_v17  ;;  %v4920_v17 = vpack.c.bf16 %v2714_v9, %v2713_v5  ;;  %vm6871_vm9 = vcmp.lt.s32.totalorder %v6236_v25, 15  ;;  %v2939_v25 = vld [vmem:[#allocation14 + $0x70] sm:$0xff] }
 0x408   : > { %4907 = vmatpush3.bf16.msra.mxu1 %v4904_v11  ;;  %4389 = vmatprep.mubr.msk.f32.mxu1 %vm1003_vm12, %v2289_v37  ;;  %v2678_v11 = vld [vmem:[#allocation3 + $0x31] sm:$0xff]  ;;  %vm6874_vm12 = vcmp.lt.s32.totalorder %v6260_v55, 15 }
 0x409   : > { %4909 = vmatprep.subr.bf16.mxu1 %v4908_v40 }
 0x40b   : > { %4390 = vmatmul.mubr.msk.f32.gmra.mrb[14].mxu1 %vm1004_vm11, %v2290_v28  ;;  %v2934_v28 = vld [vmem:[#allocation14 + $0x48] sm:$0xff]  ;;  %vm6873_vm11 = vcmp.lt.s32.totalorder %v6254_v46, 15  ;;  %v4972_v46 = vpack.c.bf16 %v2940_v32, %v2939_v25 }
 0x40c   : > { %4911 = vmatpush3.bf16.msra.mxu1 %v4908_v40  ;;  %4424 = vmatprep.mubr.f32.mxu1 %v6427_v8  ;;  %v4924_v8 = vpack.c.bf16 %v2716_v18, %v2715_v10  ;;  %v2680_v40 = vld [vmem:[#allocation3 + $0x41] sm:$0xff]  ;;  %v4960_v0 = vpack.c.bf16 %v2934_v28, %v2933_v59 }
 0x40d   : > { %4913 = vmatprep.subr.bf16.mxu1 %v4912_v56 }
 0x40f   : > { %4425 = vmatmul.mubr.f32.vlgmr.msra.gmra.mrb[0].mxu1 %v6438_v34  ;;  %v4928_v34 = vpack.c.bf16 %v2718_v23, %v2717_v30 }
 0x410   : > { %4915 = vmatpush3.bf16.msra.mxu1 %v4912_v56  ;;  %4427 = vmatprep.mubr.f32.mxu1 %v6440_v21  ;;  %v2719_v21 = vld [vmem:[#allocation11 + $0x450] sm:$0xff]  ;;  %v2682_v56 = vld [vmem:[#allocation3 + $0x51] sm:$0xff] }
 0x411   : > { %4917 = vmatprep.subr.bf16.mxu1 %v4916_v31 }
 0x413   : > { %4428 = vmatmul.mubr.f32.gmra.mrb[2].mxu1 %v6450_v38  ;;  %v4932_v38 = vpack.c.bf16 %v2720_v35, %v2719_v21 }
 0x414   : > { %4919 = vmatpush3.bf16.msra.mxu1 %v4916_v31  ;;  %4430 = vmatprep.mubr.f32.mxu1 %v6452_v39  ;;  %v2721_v39 = vld [vmem:[#allocation11 + $0x460] sm:$0xff]  ;;  %v2684_v31 = vld [vmem:[#allocation3 + $0x61] sm:$0xff] }
 0x415   : > { %4921 = vmatprep.subr.bf16.mxu1 %v4920_v17 }
 0x417   : > { %4431 = vmatmul.mubr.f32.gmra.mrb[4].mxu1 %v6462_v33  ;;  %v4936_v33 = vpack.c.bf16 %v2722_v27, %v2721_v39 }
 0x418   : > { %4923 = vmatpush3.bf16.msra.mxu1 %v4920_v17  ;;  %4433 = vmatprep.mubr.f32.mxu1 %v6464_v54  ;;  %v2925_v54 = vld [vmem:[#allocation14] sm:$0xff] }
 0x419   : > { %4925 = vmatprep.subr.bf16.mxu1 %v4924_v8  ;;  %v4944_v58 = vpack.c.bf16 %v2926_v42, %v2925_v54 }
 0x41b   : > { %4434 = vmatmul.mubr.f32.gmra.mrb[6].mxu1 %v6474_v49  ;;  %v2498_v49 = vld [vmem:[#allocation3 + $0x98] sm:$0xff]  ;;  %4945 = vmatprep.subr.bf16.mxu0 %v4944_v58 }
 0x41c   : > { %4927 = vmatpush3.bf16.msra.mxu1 %v4924_v8  ;;  %4436 = vmatprep.mubr.f32.mxu1 %v6476_v62  ;;  %v4940_v62 = vpack.c.bf16 %v2724_v47, %v2723_v51 }
 0x41d   : > { %4929 = vmatprep.subr.bf16.mxu1 %v4928_v34  ;;  %4947 = vmatpush3.bf16.msra.mxu0 %v4944_v58 }
 0x41f   : > { %4437 = vmatmul.mubr.f32.gmra.mrb[8].mxu1 %v6486_v6  ;;  %v2927_v6 = vld [vmem:[#allocation14 + $0x10] sm:$0xff] }
 0x420   : > { %4931 = vmatpush3.bf16.msra.mxu1 %v4928_v34  ;;  %4439 = vmatprep.mubr.f32.mxu1 %v6488_v20  ;;  %v4948_v20 = vpack.c.bf16 %v2928_v43, %v2927_v6  ;;  %v6635_v34 = vld [vmem:[#allocation13] ss:$0 sm:$0xff] }
 0x421   : > { %4933 = vmatprep.subr.bf16.mxu1 %v4932_v38 }
 0x422   : > { %4949 = vmatprep.subr.bf16.mxu0 %v4948_v20 }
 0x423   : > { %4440 = vmatmul.mubr.f32.gmra.mrb[10].mxu1 %v6498_v14  ;;  %v2929_v14 = vld [vmem:[#allocation14 + $0x20] sm:$0xff]  ;;  %4951 = vmatpush3.bf16.msra.mxu0 %v4948_v20 }
 0x424   : > { %4935 = vmatpush3.bf16.msra.mxu1 %v4932_v38  ;;  %4442 = vmatprep.mubr.f32.mxu1 %v6500_v22  ;;  %v4952_v22 = vpack.c.bf16 %v2930_v44, %v2929_v14 }
 0x425   : > { %4937 = vmatprep.subr.bf16.mxu1 %v4936_v33 }
 0x426   : > { %4953 = vmatprep.subr.bf16.mxu0 %v4952_v22 }
 0x427   : > { %4443 = vmatmul.mubr.f32.gmra.mrb[12].mxu1 %v6510_v29  ;;  %v2932_v29 = vld [vmem:[#allocation14 + $0x38] sm:$0xff]  ;;  %4955 = vmatpush3.bf16.msra.mxu0 %v4952_v22 }
 0x428   : > { %4939 = vmatpush3.bf16.msra.mxu1 %v4936_v33  ;;  %4445 = vmatprep.mubr.f32.mxu1 %v2498_v49  ;;  %v4956_v37 = vpack.c.bf16 %v2932_v29, %v2931_v2 }
 0x429   : > { %4941 = vmatprep.subr.bf16.mxu1 %v4940_v62 }
 0x42a   : > { %4957 = vmatprep.subr.bf16.mxu0 %v4956_v37 }
 0x42b   : > { %4446 = vmatmul.mubr.f32.gmra.mrb[14].mxu1 %v2499_v1  ;;  %4959 = vmatpush3.bf16.msra.mxu0 %v4956_v37 }
 0x42c   : > { %4943 = vmatpush3.bf16.msra.mxu1 %v4940_v62  ;;  %4480 = vmatprep.mubr.msk.f32.mxu1 %vm1005_vm0, %v2677_v7  ;;  %vm6866_vm0 = vcmp.lt.s32.totalorder %v6175_v53, 15  ;;  %v2691_v53 = vld [vmem:[#allocation3 + $0x99] sm:$0xff] }
 0x42d   : > { %4961 = vmatprep.subr.bf16.mxu0 %v4960_v0 }
 0x42f   : > { %4481 = vmatmul.mubr.msk.f32.vlgmr.msra.gmra.mrb[0].mxu1 %vm1006_vm1, %v2678_v11  ;;  %4963 = vmatpush3.bf16.msra.mxu0 %v4960_v0  ;;  %vm6867_vm1 = vcmp.lt.s32.totalorder %v6187_v57, 15  ;;  %v2692_v57 = vld [vmem:[#allocation3 + $0xa1] sm:$0xff] }
 0x430   : > { %4483 = vmatprep.mubr.msk.f32.mxu1 %vm1007_vm2, %v2679_v19  ;;  %vm6868_vm2 = vcmp.lt.s32.totalorder %v6196_v45, 15  ;;  %4965 = vmatprep.subr.bf16.mxu0 %v4964_v26  ;;  %v2937_v45 = vld [vmem:[#allocation14 + $0x60] sm:$0xff] }
 0x433   : > { %4484 = vmatmul.mubr.msk.f32.gmra.mrb[2].mxu1 %vm1008_vm4, %v2680_v40  ;;  %4967 = vmatpush3.bf16.msra.mxu0 %v4964_v26  ;;  %vm6870_vm4 = vcmp.lt.s32.totalorder %v6224_v16, 15  ;;  %v4968_v16 = vpack.c.bf16 %v2938_v4, %v2937_v45 }
 0x434   : > { %4486 = vmatprep.mubr.msk.f32.mxu1 %vm6866_vm0, %v2681_v41 }
 0x435   : > { %4969 = vmatprep.subr.bf16.mxu0 %v4968_v16 }
 0x437   : > { %4487 = vmatmul.mubr.msk.f32.gmra.mrb[4].mxu1 %vm6867_vm1, %v2682_v56  ;;  %4971 = vmatpush3.bf16.msra.mxu0 %v4968_v16 }
 0x438   : > { %4489 = vmatprep.mubr.msk.f32.mxu1 %vm6868_vm2, %v2683_v52  ;;  %4973 = vmatprep.subr.bf16.mxu0 %v4972_v46 }
 0x43b   : > { %4490 = vmatmul.mubr.msk.f32.gmra.mrb[6].mxu1 %vm6869_vm3, %v2684_v31  ;;  %4975 = vmatpush3.bf16.msra.mxu0 %v4972_v46 }
 0x43c   : > { %4492 = vmatprep.mubr.msk.f32.mxu1 %vm6870_vm4, %v2685_v13 }
 0x43f   : > { %4493 = vmatmul.mubr.msk.f32.gmra.mrb[8].mxu1 %vm6871_vm9, %v6287_v36 }
 0x440   : > { %4495 = vmatprep.mubr.msk.f32.mxu1 %vm6872_vm10, %v6294_v12 }
 0x443   : > { %4496 = vmatmul.mubr.msk.f32.gmra.mrb[10].mxu1 %vm6873_vm11, %v6304_v48 }
 0x444   : > { %4498 = vmatprep.mubr.msk.f32.mxu1 %vm6874_vm12, %v6519_v50 }
 0x447   : > { %4499 = vmatmul.mubr.msk.f32.gmra.mrb[12].mxu1 %vm6875_vm13, %v6527_v61 }
 0x448   : > { %4501 = vmatprep.mubr.msk.f32.mxu1 %vm6876_vm14, %v2691_v53 }
 0x44b   : > { %4502 = vmatmul.mubr.msk.f32.gmra.mrb[14].mxu1 %vm6877_vm15, %v2692_v57 }
 0x495   : > { %v4090_v55 = vpop.f32.mrb[20].mxu0 }
 0x496   : > { %v1344_v63 = vpop.f32.mrb[21].mxu0 }
 0x499   : > { %v4093_v36 = vpop.f32.mrb[22].mxu0 }
 0x49a   : > { %v1354_v12 = vpop.f32.mrb[23].mxu0 }
 0x49d   : > { %v4096_v3 = vpop.f32.mrb[24].mxu0 }
 0x49e   : > { %v1364_v48 = vpop.f32.mrb[25].mxu0 }
 0x4a1   : > { %v4099_v50 = vpop.f32.mrb[26].mxu0 }
 0x4a2   : > { %v1374_v61 = vpop.f32.mrb[27].mxu0 }
 0x4a5   : > { %v4102_v24 = vpop.f32.mrb[28].mxu0 }
 0x4a6   : > { %v1384_v5 = vpop.f32.mrb[29].mxu0 }
 0x4a9   : > { %v4105_v9 = vpop.f32.mrb[30].mxu0 }
 0x4aa   : > { %v1394_v17 = vpop.f32.mrb[31].mxu0 }
 0x4ad   : > { %v4108_v10 = vpop.f32.mrb[32].mxu0 }
 0x4ae   : > { %v6629_v18 = vpop.f32.mrb[33].mxu0 }
 0x4b1   : > { %v6631_v8 = vpop.f32.mrb[34].mxu0 }
 0x4b2   : > { %v6633_v30 = vpop.f32.mrb[35].mxu0 }
 0x502   : > { %v4482_v23 = vpop.f32.mrb[0].mxu1 }
 0x503   : > { %v4976_v21 = vadd.f32 %v4482_v23, %v4090_v55  ;;  %v2791_v35 = vpop.f32.mrb[1].mxu1 }
 0x504   : > { %v4977_v38 = vadd.f32 %v2791_v35, %v1344_v63 }
 0x505   : > { %v2894_v39 = vadd.f32 %v4976_v21, %v6635_v34 }
 0x506   : > { %v2893_v27 = vadd.f32 %v4977_v38, %v6635_v34  ;;  %v4485_v33 = vpop.f32.mrb[2].mxu1 }
 0x507   : > { %v4978_v54 = vadd.f32 %v4485_v33, %v4093_v36  ;;  %v2801_v42 = vpop.f32.mrb[3].mxu1  ;;  %v2910_v58 = vmax.f32 %v2894_v39, 0.0  ;;  %v3094_v39 = vld [vmem:[%s6009_s16 + $0x8] sm:$0xff]  ;;  %v3093_v33 = vld [vmem:[%s6009_s16] sm:$0xff] }
 0x508   : > { %v2909_v51 = vmax.f32 %v2893_v27, 0.0  ;;  %v4979_v47 = vadd.f32 %v2801_v42, %v1354_v12 }
 0x509   : > { %v2896_v49 = vadd.f32 %v4978_v54, %v6635_v34 }
 0x50a   : > { %v2895_v62 = vadd.f32 %v4979_v47, %v6635_v34  ;;  %v4488_v6 = vpop.f32.mrb[4].mxu1  ;;  %4536 = vmatprep.mubr.f32.mxu0 %v2909_v51  ;;  %v3096_v47 = vld [vmem:[%s6009_s16 + $0x18] sm:$0xff] }
 0x50b   : > { %v4980_v43 = vadd.f32 %v4488_v6, %v4096_v3  ;;  %v2811_v20 = vpop.f32.mrb[5].mxu1  ;;  %4537 = vmatmul.mubr.f32.vlgmr.msra.gmra.mrb[36].mxu0 %v2910_v58  ;;  %v2912_v14 = vmax.f32 %v2896_v49, 0.0  ;;  %v3095_v6 = vld [vmem:[%s6009_s16 + $0x10] sm:$0xff] }
 0x50c   : > { %v2911_v1 = vmax.f32 %v2895_v62, 0.0  ;;  %v4981_v7 = vadd.f32 %v2811_v20, %v1364_v48 }
 0x50d   : > { %v2898_v44 = vadd.f32 %v4980_v43, %v6635_v34 }
 0x50e   : > { %v2897_v22 = vadd.f32 %v4981_v7, %v6635_v34  ;;  %v4491_v11 = vpop.f32.mrb[6].mxu1  ;;  %4539 = vmatprep.mubr.f32.mxu0 %v2911_v1 }
 0x50f   : > { %v4982_v19 = vadd.f32 %v4491_v11, %v4099_v50  ;;  %v2821_v2 = vpop.f32.mrb[7].mxu1  ;;  %4540 = vmatmul.mubr.f32.gmra.mrb[38].mxu0 %v2912_v14  ;;  %v2914_v40 = vmax.f32 %v2898_v44, 0.0  ;;  %v3098_v44 = vld [vmem:[%s6009_s16 + $0x28] sm:$0xff] }
 0x510   : > { %v2913_v29 = vmax.f32 %v2897_v22, 0.0  ;;  %v4983_v37 = vadd.f32 %v2821_v2, %v1374_v61  ;;  %v3097_v2 = vld [vmem:[%s6009_s16 + $0x20] sm:$0xff] }
 0x511   : > { %v2900_v41 = vadd.f32 %v4982_v19, %v6635_v34 }
 0x512   : > { %v2899_v59 = vadd.f32 %v4983_v37, %v6635_v34  ;;  %v4494_v28 = vpop.f32.mrb[8].mxu1  ;;  %4542 = vmatprep.mubr.f32.mxu0 %v2913_v29 }
 0x513   : > { %v4984_v0 = vadd.f32 %v4494_v28, %v4102_v24  ;;  %v2831_v56 = vpop.f32.mrb[9].mxu1  ;;  %4543 = vmatmul.mubr.f32.gmra.mrb[40].mxu0 %v2914_v40  ;;  %v2916_v15 = vmax.f32 %v2900_v41, 0.0  ;;  %v3100_v28 = vld [vmem:[%s6009_s16 + $0x38] sm:$0xff] }
 0x514   : > { %v2915_v52 = vmax.f32 %v2899_v59, 0.0  ;;  %v4985_v60 = vadd.f32 %v2831_v56, %v1384_v5 }
 0x515   : > { %v2902_v26 = vadd.f32 %v4984_v0, %v6635_v34 }
 0x516   : > { %v2901_v31 = vadd.f32 %v4985_v60, %v6635_v34  ;;  %v4497_v13 = vpop.f32.mrb[10].mxu1  ;;  %4545 = vmatprep.mubr.f32.mxu0 %v2915_v52  ;;  %v3099_v60 = vld [vmem:[%s6009_s16 + $0x30] sm:$0xff] }
 0x517   : > { %v4986_v53 = vadd.f32 %v4497_v13, %v4105_v9  ;;  %v2841_v57 = vpop.f32.mrb[11].mxu1  ;;  %4546 = vmatmul.mubr.f32.gmra.mrb[42].mxu0 %v2916_v15  ;;  %v2918_v16 = vmax.f32 %v2902_v26, 0.0 }
 0x518   : > { %v2917_v45 = vmax.f32 %v2901_v31, 0.0  ;;  %v4987_v4 = vadd.f32 %v2841_v57, %v1394_v17  ;;  %v3102_v57 = vld [vmem:[%s6009_s16 + $0x48] sm:$0xff] }
 0x519   : > { %v2904_v25 = vadd.f32 %v4986_v53, %v6635_v34 }
 0x51a   : > { %v2903_v32 = vadd.f32 %v4987_v4, %v6635_v34  ;;  %v4500_v46 = vpop.f32.mrb[12].mxu1  ;;  %4548 = vmatprep.mubr.f32.mxu0 %v2917_v45 }
 0x51b   : > { %v4988_v55 = vadd.f32 %v4500_v46, %v4108_v10  ;;  %v2851_v63 = vpop.f32.mrb[13].mxu1  ;;  %4549 = vmatmul.mubr.f32.gmra.mrb[44].mxu0 %v2918_v16  ;;  %v2920_v3 = vmax.f32 %v2904_v25, 0.0  ;;  %v3101_v25 = vld [vmem:[%s6009_s16 + $0x40] sm:$0xff] }
 0x51c   : > { %v2919_v36 = vmax.f32 %v2903_v32, 0.0  ;;  %v4989_v12 = vadd.f32 %v2851_v63, %v6629_v18 }
 0x51d   : > { %v2906_v48 = vadd.f32 %v4988_v55, %v6635_v34 }
 0x51e   : > { %v2905_v50 = vadd.f32 %v4989_v12, %v6635_v34  ;;  %v4503_v61 = vpop.f32.mrb[14].mxu1  ;;  %4551 = vmatprep.mubr.f32.mxu0 %v2919_v36  ;;  %v3104_v12 = vld [vmem:[%s6009_s16 + $0x58] sm:$0xff] }
 0x51f   : > { %v4990_v24 = vadd.f32 %v4503_v61, %v6631_v8  ;;  %v2861_v5 = vpop.f32.mrb[15].mxu1  ;;  %4552 = vmatmul.mubr.f32.gmra.mrb[46].mxu0 %v2920_v3  ;;  %v2922_v10 = vmax.f32 %v2906_v48, 0.0  ;;  %v6656_v8 = vld [vmem:[#allocation16] ss:$0 sm:$0xff]  ;;  %v3103_v61 = vld [vmem:[%s6009_s16 + $0x50] sm:$0xff] }
 0x520   : > { %v2921_v9 = vmax.f32 %v2905_v50, 0.0  ;;  %v4991_v17 = vadd.f32 %v2861_v5, %v6633_v30 }
 0x521   : > { %v2908_v23 = vadd.f32 %v4990_v24, %v6635_v34 }
 0x522   : > { %v2907_v18 = vadd.f32 %v4991_v17, %v6635_v34  ;;  %4554 = vmatprep.mubr.f32.mxu0 %v2921_v9 }
 0x523   : > { %4555 = vmatmul.mubr.f32.gmra.mrb[48].mxu0 %v2922_v10  ;;  %v2924_v35 = vmax.f32 %v2908_v23, 0.0  ;;  %v3106_v23 = vld [vmem:[%s6009_s16 + $0x68] sm:$0xff] }
 0x524   : > { %v2923_v21 = vmax.f32 %v2907_v18, 0.0 }
 0x526   : > { %4557 = vmatprep.mubr.f32.mxu0 %v2923_v21 }
 0x527   : > { %4558 = vmatmul.mubr.f32.gmra.mrb[50].mxu0 %v2924_v35 }
 0x5de   : > { %v4538_v38 = vpop.f32.mrb[36].mxu0 }
 0x5df   : > { %v3020_v30 = vadd.f32 %v4538_v38, %v6656_v8  ;;  %v3014_v27 = vpop.f32.mrb[37].mxu0  ;;  %v3105_v38 = vld [vmem:[%s6009_s16 + $0x60] sm:$0xff] }
 0x5e0   : > { %v3015_v34 = vadd.f32 %v6656_v8, %v3014_v27 }
 0x5e1   : > { %v3110_v54 = vadd.f32 %v3094_v39, %v3020_v30 }
 0x5e2   : > { %v3109_v42 = vadd.f32 %v3093_v33, %v3015_v34  ;;  %v4541_v51 = vpop.f32.mrb[38].mxu0 }
 0x5e3   : > { %v3126_v58 = vmax.f32 %v3110_v54, 0.0  ;;  %v3030_v49 = vadd.f32 %v4541_v51, %v6656_v8  ;;  %v3024_v62 = vpop.f32.mrb[39].mxu0  ;;  %v3108_v54 = vld [vmem:[%s6009_s16 + $0x78] sm:$0xff] }
 0x5e4   : > { %v3125_v43 = vmax.f32 %v3109_v42, 0.0  ;;  %v3025_v20 = vadd.f32 %v6656_v8, %v3024_v62 }
 0x5e5   : > { %3142 = vst [vmem:[%s6074_s20 + $0x8] sm:$0xff] %v3126_v58  ;;  %v3112_v1 = vadd.f32 %v3096_v47, %v3030_v49  ;;  %v3107_v58 = vld [vmem:[%s6009_s16 + $0x70] sm:$0xff]  ;;  %s3158_s16 = scalar_lea.sflag [#allocation7], %s6003_s25 }
 0x5e6   : > { %3141 = vst [vmem:[%s6074_s20] sm:$0xff] %v3125_v43  ;;  %v3111_v7 = vadd.f32 %v3095_v6, %v3025_v20  ;;  %v4544_v14 = vpop.f32.mrb[40].mxu0 }
 0x5e7   : > { %v3128_v22 = vmax.f32 %v3112_v1, 0.0  ;;  %v3040_v11 = vadd.f32 %v4544_v14, %v6656_v8  ;;  %v3034_v19 = vpop.f32.mrb[41].mxu0 }
 0x5e8   : > { %v3127_v29 = vmax.f32 %v3111_v7, 0.0  ;;  %v3035_v37 = vadd.f32 %v6656_v8, %v3034_v19 }
 0x5e9   : > { %3144 = vst [vmem:[%s6074_s20 + $0x18] sm:$0xff] %v3128_v22  ;;  %v3114_v40 = vadd.f32 %v3098_v44, %v3040_v11 }
 0x5ea   : > { %3143 = vst [vmem:[%s6074_s20 + $0x10] sm:$0xff] %v3127_v29  ;;  %v3113_v41 = vadd.f32 %v3097_v2, %v3035_v37  ;;  %v4547_v59 = vpop.f32.mrb[42].mxu0 }
 0x5eb   : > { %v3130_v0 = vmax.f32 %v3114_v40, 0.0  ;;  %v3050_v56 = vadd.f32 %v4547_v59, %v6656_v8  ;;  %v3044_v52 = vpop.f32.mrb[43].mxu0 }
 0x5ec   : > { %v3129_v15 = vmax.f32 %v3113_v41, 0.0  ;;  %v3045_v26 = vadd.f32 %v6656_v8, %v3044_v52 }
 0x5ed   : > { %3146 = vst [vmem:[%s6074_s20 + $0x28] sm:$0xff] %v3130_v0  ;;  %v3116_v31 = vadd.f32 %v3100_v28, %v3050_v56 }
 0x5ee   : > { %3145 = vst [vmem:[%s6074_s20 + $0x20] sm:$0xff] %v3129_v15  ;;  %v3115_v13 = vadd.f32 %v3099_v60, %v3045_v26  ;;  %v4550_v53 = vpop.f32.mrb[44].mxu0 }
 0x5ef   : > { %v3132_v45 = vmax.f32 %v3116_v31, 0.0  ;;  %v3060_v4 = vadd.f32 %v4550_v53, %v6656_v8  ;;  %v3054_v16 = vpop.f32.mrb[45].mxu0 }
 0x5f0   : > { %v3131_v32 = vmax.f32 %v3115_v13, 0.0  ;;  %v3055_v46 = vadd.f32 %v6656_v8, %v3054_v16 }
 0x5f1   : > { %3148 = vst [vmem:[%s6074_s20 + $0x38] sm:$0xff] %v3132_v45  ;;  %v3118_v55 = vadd.f32 %v3102_v57, %v3060_v4 }
 0x5f2   : > { %3147 = vst [vmem:[%s6074_s20 + $0x30] sm:$0xff] %v3131_v32  ;;  %v3117_v63 = vadd.f32 %v3101_v25, %v3055_v46  ;;  %v4553_v36 = vpop.f32.mrb[46].mxu0 }
 0x5f3   : > { %v3134_v3 = vmax.f32 %v3118_v55, 0.0  ;;  %v3070_v48 = vadd.f32 %v4553_v36, %v6656_v8  ;;  %v3064_v50 = vpop.f32.mrb[47].mxu0 }
 0x5f4   : > { %v3133_v24 = vmax.f32 %v3117_v63, 0.0  ;;  %v3065_v5 = vadd.f32 %v6656_v8, %v3064_v50 }
 0x5f5   : > { %3150 = vst [vmem:[%s6074_s20 + $0x48] sm:$0xff] %v3134_v3  ;;  %v3120_v9 = vadd.f32 %v3104_v12, %v3070_v48 }
 0x5f6   : > { %3149 = vst [vmem:[%s6074_s20 + $0x40] sm:$0xff] %v3133_v24  ;;  %v3119_v17 = vadd.f32 %v3103_v61, %v3065_v5  ;;  %v4556_v10 = vpop.f32.mrb[48].mxu0 }
 0x5f7   : > { %v3136_v18 = vmax.f32 %v3120_v9, 0.0  ;;  %v3080_v21 = vadd.f32 %v4556_v10, %v6656_v8  ;;  %v3074_v35 = vpop.f32.mrb[49].mxu0 }
 0x5f8   : > { %v3135_v39 = vmax.f32 %v3119_v17, 0.0  ;;  %v3075_v30 = vadd.f32 %v6656_v8, %v3074_v35 }
 0x5f9   : > { %3152 = vst [vmem:[%s6074_s20 + $0x58] sm:$0xff] %v3136_v18  ;;  %v3122_v27 = vadd.f32 %v3106_v23, %v3080_v21 }
 0x5fa   : > { %3151 = vst [vmem:[%s6074_s20 + $0x50] sm:$0xff] %v3135_v39  ;;  %v3121_v33 = vadd.f32 %v3105_v38, %v3075_v30  ;;  %v4559_v34 = vpop.f32.mrb[50].mxu0 }
 0x5fb   : > { %v3138_v42 = vmax.f32 %v3122_v27, 0.0  ;;  %v3090_v51 = vadd.f32 %v4559_v34, %v6656_v8  ;;  %v3084_v47 = vpop.f32.mrb[51].mxu0 }
 0x5fc   : > { %v3137_v49 = vmax.f32 %v3121_v33, 0.0  ;;  %v3085_v62 = vadd.f32 %v6656_v8, %v3084_v47 }
 0x5fd   : > { %3154 = vst [vmem:[%s6074_s20 + $0x68] sm:$0xff] %v3138_v42  ;;  %v3124_v6 = vadd.f32 %v3108_v54, %v3090_v51 }
 0x5fe   : > { %3153 = vst [vmem:[%s6074_s20 + $0x60] sm:$0xff] %v3137_v49  ;;  %v3123_v43 = vadd.f32 %v3107_v58, %v3085_v62 }
 0x5ff   : > { %v3140_v20 = vmax.f32 %v3124_v6, 0.0 }
 0x600   : > { %v3139_v1 = vmax.f32 %v3123_v43, 0.0 }
 0x601   : > { %3156 = vst [vmem:[%s6074_s20 + $0x78] sm:$0xff] %v3140_v20 }
 0x602   : > { %3155 = vst [vmem:[%s6074_s20 + $0x70] sm:$0xff] %v3139_v1 }
 0x603   : > { %5543 = shalt.err (!%p5540_p1)
}
 0x604   : > { %s5544_s7 = scalar_lea.hbm %s6710_s13, 2048  ;;  %s5548_s4 = scalar_lea.hbm %s6881_s21, 8192 }
 0x605   : > { %p5545_p11 = scmp.ne.s32.totalorder %s6710_s13, %s5544_s7  ;;  %p5549_p0 = scmp.lt.u32.totalorder %s6710_s13, %s6881_s21 }
 0x606   : > { %p5550_p3 = scmp.lt.u32.totalorder %s5548_s4, %s5544_s7  ;;  %p5552_p2 = scmp.lt.u32.totalorder %s5544_s7, %s6710_s13 }
 0x607   : > { %p5546_p12 = pnand %p5545_p11, %p6882_p10 }
 0x608   : > { %p5551_p4 = por %p5550_p3, %p5549_p0 }
 0x609   : > { %p5547_p13 = pneg %p5546_p12 }
 0x60a   : > { %p5553_p7 = por %p5552_p2, %p5551_p4 }
 0x60c   : > { %p5554_p5 = pnand %p5553_p7, %p5547_p13 }
 0x60e   : > { %5557 = shalt.err (!%p5554_p5)
}
 0x60f   : > { %s5661_s23 = smov 128   ;;  %s5662_s0 = smov 8  }
 0x610   : > { %5162 = dma.vmem_to_hbm [thread:$0]  (%p6882_p10), %s6712_s9, 2048, %s6710_s13, %s3158_s16, %s5661_s23, %s5661_s23, %s5662_s0  }
 0x611 PF: > { %p5204_p6 = scmp.ge.s32.totalorder %s5644_s12, 2  ;;  %s3188_s6 = sand.u32 1, %s5616_s27  }
 0x612   : > { %p6883_p8 = scmp.ne.s32.totalorder %s6838_s26, 0  ;;  %s3189_s18 = scalar_lea.sflag [#allocation7], %s3188_s6 }
 0x614   : > { %p5188_p9 = pnand %p5204_p6, %p6883_p8 }
 0x616   : > { %5611 = dma.done.wait (!%p5188_p9), %s3189_s18, 2048  }
 0x617   : > { %5613 = vsyncadd (!%p5188_p9), %s3189_s18, 4294965248  ;;  %s27_s12 = sadd.s32 1, %s5644_s12   ;;  %s6884_s17 = sld [smem:[#allocation33_spill]] }
 0x618   : > { %p24_p1 = scmp.ge.s32.totalorder %s27_s12, 6   ;;  %s6885_s25 = sld [smem:[#allocation34_spill]] }
 0x619   : > { %s6886_s27 = smov %s5620_s28  ;;  %s6887_s28 = smov %s5624_s29 }
 0x61a   : > { %s6888_s29 = smov %s5951_s8  ;;  %s6889_s30 = smov %s5636_s10 }
 0x61b   : > { %s6890_s9 = smov %s5640_s11  ;;  %26 = sbr.rel (!%p24_p1) target bundleno = 20 (0x14), region = 138 }
 0x61d   : > { %s6891_s10 = smov %s6884_s17 }
 0x61e   : > { %s6892_s11 = smov %s6885_s25 }
 0x622   :  { %3194 = vsyncpa [#allocation6], 1 }
 0x623   :  { %3196 = vsyncpa [#allocation6 + $0x1], 1 }
 0x624   :  { %3197 = vsyncpa [#allocation9], 1 }
 0x625   :  { %3198 = vsyncpa [#allocation12], 1 }
 0x626   :  { %3199 = vsyncpa [#allocation15], 1 }
 0x627   :  { %3200 = vsyncpa [#allocation7], 1 }
 0x628   :  { %3202 = vsyncpa [#allocation7 + $0x1], 1 }
 0x629   :  { %3203 = vsyncmov [#allocation4] }
 0x62c   :  { %s3204_s26 = vpop.sfrf %3203 }
 0x62d   :  { %p3482_p10 = scmp.ne.s32.totalorder %s3204_s26, 0 }
 0x62f   :  { %3208 = shalt.err (%p3482_p10)  }
 0x630   :  { %3210 = vsyncmov [#allocation4 + $0x1] }
 0x633   :  { %s3211_s8 = vpop.sfrf %3210 }
 0x634   :  { %p3483_p11 = scmp.ne.s32.totalorder %s3211_s8, 0 }
 0x636   :  { %3215 = shalt.err (%p3483_p11)  }

</bundles_post_ra>
